<compile_context>
chip_gen: v7x
topology: tpu7x:2x2x1
jax: 0.10.0
libtpu: 0.0.40
codegen_flags: <defaults>
</compile_context>

<pallas_src>
import functools

import jax
import jax.numpy as jnp
from jax.experimental import pallas as pl
from jax.experimental.pallas import tpu as pltpu


# For a k=4, s=2, p=1 ConvTranspose, a second such layer only ever reads the
# first layer's phase tensors A_r at these (phase r, spatial offset d) combos.
_COMBOS = ((0, 0), (1, 0), (1, -1), (0, 1))
_U_TO_COMBO = {-1: 2, 0: 0, 1: 1, 2: 3}


# ----------------------------------------------------------------------------
# Fused kernel: whole decoder for one batch element.
# ----------------------------------------------------------------------------
def _decoder_kernel(x_ref, w1_ref, b1_ref, w3_ref, wp_ref,
                    wd1_ref, bd1_ref, wd2_ref, bd2_ref,
                    o_ref,
                    xin_pad, act_pad, a_pad,
                    *, compute_dtype):
    _, H, W, Cin = x_ref.shape
    Ch = act_pad.shape[-1]        # num_hiddens
    C1 = a_pad.shape[-1]          # num_hiddens // 2
    L = w3_ref.shape[0]           # num residual layers
    HW = H * W
    cd = compute_dtype

    def mm(a, b):
        return jnp.dot(a.astype(cd), b.astype(cd),
                       preferred_element_type=jnp.float32)

    def im2col(xp, k, oy=0, ox=0):
        # xp: spatially padded (H+2, W+2, C) value -> (H*W, k*k*C) patch matrix
        c = xp.shape[-1]
        cols = [xp[oy + dy:oy + dy + H, ox + dx:ox + dx + W, :].reshape(HW, c)
                for dy in range(k) for dx in range(k)]
        return jnp.concatenate(cols, axis=-1)

    # Zero the padded scratch every grid step (cheap, a few KiB of VMEM
    # writes).  Unconditional so correctness does not depend on which
    # TensorCore executes which batch index on megacore parts.
    xin_pad[...] = jnp.zeros_like(xin_pad)
    act_pad[...] = jnp.zeros_like(act_pad)
    a_pad[...] = jnp.zeros_like(a_pad)

    # ---- pad the network input inside the kernel ---------------------------
    xin_pad[1:H + 1, 1:W + 1, :] = x_ref[0]

    # ---- conv_1: 3x3, stride 1, pad 1, bias (one im2col matmul) ------------
    y = mm(im2col(xin_pad[...], 3), w1_ref[...]) + b1_ref[...]      # (HW, Ch)
    act_pad[1:H + 1, 1:W + 1, :] = y.reshape(H, W, Ch)

    # ---- residual stack: x + Conv1x1(ReLU(Conv3x3(ReLU(x)))) ---------------
    for l in range(L):
        a = act_pad[...]                                    # (H+2, W+2, Ch)
        h = jnp.maximum(a, 0.0)                             # relu(pad)=pad(relu)
        r = jnp.maximum(mm(im2col(h, 3), w3_ref[l]), 0.0)   # (HW, Crh)
        r = mm(r, wp_ref[l])                                # (HW, Ch)
        skip = a[1:H + 1, 1:W + 1, :].reshape(HW, Ch)
        act_pad[1:H + 1, 1:W + 1, :] = (skip + r).reshape(H, W, Ch)

    # ---- conv_trans_1 (k=4,s=2,p=1) + ReLU ----------------------------------
    # All 4 sub-pixel phases from ONE im2col matmul: weights are phase-blocked
    # over a shared 3x3 input window (unused taps zeroed in the weight prep).
    # The trailing ReLU of ResidualStack is fused into this read.
    h2 = jnp.maximum(act_pad[...], 0.0)                     # (H+2, W+2, Ch)
    ph = jnp.maximum(mm(im2col(h2, 3), wd1_ref[...]) + bd1_ref[...], 0.0)
    for q in range(4):                                      # ph: (HW, 4*C1)
        a_pad[q, 1:H + 1, 1:W + 1, :] = \
            ph[:, q * C1:(q + 1) * C1].reshape(H, W, C1)

    # ---- conv_trans_2 (k=4,s=2,p=1) in "double sub-pixel phase" space ------
    # One dense matmul; output channels = 16 phases x padded Cout (=128 lanes),
    # so the output store is fully lane-dense.
    A = a_pad[...]                                          # (4, H+2, W+2, C1)
    cols = []
    for cy in range(4):
        ryy, dy = _COMBOS[cy]
        for cx in range(4):
            rxx, dx = _COMBOS[cx]
            sl = A[ryy * 2 + rxx, 1 + dy:1 + dy + H, 1 + dx:1 + dx + W, :]
            cols.append(sl.reshape(HW, C1))
    sp = jnp.concatenate(cols, axis=-1)                     # (HW, 16*C1)
    out = mm(sp, wd2_ref[...]) + bd2_ref[...]               # (HW, 16*Cp2)
    o_ref[...] = out.reshape(1, H, W, out.shape[-1]).astype(o_ref.dtype)


# ----------------------------------------------------------------------------
# Weight preparation (pure layout glue on tiny tensors, runs under jit).
# ----------------------------------------------------------------------------
def _prep_kernel_weights(params):
    w1 = params["conv1_w"]                                  # (3,3,Cin,Ch)
    kh, kw, Cin, Ch = w1.shape
    w1m = w1.reshape(kh * kw * Cin, Ch).astype(jnp.float32)
    b1 = params["conv1_b"].reshape(1, Ch).astype(jnp.float32)

    w3_all = jnp.stack([w3.reshape(9 * Ch, -1) for (w3, _) in params["res"]],
                       0).astype(jnp.float32)
    wp_all = jnp.stack([wp for (_, wp) in params["res"]], 0).astype(jnp.float32)

    # conv_trans_1, PyTorch layout (Cin, Cout, 4, 4) -> one (9*Cin, 4*Cout)
    # phase-blocked matrix over a shared 3x3 window.  Phase (ry, rx) of the
    # 2x-upsampled output at pixel (y, x) reads padded input rows y+ry+dy
    # (dy in {0,1}) with kernel tap 3-ry-2*dy; those rows are the 3x3 window
    # taps dy3 = ry+dy.  Taps a phase does not touch stay zero.
    wct1 = params["ct1_w"]
    C1 = wct1.shape[1]
    wd1 = jnp.zeros((9 * Ch, 4 * C1), jnp.float32)
    for ry in range(2):
        for rx in range(2):
            q = ry * 2 + rx
            for dy in range(2):
                for dx in range(2):
                    row = ((ry + dy) * 3 + (rx + dx)) * Ch
                    wd1 = wd1.at[row:row + Ch, q * C1:(q + 1) * C1].set(
                        wct1[:, :, 3 - ry - 2 * dy, 3 - rx - 2 * dx])
    bd1 = jnp.tile(params["ct1_b"], 4).reshape(1, 4 * C1).astype(jnp.float32)

    # conv_trans_2 -> one (16*C1, 16*Cp2) "double-phase" matrix.  The second
    # deconv's output phase t = 2*p + s at position y reads Y[2y + m] with
    # m = p + s + e - 1 (e in {0,1}), and Y[2y + m] equals the first deconv's
    # phase tensor A_r[y + d] with (r, d) = _COMBOS[_U_TO_COMBO[m]].
    wct2 = params["ct2_w"]                                  # (C1, Cout2, 4, 4)
    Cout2 = wct2.shape[1]
    Cp2 = ((Cout2 + 7) // 8) * 8                            # lane-pad Cout
    wd2 = jnp.zeros((16 * C1, 16 * Cp2), jnp.float32)
    for rpy in range(2):
      for sy in range(2):
        for rpx in range(2):
          for sx in range(2):
            t = (2 * rpy + sy) * 4 + (2 * rpx + sx)         # final output phase
            for ey in range(2):
              for ex in range(2):
                cy = _U_TO_COMBO[rpy + sy + ey - 1]
                cx = _U_TO_COMBO[rpx + sx + ex - 1]
                j = cy * 4 + cx
                ky = 3 - sy - 2 * ey
                kx = 3 - sx - 2 * ex
                wd2 = wd2.at[j * C1:(j + 1) * C1,
                             t * Cp2:t * Cp2 + Cout2].add(wct2[:, :, ky, kx])
    bd2 = jnp.tile(jnp.pad(params["ct2_b"], (0, Cp2 - Cout2)), 16)
    bd2 = bd2.reshape(1, 16 * Cp2).astype(jnp.float32)

    return (w1m, b1, w3_all, wp_all, wd1, bd1, wd2, bd2, C1, Cout2, Cp2)


# ----------------------------------------------------------------------------
# Public forward (NCHW in / NCHW out, like the PyTorch module).
# ----------------------------------------------------------------------------
def decoder_forward(x_nchw, params, compute_dtype=jnp.float32):
    x = jnp.transpose(x_nchw, (0, 2, 3, 1)).astype(jnp.float32)   # -> NHWC
    N, H, W, Cin = x.shape
    (w1m, b1, w3_all, wp_all, wd1, bd1, wd2, bd2, C1, Cout2, Cp2) = \
        _prep_kernel_weights(params)
    Ch = b1.shape[1]
    out_c = 16 * Cp2

    kernel = functools.partial(_decoder_kernel, compute_dtype=compute_dtype)
    outk = pl.pallas_call(
        kernel,
        out_shape=jax.ShapeDtypeStruct((N, H, W, out_c), jnp.float32),
        grid=(N,),
        in_specs=[
            pl.BlockSpec((1, H, W, Cin), lambda n: (n, 0, 0, 0)),
            pl.BlockSpec(w1m.shape, lambda n: (0, 0)),
            pl.BlockSpec(b1.shape, lambda n: (0, 0)),
            pl.BlockSpec(w3_all.shape, lambda n: (0, 0, 0)),
            pl.BlockSpec(wp_all.shape, lambda n: (0, 0, 0)),
            pl.BlockSpec(wd1.shape, lambda n: (0, 0)),
            pl.BlockSpec(bd1.shape, lambda n: (0, 0)),
            pl.BlockSpec(wd2.shape, lambda n: (0, 0)),
            pl.BlockSpec(bd2.shape, lambda n: (0, 0)),
        ],
        out_specs=pl.BlockSpec((1, H, W, out_c), lambda n: (n, 0, 0, 0)),
        scratch_shapes=[
            pltpu.VMEM((H + 2, W + 2, Cin), jnp.float32),   # padded input
            pltpu.VMEM((H + 2, W + 2, Ch), jnp.float32),    # padded activations
            pltpu.VMEM((4, H + 2, W + 2, C1), jnp.float32), # deconv1 phases
        ],
        compiler_params=pltpu.CompilerParams(
            dimension_semantics=("parallel",)),              # megacore-friendly
    )(x, w1m, b1, w3_all, wp_all, wd1, bd1, wd2, bd2)

    # Unpack 16 sub-pixel phases + channel padding -> NCHW (layout glue only).
    out = outk.reshape(N, H, W, 4, 4, Cp2)
    out = out.transpose(0, 5, 1, 3, 2, 4).reshape(N, Cp2, 4 * H, 4 * W)
    return out[:, :Cout2]


# ----------------------------------------------------------------------------
# Pure-JAX reference (XLA convs), used only for the in-script correctness check.
# ----------------------------------------------------------------------------
def _conv2d_nhwc(x, w_hwio, b=None, padding=1):
    y = jax.lax.conv_general_dilated(
        x, w_hwio, window_strides=(1, 1),
        padding=((padding, padding), (padding, padding)),
        dimension_numbers=("NHWC", "HWIO", "NHWC"),
        precision=jax.lax.Precision.HIGHEST)
    return y if b is None else y + b


def _conv_transpose2d_nhwc(x, w_pt, b):     # w_pt: (Cin, Cout, 4, 4); k4 s2 p1
    w_hwio = jnp.transpose(w_pt[:, :, ::-1, ::-1], (2, 3, 0, 1))
    y = jax.lax.conv_general_dilated(
        x, w_hwio, window_strides=(1, 1),
        padding=((2, 2), (2, 2)), lhs_dilation=(2, 2),
        dimension_numbers=("NHWC", "HWIO", "NHWC"),
        precision=jax.lax.Precision.HIGHEST)
    return y + b


def decoder_reference(x_nchw, params):
    x = jnp.transpose(x_nchw, (0, 2, 3, 1))
    h = _conv2d_nhwc(x, params["conv1_w"], params["conv1_b"])
    for (w3, wp) in params["res"]:
        r = _conv2d_nhwc(jax.nn.relu(h), w3, padding=1)
        r = jnp.einsum("nhwc,cd->nhwd", jax.nn.relu(r), wp,
                       precision=jax.lax.Precision.HIGHEST)
        h = h + r
    h = jax.nn.relu(h)
    h = jax.nn.relu(_conv_transpose2d_nhwc(h, params["ct1_w"], params["ct1_b"]))
    y = _conv_transpose2d_nhwc(h, params["ct2_w"], params["ct2_b"])
    return jnp.transpose(y, (0, 3, 1, 2))


# ----------------------------------------------------------------------------
# Parameter init (same structure/layouts as the PyTorch module's tensors).
# ----------------------------------------------------------------------------
def init_decoder_params(key, in_channels, num_hiddens,
                        num_residual_layers, num_residual_hiddens):
    ks = jax.random.split(key, 6 + 2 * num_residual_layers)
    p = {}
    p["conv1_w"] = 0.05 * jax.random.normal(
        ks[0], (3, 3, in_channels, num_hiddens), jnp.float32)
    p["conv1_b"] = 0.05 * jax.random.normal(ks[1], (num_hiddens,), jnp.float32)
    p["res"] = []
    for i in range(num_residual_layers):
        w1 = 0.05 * jax.random.normal(
            ks[2 + 2 * i], (3, 3, num_hiddens, num_residual_hiddens), jnp.float32)
        w2 = 0.05 * jax.random.normal(
            ks[3 + 2 * i], (num_residual_hiddens, num_hiddens), jnp.float32)
        p["res"].append((w1, w2))
    base = 2 + 2 * num_residual_layers
    # ConvTranspose2d weights kept in PyTorch layout (Cin, Cout, kh, kw)
    p["ct1_w"] = 0.05 * jax.random.normal(
        ks[base], (num_hiddens, num_hiddens // 2, 4, 4), jnp.float32)
    p["ct1_b"] = 0.05 * jax.random.normal(
        ks[base + 1], (num_hiddens // 2,), jnp.float32)
    p["ct2_w"] = 0.05 * jax.random.normal(
        ks[base + 2], (num_hiddens // 2, 3, 4, 4), jnp.float32)
    p["ct2_b"] = 0.05 * jax.random.normal(ks[base + 3], (3,), jnp.float32)
    return p


if __name__ == "__main__":
    # batch=2, in_channels=4, spatial latent 8x8, num_hiddens=32,
    # num_residual_layers=2, num_residual_hiddens=16  -> output (2, 3, 32, 32)
    B, C_IN, H, W = 2, 4, 8, 8
    NUM_HIDDENS, NUM_RES_LAYERS, NUM_RES_HIDDENS = 32, 2, 16

    key = jax.random.PRNGKey(0)
    k_x, k_p = jax.random.split(key)
    x = jax.random.normal(k_x, (B, C_IN, H, W), jnp.float32)
    params = init_decoder_params(k_p, C_IN, NUM_HIDDENS,
                                 NUM_RES_LAYERS, NUM_RES_HIDDENS)

    out = jax.jit(decoder_forward)(x, params)
    out = jax.block_until_ready(out)

    # decoder upsamples 2x twice: (2, 3, 32, 32)
    assert out.shape == (B, 3, 4 * H, 4 * W), out.shape
    assert bool(jnp.all(jnp.isfinite(out)))

    # Correctness check against a pure-JAX/XLA reference of the same module.
    ref = jax.block_until_ready(jax.jit(decoder_reference)(x, params))
    max_err = float(jnp.max(jnp.abs(out - ref)))
    assert max_err < 3e-3, f"kernel vs reference mismatch: max|diff|={max_err}"

    print("KERNEL_OK")
</pallas_src>

<mosaic_0001>
module attributes {stable_mosaic.version = 11 : i64} {
  func.func @_decoder_kernel(%arg0: i32, %arg1: memref<1x8x8x4xf32, #tpu.memory_space<vmem>>, %arg2: memref<36x32xf32, #tpu.memory_space<vmem>>, %arg3: memref<1x32xf32, #tpu.memory_space<vmem>>, %arg4: memref<2x288x16xf32, #tpu.memory_space<vmem>>, %arg5: memref<2x16x32xf32, #tpu.memory_space<vmem>>, %arg6: memref<288x64xf32, #tpu.memory_space<vmem>>, %arg7: memref<1x64xf32, #tpu.memory_space<vmem>>, %arg8: memref<256x128xf32, #tpu.memory_space<vmem>>, %arg9: memref<1x128xf32, #tpu.memory_space<vmem>>, %arg10: memref<1x8x8x128xf32, #tpu.memory_space<vmem>>, %arg11: memref<10x10x4xf32, #tpu.memory_space<vmem>>, %arg12: memref<10x10x32xf32, #tpu.memory_space<vmem>>, %arg13: memref<4x10x10x16xf32, #tpu.memory_space<vmem>>) attributes {dimension_semantics = [#tpu.dimension_semantics<parallel>], iteration_bounds = array<i64: 2>, scalar_prefetch = 0 : i64, scratch_operands = 3 : i64, tpu.core_type = #tpu.core_type<tc>, window_params = [{transform_indices = @transform_0, window_bounds = array<i64: 1, 8, 8, 4>}, {pipeline_mode = #tpu.pipeline_mode<synchronous>, transform_indices = @transform_1, window_bounds = array<i64: 36, 32>}, {pipeline_mode = #tpu.pipeline_mode<synchronous>, transform_indices = @transform_2, window_bounds = array<i64: 1, 32>}, {pipeline_mode = #tpu.pipeline_mode<synchronous>, transform_indices = @transform_3, window_bounds = array<i64: 2, 288, 16>}, {pipeline_mode = #tpu.pipeline_mode<synchronous>, transform_indices = @transform_4, window_bounds = array<i64: 2, 16, 32>}, {pipeline_mode = #tpu.pipeline_mode<synchronous>, transform_indices = @transform_5, window_bounds = array<i64: 288, 64>}, {pipeline_mode = #tpu.pipeline_mode<synchronous>, transform_indices = @transform_6, window_bounds = array<i64: 1, 64>}, {pipeline_mode = #tpu.pipeline_mode<synchronous>, transform_indices = @transform_7, window_bounds = array<i64: 256, 128>}, {pipeline_mode = #tpu.pipeline_mode<synchronous>, transform_indices = @transform_8, window_bounds = array<i64: 1, 128>}, {transform_indices = @transform_9, window_bounds = array<i64: 1, 8, 8, 128>}]} {
    %cst = arith.constant 0.000000e+00 : f32
    %0 = vector.broadcast %cst : f32 to vector<10x10x4xf32>
    %c0 = arith.constant 0 : index
    %c0_0 = arith.constant 0 : index
    %c0_1 = arith.constant 0 : index
    %1 = vector.load %arg11[%c0, %c0_0, %c0_1] : memref<10x10x4xf32, #tpu.memory_space<vmem>>, vector<10x10x4xf32>
    tpu.vector_store %arg11[%c0, %c0_0, %c0_1], %0 {strides = array<i32>} : memref<10x10x4xf32, #tpu.memory_space<vmem>>, vector<10x10x4xf32>,
    %cst_2 = arith.constant 0.000000e+00 : f32
    %2 = vector.broadcast %cst_2 : f32 to vector<10x10x32xf32>
    %c0_3 = arith.constant 0 : index
    %c0_4 = arith.constant 0 : index
    %c0_5 = arith.constant 0 : index
    %3 = vector.load %arg12[%c0_3, %c0_4, %c0_5] : memref<10x10x32xf32, #tpu.memory_space<vmem>>, vector<10x10x32xf32>
    tpu.vector_store %arg12[%c0_3, %c0_4, %c0_5], %2 {strides = array<i32>} : memref<10x10x32xf32, #tpu.memory_space<vmem>>, vector<10x10x32xf32>,
    %cst_6 = arith.constant 0.000000e+00 : f32
    %4 = vector.broadcast %cst_6 : f32 to vector<4x10x10x16xf32>
    %c0_7 = arith.constant 0 : index
    %c0_8 = arith.constant 0 : index
    %c0_9 = arith.constant 0 : index
    %c0_10 = arith.constant 0 : index
    %5 = vector.load %arg13[%c0_7, %c0_8, %c0_9, %c0_10] : memref<4x10x10x16xf32, #tpu.memory_space<vmem>>, vector<4x10x10x16xf32>
    tpu.vector_store %arg13[%c0_7, %c0_8, %c0_9, %c0_10], %4 {strides = array<i32>} : memref<4x10x10x16xf32, #tpu.memory_space<vmem>>, vector<4x10x10x16xf32>,
    %c0_11 = arith.constant 0 : index
    %c0_12 = arith.constant 0 : index
    %c0_13 = arith.constant 0 : index
    %c0_14 = arith.constant 0 : index
    %6 = vector.load %arg1[%c0_11, %c0_12, %c0_13, %c0_14] : memref<1x8x8x4xf32, #tpu.memory_space<vmem>>, vector<1x8x8x4xf32>
    %7 = vector.shape_cast %6 : vector<1x8x8x4xf32> to vector<8x8x4xf32>
    %c1 = arith.constant 1 : index
    %c1_15 = arith.constant 1 : index
    %c0_16 = arith.constant 0 : index
    %8 = vector.load %arg11[%c1, %c1_15, %c0_16] : memref<10x10x4xf32, #tpu.memory_space<vmem>>, vector<8x8x4xf32>
    tpu.vector_store %arg11[%c1, %c1_15, %c0_16], %7 {strides = array<i32>} : memref<10x10x4xf32, #tpu.memory_space<vmem>>, vector<8x8x4xf32>,
    %c0_17 = arith.constant 0 : index
    %c0_18 = arith.constant 0 : index
    %c0_19 = arith.constant 0 : index
    %9 = vector.load %arg11[%c0_17, %c0_18, %c0_19] : memref<10x10x4xf32, #tpu.memory_space<vmem>>, vector<10x10x4xf32>
    %10 = vector.extract_strided_slice %9 {offsets = [0, 0, 0], sizes = [8, 8, 4], strides = [1, 1, 1]} : vector<10x10x4xf32> to vector<8x8x4xf32>
    %11 = vector.shape_cast %10 : vector<8x8x4xf32> to vector<64x4xf32>
    %12 = vector.extract_strided_slice %9 {offsets = [0, 1, 0], sizes = [8, 8, 4], strides = [1, 1, 1]} : vector<10x10x4xf32> to vector<8x8x4xf32>
    %13 = vector.shape_cast %12 : vector<8x8x4xf32> to vector<64x4xf32>
    %14 = vector.extract_strided_slice %9 {offsets = [0, 2, 0], sizes = [8, 8, 4], strides = [1, 1, 1]} : vector<10x10x4xf32> to vector<8x8x4xf32>
    %15 = vector.shape_cast %14 : vector<8x8x4xf32> to vector<64x4xf32>
    %16 = vector.extract_strided_slice %9 {offsets = [1, 0, 0], sizes = [8, 8, 4], strides = [1, 1, 1]} : vector<10x10x4xf32> to vector<8x8x4xf32>
    %17 = vector.shape_cast %16 : vector<8x8x4xf32> to vector<64x4xf32>
    %18 = vector.extract_strided_slice %9 {offsets = [1, 1, 0], sizes = [8, 8, 4], strides = [1, 1, 1]} : vector<10x10x4xf32> to vector<8x8x4xf32>
    %19 = vector.shape_cast %18 : vector<8x8x4xf32> to vector<64x4xf32>
    %20 = vector.extract_strided_slice %9 {offsets = [1, 2, 0], sizes = [8, 8, 4], strides = [1, 1, 1]} : vector<10x10x4xf32> to vector<8x8x4xf32>
    %21 = vector.shape_cast %20 : vector<8x8x4xf32> to vector<64x4xf32>
    %22 = vector.extract_strided_slice %9 {offsets = [2, 0, 0], sizes = [8, 8, 4], strides = [1, 1, 1]} : vector<10x10x4xf32> to vector<8x8x4xf32>
    %23 = vector.shape_cast %22 : vector<8x8x4xf32> to vector<64x4xf32>
    %24 = vector.extract_strided_slice %9 {offsets = [2, 1, 0], sizes = [8, 8, 4], strides = [1, 1, 1]} : vector<10x10x4xf32> to vector<8x8x4xf32>
    %25 = vector.shape_cast %24 : vector<8x8x4xf32> to vector<64x4xf32>
    %26 = vector.extract_strided_slice %9 {offsets = [2, 2, 0], sizes = [8, 8, 4], strides = [1, 1, 1]} : vector<10x10x4xf32> to vector<8x8x4xf32>
    %27 = vector.shape_cast %26 : vector<8x8x4xf32> to vector<64x4xf32>
    %28 = tpu.concatenate %11, %13, %15, %17, %19, %21, %23, %25, %27 in 1 : vector<64x4xf32>, vector<64x4xf32>, vector<64x4xf32>, vector<64x4xf32>, vector<64x4xf32>, vector<64x4xf32>, vector<64x4xf32>, vector<64x4xf32>, vector<64x4xf32> -> vector<64x36xf32>
    %c0_20 = arith.constant 0 : index
    %c0_21 = arith.constant 0 : index
    %29 = vector.load %arg2[%c0_20, %c0_21] : memref<36x32xf32, #tpu.memory_space<vmem>>, vector<36x32xf32>
    %cst_22 = arith.constant dense<0.000000e+00> : vector<64x32xf32>
    %30 = tpu.matmul %28, %29, %cst_22 {dimension_numbers = #tpu.dot_dimension_numbers<[1], [0], [0], [1], [0, 0, 1, 1], [], []>} : vector<64x36xf32>, vector<36x32xf32>, vector<64x32xf32> -> vector<64x32xf32>
    %c0_23 = arith.constant 0 : index
    %c0_24 = arith.constant 0 : index
    %31 = vector.load %arg3[%c0_23, %c0_24] : memref<1x32xf32, #tpu.memory_space<vmem>>, vector<1x32xf32>
    %32 = vector.broadcast %31 : vector<1x32xf32> to vector<64x32xf32>
    %33 = arith.addf %30, %32 : vector<64x32xf32>
    %34 = vector.shape_cast %33 : vector<64x32xf32> to vector<8x8x32xf32>
    %c1_25 = arith.constant 1 : index
    %c1_26 = arith.constant 1 : index
    %c0_27 = arith.constant 0 : index
    %35 = vector.load %arg12[%c1_25, %c1_26, %c0_27] : memref<10x10x32xf32, #tpu.memory_space<vmem>>, vector<8x8x32xf32>
    tpu.vector_store %arg12[%c1_25, %c1_26, %c0_27], %34 {strides = array<i32>} : memref<10x10x32xf32, #tpu.memory_space<vmem>>, vector<8x8x32xf32>,
    %c0_28 = arith.constant 0 : index
    %c0_29 = arith.constant 0 : index
    %c0_30 = arith.constant 0 : index
    %36 = vector.load %arg12[%c0_28, %c0_29, %c0_30] : memref<10x10x32xf32, #tpu.memory_space<vmem>>, vector<10x10x32xf32>
    %cst_31 = arith.constant 0.000000e+00 : f32
    %37 = vector.broadcast %cst_31 : f32 to vector<10x10x32xf32>
    %38 = arith.maximumf %36, %37 : vector<10x10x32xf32>
    %39 = vector.extract_strided_slice %38 {offsets = [0, 0, 0], sizes = [8, 8, 32], strides = [1, 1, 1]} : vector<10x10x32xf32> to vector<8x8x32xf32>
    %40 = vector.shape_cast %39 : vector<8x8x32xf32> to vector<64x32xf32>
    %41 = vector.extract_strided_slice %38 {offsets = [0, 1, 0], sizes = [8, 8, 32], strides = [1, 1, 1]} : vector<10x10x32xf32> to vector<8x8x32xf32>
    %42 = vector.shape_cast %41 : vector<8x8x32xf32> to vector<64x32xf32>
    %43 = vector.extract_strided_slice %38 {offsets = [0, 2, 0], sizes = [8, 8, 32], strides = [1, 1, 1]} : vector<10x10x32xf32> to vector<8x8x32xf32>
    %44 = vector.shape_cast %43 : vector<8x8x32xf32> to vector<64x32xf32>
    %45 = vector.extract_strided_slice %38 {offsets = [1, 0, 0], sizes = [8, 8, 32], strides = [1, 1, 1]} : vector<10x10x32xf32> to vector<8x8x32xf32>
    %46 = vector.shape_cast %45 : vector<8x8x32xf32> to vector<64x32xf32>
    %47 = vector.extract_strided_slice %38 {offsets = [1, 1, 0], sizes = [8, 8, 32], strides = [1, 1, 1]} : vector<10x10x32xf32> to vector<8x8x32xf32>
    %48 = vector.shape_cast %47 : vector<8x8x32xf32> to vector<64x32xf32>
    %49 = vector.extract_strided_slice %38 {offsets = [1, 2, 0], sizes = [8, 8, 32], strides = [1, 1, 1]} : vector<10x10x32xf32> to vector<8x8x32xf32>
    %50 = vector.shape_cast %49 : vector<8x8x32xf32> to vector<64x32xf32>
    %51 = vector.extract_strided_slice %38 {offsets = [2, 0, 0], sizes = [8, 8, 32], strides = [1, 1, 1]} : vector<10x10x32xf32> to vector<8x8x32xf32>
    %52 = vector.shape_cast %51 : vector<8x8x32xf32> to vector<64x32xf32>
    %53 = vector.extract_strided_slice %38 {offsets = [2, 1, 0], sizes = [8, 8, 32], strides = [1, 1, 1]} : vector<10x10x32xf32> to vector<8x8x32xf32>
    %54 = vector.shape_cast %53 : vector<8x8x32xf32> to vector<64x32xf32>
    %55 = vector.extract_strided_slice %38 {offsets = [2, 2, 0], sizes = [8, 8, 32], strides = [1, 1, 1]} : vector<10x10x32xf32> to vector<8x8x32xf32>
    %56 = vector.shape_cast %55 : vector<8x8x32xf32> to vector<64x32xf32>
    %57 = tpu.concatenate %40, %42, %44, %46, %48, %50, %52, %54, %56 in 1 : vector<64x32xf32>, vector<64x32xf32>, vector<64x32xf32>, vector<64x32xf32>, vector<64x32xf32>, vector<64x32xf32>, vector<64x32xf32>, vector<64x32xf32>, vector<64x32xf32> -> vector<64x288xf32>
    %c0_32 = arith.constant 0 : index
    %c0_33 = arith.constant 0 : index
    %c0_34 = arith.constant 0 : index
    %58 = vector.load %arg4[%c0_32, %c0_33, %c0_34] : memref<2x288x16xf32, #tpu.memory_space<vmem>>, vector<1x288x16xf32>
    %59 = vector.shape_cast %58 : vector<1x288x16xf32> to vector<288x16xf32>
    %cst_35 = arith.constant dense<0.000000e+00> : vector<64x16xf32>
    %60 = tpu.matmul %57, %59, %cst_35 {dimension_numbers = #tpu.dot_dimension_numbers<[1], [0], [0], [1], [0, 0, 1, 1], [], []>} : vector<64x288xf32>, vector<288x16xf32>, vector<64x16xf32> -> vector<64x16xf32>
    %cst_36 = arith.constant 0.000000e+00 : f32
    %61 = vector.broadcast %cst_36 : f32 to vector<64x16xf32>
    %62 = arith.maximumf %60, %61 : vector<64x16xf32>
    %c0_37 = arith.constant 0 : index
    %c0_38 = arith.constant 0 : index
    %c0_39 = arith.constant 0 : index
    %63 = vector.load %arg5[%c0_37, %c0_38, %c0_39] : memref<2x16x32xf32, #tpu.memory_space<vmem>>, vector<1x16x32xf32>
    %64 = vector.shape_cast %63 : vector<1x16x32xf32> to vector<16x32xf32>
    %cst_40 = arith.constant dense<0.000000e+00> : vector<64x32xf32>
    %65 = tpu.matmul %62, %64, %cst_40 {dimension_numbers = #tpu.dot_dimension_numbers<[1], [0], [0], [1], [0, 0, 1, 1], [], []>} : vector<64x16xf32>, vector<16x32xf32>, vector<64x32xf32> -> vector<64x32xf32>
    %66 = vector.extract_strided_slice %36 {offsets = [1, 1, 0], sizes = [8, 8, 32], strides = [1, 1, 1]} : vector<10x10x32xf32> to vector<8x8x32xf32>
    %67 = vector.shape_cast %66 : vector<8x8x32xf32> to vector<64x32xf32>
    %68 = arith.addf %67, %65 : vector<64x32xf32>
    %69 = vector.shape_cast %68 : vector<64x32xf32> to vector<8x8x32xf32>
    %c1_41 = arith.constant 1 : index
    %c1_42 = arith.constant 1 : index
    %c0_43 = arith.constant 0 : index
    %70 = vector.load %arg12[%c1_41, %c1_42, %c0_43] : memref<10x10x32xf32, #tpu.memory_space<vmem>>, vector<8x8x32xf32>
    tpu.vector_store %arg12[%c1_41, %c1_42, %c0_43], %69 {strides = array<i32>} : memref<10x10x32xf32, #tpu.memory_space<vmem>>, vector<8x8x32xf32>,
    %c0_44 = arith.constant 0 : index
    %c0_45 = arith.constant 0 : index
    %c0_46 = arith.constant 0 : index
    %71 = vector.load %arg12[%c0_44, %c0_45, %c0_46] : memref<10x10x32xf32, #tpu.memory_space<vmem>>, vector<10x10x32xf32>
    %cst_47 = arith.constant 0.000000e+00 : f32
    %72 = vector.broadcast %cst_47 : f32 to vector<10x10x32xf32>
    %73 = arith.maximumf %71, %72 : vector<10x10x32xf32>
    %74 = vector.extract_strided_slice %73 {offsets = [0, 0, 0], sizes = [8, 8, 32], strides = [1, 1, 1]} : vector<10x10x32xf32> to vector<8x8x32xf32>
    %75 = vector.shape_cast %74 : vector<8x8x32xf32> to vector<64x32xf32>
    %76 = vector.extract_strided_slice %73 {offsets = [0, 1, 0], sizes = [8, 8, 32], strides = [1, 1, 1]} : vector<10x10x32xf32> to vector<8x8x32xf32>
    %77 = vector.shape_cast %76 : vector<8x8x32xf32> to vector<64x32xf32>
    %78 = vector.extract_strided_slice %73 {offsets = [0, 2, 0], sizes = [8, 8, 32], strides = [1, 1, 1]} : vector<10x10x32xf32> to vector<8x8x32xf32>
    %79 = vector.shape_cast %78 : vector<8x8x32xf32> to vector<64x32xf32>
    %80 = vector.extract_strided_slice %73 {offsets = [1, 0, 0], sizes = [8, 8, 32], strides = [1, 1, 1]} : vector<10x10x32xf32> to vector<8x8x32xf32>
    %81 = vector.shape_cast %80 : vector<8x8x32xf32> to vector<64x32xf32>
    %82 = vector.extract_strided_slice %73 {offsets = [1, 1, 0], sizes = [8, 8, 32], strides = [1, 1, 1]} : vector<10x10x32xf32> to vector<8x8x32xf32>
    %83 = vector.shape_cast %82 : vector<8x8x32xf32> to vector<64x32xf32>
    %84 = vector.extract_strided_slice %73 {offsets = [1, 2, 0], sizes = [8, 8, 32], strides = [1, 1, 1]} : vector<10x10x32xf32> to vector<8x8x32xf32>
    %85 = vector.shape_cast %84 : vector<8x8x32xf32> to vector<64x32xf32>
    %86 = vector.extract_strided_slice %73 {offsets = [2, 0, 0], sizes = [8, 8, 32], strides = [1, 1, 1]} : vector<10x10x32xf32> to vector<8x8x32xf32>
    %87 = vector.shape_cast %86 : vector<8x8x32xf32> to vector<64x32xf32>
    %88 = vector.extract_strided_slice %73 {offsets = [2, 1, 0], sizes = [8, 8, 32], strides = [1, 1, 1]} : vector<10x10x32xf32> to vector<8x8x32xf32>
    %89 = vector.shape_cast %88 : vector<8x8x32xf32> to vector<64x32xf32>
    %90 = vector.extract_strided_slice %73 {offsets = [2, 2, 0], sizes = [8, 8, 32], strides = [1, 1, 1]} : vector<10x10x32xf32> to vector<8x8x32xf32>
    %91 = vector.shape_cast %90 : vector<8x8x32xf32> to vector<64x32xf32>
    %92 = tpu.concatenate %75, %77, %79, %81, %83, %85, %87, %89, %91 in 1 : vector<64x32xf32>, vector<64x32xf32>, vector<64x32xf32>, vector<64x32xf32>, vector<64x32xf32>, vector<64x32xf32>, vector<64x32xf32>, vector<64x32xf32>, vector<64x32xf32> -> vector<64x288xf32>
    %c1_48 = arith.constant 1 : index
    %c0_49 = arith.constant 0 : index
    %c0_50 = arith.constant 0 : index
    %93 = vector.load %arg4[%c1_48, %c0_49, %c0_50] : memref<2x288x16xf32, #tpu.memory_space<vmem>>, vector<1x288x16xf32>
    %94 = vector.shape_cast %93 : vector<1x288x16xf32> to vector<288x16xf32>
    %cst_51 = arith.constant dense<0.000000e+00> : vector<64x16xf32>
    %95 = tpu.matmul %92, %94, %cst_51 {dimension_numbers = #tpu.dot_dimension_numbers<[1], [0], [0], [1], [0, 0, 1, 1], [], []>} : vector<64x288xf32>, vector<288x16xf32>, vector<64x16xf32> -> vector<64x16xf32>
    %cst_52 = arith.constant 0.000000e+00 : f32
    %96 = vector.broadcast %cst_52 : f32 to vector<64x16xf32>
    %97 = arith.maximumf %95, %96 : vector<64x16xf32>
    %c1_53 = arith.constant 1 : index
    %c0_54 = arith.constant 0 : index
    %c0_55 = arith.constant 0 : index
    %98 = vector.load %arg5[%c1_53, %c0_54, %c0_55] : memref<2x16x32xf32, #tpu.memory_space<vmem>>, vector<1x16x32xf32>
    %99 = vector.shape_cast %98 : vector<1x16x32xf32> to vector<16x32xf32>
    %cst_56 = arith.constant dense<0.000000e+00> : vector<64x32xf32>
    %100 = tpu.matmul %97, %99, %cst_56 {dimension_numbers = #tpu.dot_dimension_numbers<[1], [0], [0], [1], [0, 0, 1, 1], [], []>} : vector<64x16xf32>, vector<16x32xf32>, vector<64x32xf32> -> vector<64x32xf32>
    %101 = vector.extract_strided_slice %71 {offsets = [1, 1, 0], sizes = [8, 8, 32], strides = [1, 1, 1]} : vector<10x10x32xf32> to vector<8x8x32xf32>
    %102 = vector.shape_cast %101 : vector<8x8x32xf32> to vector<64x32xf32>
    %103 = arith.addf %102, %100 : vector<64x32xf32>
    %104 = vector.shape_cast %103 : vector<64x32xf32> to vector<8x8x32xf32>
    %c1_57 = arith.constant 1 : index
    %c1_58 = arith.constant 1 : index
    %c0_59 = arith.constant 0 : index
    %105 = vector.load %arg12[%c1_57, %c1_58, %c0_59] : memref<10x10x32xf32, #tpu.memory_space<vmem>>, vector<8x8x32xf32>
    tpu.vector_store %arg12[%c1_57, %c1_58, %c0_59], %104 {strides = array<i32>} : memref<10x10x32xf32, #tpu.memory_space<vmem>>, vector<8x8x32xf32>,
    %c0_60 = arith.constant 0 : index
    %c0_61 = arith.constant 0 : index
    %c0_62 = arith.constant 0 : index
    %106 = vector.load %arg12[%c0_60, %c0_61, %c0_62] : memref<10x10x32xf32, #tpu.memory_space<vmem>>, vector<10x10x32xf32>
    %cst_63 = arith.constant 0.000000e+00 : f32
    %107 = vector.broadcast %cst_63 : f32 to vector<10x10x32xf32>
    %108 = arith.maximumf %106, %107 : vector<10x10x32xf32>
    %109 = vector.extract_strided_slice %108 {offsets = [0, 0, 0], sizes = [8, 8, 32], strides = [1, 1, 1]} : vector<10x10x32xf32> to vector<8x8x32xf32>
    %110 = vector.shape_cast %109 : vector<8x8x32xf32> to vector<64x32xf32>
    %111 = vector.extract_strided_slice %108 {offsets = [0, 1, 0], sizes = [8, 8, 32], strides = [1, 1, 1]} : vector<10x10x32xf32> to vector<8x8x32xf32>
    %112 = vector.shape_cast %111 : vector<8x8x32xf32> to vector<64x32xf32>
    %113 = vector.extract_strided_slice %108 {offsets = [0, 2, 0], sizes = [8, 8, 32], strides = [1, 1, 1]} : vector<10x10x32xf32> to vector<8x8x32xf32>
    %114 = vector.shape_cast %113 : vector<8x8x32xf32> to vector<64x32xf32>
    %115 = vector.extract_strided_slice %108 {offsets = [1, 0, 0], sizes = [8, 8, 32], strides = [1, 1, 1]} : vector<10x10x32xf32> to vector<8x8x32xf32>
    %116 = vector.shape_cast %115 : vector<8x8x32xf32> to vector<64x32xf32>
    %117 = vector.extract_strided_slice %108 {offsets = [1, 1, 0], sizes = [8, 8, 32], strides = [1, 1, 1]} : vector<10x10x32xf32> to vector<8x8x32xf32>
    %118 = vector.shape_cast %117 : vector<8x8x32xf32> to vector<64x32xf32>
    %119 = vector.extract_strided_slice %108 {offsets = [1, 2, 0], sizes = [8, 8, 32], strides = [1, 1, 1]} : vector<10x10x32xf32> to vector<8x8x32xf32>
    %120 = vector.shape_cast %119 : vector<8x8x32xf32> to vector<64x32xf32>
    %121 = vector.extract_strided_slice %108 {offsets = [2, 0, 0], sizes = [8, 8, 32], strides = [1, 1, 1]} : vector<10x10x32xf32> to vector<8x8x32xf32>
    %122 = vector.shape_cast %121 : vector<8x8x32xf32> to vector<64x32xf32>
    %123 = vector.extract_strided_slice %108 {offsets = [2, 1, 0], sizes = [8, 8, 32], strides = [1, 1, 1]} : vector<10x10x32xf32> to vector<8x8x32xf32>
    %124 = vector.shape_cast %123 : vector<8x8x32xf32> to vector<64x32xf32>
    %125 = vector.extract_strided_slice %108 {offsets = [2, 2, 0], sizes = [8, 8, 32], strides = [1, 1, 1]} : vector<10x10x32xf32> to vector<8x8x32xf32>
    %126 = vector.shape_cast %125 : vector<8x8x32xf32> to vector<64x32xf32>
    %127 = tpu.concatenate %110, %112, %114, %116, %118, %120, %122, %124, %126 in 1 : vector<64x32xf32>, vector<64x32xf32>, vector<64x32xf32>, vector<64x32xf32>, vector<64x32xf32>, vector<64x32xf32>, vector<64x32xf32>, vector<64x32xf32>, vector<64x32xf32> -> vector<64x288xf32>
    %c0_64 = arith.constant 0 : index
    %c0_65 = arith.constant 0 : index
    %128 = vector.load %arg6[%c0_64, %c0_65] : memref<288x64xf32, #tpu.memory_space<vmem>>, vector<288x64xf32>
    %cst_66 = arith.constant dense<0.000000e+00> : vector<64x64xf32>
    %129 = tpu.matmul %127, %128, %cst_66 {dimension_numbers = #tpu.dot_dimension_numbers<[1], [0], [0], [1], [0, 0, 1, 1], [], []>} : vector<64x288xf32>, vector<288x64xf32>, vector<64x64xf32> -> vector<64x64xf32>
    %c0_67 = arith.constant 0 : index
    %c0_68 = arith.constant 0 : index
    %130 = vector.load %arg7[%c0_67, %c0_68] : memref<1x64xf32, #tpu.memory_space<vmem>>, vector<1x64xf32>
    %131 = vector.broadcast %130 : vector<1x64xf32> to vector<64x64xf32>
    %132 = arith.addf %129, %131 : vector<64x64xf32>
    %cst_69 = arith.constant 0.000000e+00 : f32
    %133 = vector.broadcast %cst_69 : f32 to vector<64x64xf32>
    %134 = arith.maximumf %132, %133 : vector<64x64xf32>
    %135 = vector.extract_strided_slice %134 {offsets = [0, 0], sizes = [64, 16], strides = [1, 1]} : vector<64x64xf32> to vector<64x16xf32>
    %136 = vector.shape_cast %135 : vector<64x16xf32> to vector<8x8x16xf32>
    %c0_70 = arith.constant 0 : index
    %c1_71 = arith.constant 1 : index
    %c1_72 = arith.constant 1 : index
    %c0_73 = arith.constant 0 : index
    %137 = vector.load %arg13[%c0_70, %c1_71, %c1_72, %c0_73] : memref<4x10x10x16xf32, #tpu.memory_space<vmem>>, vector<1x8x8x16xf32>
    %138 = vector.shape_cast %137 : vector<1x8x8x16xf32> to vector<8x8x16xf32>
    %139 = vector.shape_cast %136 : vector<8x8x16xf32> to vector<1x8x8x16xf32>
    tpu.vector_store %arg13[%c0_70, %c1_71, %c1_72, %c0_73], %139 {strides = array<i32>} : memref<4x10x10x16xf32, #tpu.memory_space<vmem>>, vector<1x8x8x16xf32>,
    %140 = vector.extract_strided_slice %134 {offsets = [0, 16], sizes = [64, 16], strides = [1, 1]} : vector<64x64xf32> to vector<64x16xf32>
    %141 = vector.shape_cast %140 : vector<64x16xf32> to vector<8x8x16xf32>
    %c1_74 = arith.constant 1 : index
    %c1_75 = arith.constant 1 : index
    %c1_76 = arith.constant 1 : index
    %c0_77 = arith.constant 0 : index
    %142 = vector.load %arg13[%c1_74, %c1_75, %c1_76, %c0_77] : memref<4x10x10x16xf32, #tpu.memory_space<vmem>>, vector<1x8x8x16xf32>
    %143 = vector.shape_cast %142 : vector<1x8x8x16xf32> to vector<8x8x16xf32>
    %144 = vector.shape_cast %141 : vector<8x8x16xf32> to vector<1x8x8x16xf32>
    tpu.vector_store %arg13[%c1_74, %c1_75, %c1_76, %c0_77], %144 {strides = array<i32>} : memref<4x10x10x16xf32, #tpu.memory_space<vmem>>, vector<1x8x8x16xf32>,
    %145 = vector.extract_strided_slice %134 {offsets = [0, 32], sizes = [64, 16], strides = [1, 1]} : vector<64x64xf32> to vector<64x16xf32>
    %146 = vector.shape_cast %145 : vector<64x16xf32> to vector<8x8x16xf32>
    %c2 = arith.constant 2 : index
    %c1_78 = arith.constant 1 : index
    %c1_79 = arith.constant 1 : index
    %c0_80 = arith.constant 0 : index
    %147 = vector.load %arg13[%c2, %c1_78, %c1_79, %c0_80] : memref<4x10x10x16xf32, #tpu.memory_space<vmem>>, vector<1x8x8x16xf32>
    %148 = vector.shape_cast %147 : vector<1x8x8x16xf32> to vector<8x8x16xf32>
    %149 = vector.shape_cast %146 : vector<8x8x16xf32> to vector<1x8x8x16xf32>
    tpu.vector_store %arg13[%c2, %c1_78, %c1_79, %c0_80], %149 {strides = array<i32>} : memref<4x10x10x16xf32, #tpu.memory_space<vmem>>, vector<1x8x8x16xf32>,
    %150 = vector.extract_strided_slice %134 {offsets = [0, 48], sizes = [64, 16], strides = [1, 1]} : vector<64x64xf32> to vector<64x16xf32>
    %151 = vector.shape_cast %150 : vector<64x16xf32> to vector<8x8x16xf32>
    %c3 = arith.constant 3 : index
    %c1_81 = arith.constant 1 : index
    %c1_82 = arith.constant 1 : index
    %c0_83 = arith.constant 0 : index
    %152 = vector.load %arg13[%c3, %c1_81, %c1_82, %c0_83] : memref<4x10x10x16xf32, #tpu.memory_space<vmem>>, vector<1x8x8x16xf32>
    %153 = vector.shape_cast %152 : vector<1x8x8x16xf32> to vector<8x8x16xf32>
    %154 = vector.shape_cast %151 : vector<8x8x16xf32> to vector<1x8x8x16xf32>
    tpu.vector_store %arg13[%c3, %c1_81, %c1_82, %c0_83], %154 {strides = array<i32>} : memref<4x10x10x16xf32, #tpu.memory_space<vmem>>, vector<1x8x8x16xf32>,
    %c0_84 = arith.constant 0 : index
    %c0_85 = arith.constant 0 : index
    %c0_86 = arith.constant 0 : index
    %c0_87 = arith.constant 0 : index
    %155 = vector.load %arg13[%c0_84, %c0_85, %c0_86, %c0_87] : memref<4x10x10x16xf32, #tpu.memory_space<vmem>>, vector<4x10x10x16xf32>
    %156 = vector.extract_strided_slice %155 {offsets = [0, 1, 1, 0], sizes = [1, 8, 8, 16], strides = [1, 1, 1, 1]} : vector<4x10x10x16xf32> to vector<1x8x8x16xf32>
    %157 = vector.shape_cast %156 : vector<1x8x8x16xf32> to vector<8x8x16xf32>
    %158 = vector.shape_cast %157 : vector<8x8x16xf32> to vector<64x16xf32>
    %159 = vector.extract_strided_slice %155 {offsets = [1, 1, 1, 0], sizes = [1, 8, 8, 16], strides = [1, 1, 1, 1]} : vector<4x10x10x16xf32> to vector<1x8x8x16xf32>
    %160 = vector.shape_cast %159 : vector<1x8x8x16xf32> to vector<8x8x16xf32>
    %161 = vector.shape_cast %160 : vector<8x8x16xf32> to vector<64x16xf32>
    %162 = vector.extract_strided_slice %155 {offsets = [1, 1, 0, 0], sizes = [1, 8, 8, 16], strides = [1, 1, 1, 1]} : vector<4x10x10x16xf32> to vector<1x8x8x16xf32>
    %163 = vector.shape_cast %162 : vector<1x8x8x16xf32> to vector<8x8x16xf32>
    %164 = vector.shape_cast %163 : vector<8x8x16xf32> to vector<64x16xf32>
    %165 = vector.extract_strided_slice %155 {offsets = [0, 1, 2, 0], sizes = [1, 8, 8, 16], strides = [1, 1, 1, 1]} : vector<4x10x10x16xf32> to vector<1x8x8x16xf32>
    %166 = vector.shape_cast %165 : vector<1x8x8x16xf32> to vector<8x8x16xf32>
    %167 = vector.shape_cast %166 : vector<8x8x16xf32> to vector<64x16xf32>
    %168 = vector.extract_strided_slice %155 {offsets = [2, 1, 1, 0], sizes = [1, 8, 8, 16], strides = [1, 1, 1, 1]} : vector<4x10x10x16xf32> to vector<1x8x8x16xf32>
    %169 = vector.shape_cast %168 : vector<1x8x8x16xf32> to vector<8x8x16xf32>
    %170 = vector.shape_cast %169 : vector<8x8x16xf32> to vector<64x16xf32>
    %171 = vector.extract_strided_slice %155 {offsets = [3, 1, 1, 0], sizes = [1, 8, 8, 16], strides = [1, 1, 1, 1]} : vector<4x10x10x16xf32> to vector<1x8x8x16xf32>
    %172 = vector.shape_cast %171 : vector<1x8x8x16xf32> to vector<8x8x16xf32>
    %173 = vector.shape_cast %172 : vector<8x8x16xf32> to vector<64x16xf32>
    %174 = vector.extract_strided_slice %155 {offsets = [3, 1, 0, 0], sizes = [1, 8, 8, 16], strides = [1, 1, 1, 1]} : vector<4x10x10x16xf32> to vector<1x8x8x16xf32>
    %175 = vector.shape_cast %174 : vector<1x8x8x16xf32> to vector<8x8x16xf32>
    %176 = vector.shape_cast %175 : vector<8x8x16xf32> to vector<64x16xf32>
    %177 = vector.extract_strided_slice %155 {offsets = [2, 1, 2, 0], sizes = [1, 8, 8, 16], strides = [1, 1, 1, 1]} : vector<4x10x10x16xf32> to vector<1x8x8x16xf32>
    %178 = vector.shape_cast %177 : vector<1x8x8x16xf32> to vector<8x8x16xf32>
    %179 = vector.shape_cast %178 : vector<8x8x16xf32> to vector<64x16xf32>
    %180 = vector.extract_strided_slice %155 {offsets = [2, 0, 1, 0], sizes = [1, 8, 8, 16], strides = [1, 1, 1, 1]} : vector<4x10x10x16xf32> to vector<1x8x8x16xf32>
    %181 = vector.shape_cast %180 : vector<1x8x8x16xf32> to vector<8x8x16xf32>
    %182 = vector.shape_cast %181 : vector<8x8x16xf32> to vector<64x16xf32>
    %183 = vector.extract_strided_slice %155 {offsets = [3, 0, 1, 0], sizes = [1, 8, 8, 16], strides = [1, 1, 1, 1]} : vector<4x10x10x16xf32> to vector<1x8x8x16xf32>
    %184 = vector.shape_cast %183 : vector<1x8x8x16xf32> to vector<8x8x16xf32>
    %185 = vector.shape_cast %184 : vector<8x8x16xf32> to vector<64x16xf32>
    %186 = vector.extract_strided_slice %155 {offsets = [3, 0, 0, 0], sizes = [1, 8, 8, 16], strides = [1, 1, 1, 1]} : vector<4x10x10x16xf32> to vector<1x8x8x16xf32>
    %187 = vector.shape_cast %186 : vector<1x8x8x16xf32> to vector<8x8x16xf32>
    %188 = vector.shape_cast %187 : vector<8x8x16xf32> to vector<64x16xf32>
    %189 = vector.extract_strided_slice %155 {offsets = [2, 0, 2, 0], sizes = [1, 8, 8, 16], strides = [1, 1, 1, 1]} : vector<4x10x10x16xf32> to vector<1x8x8x16xf32>
    %190 = vector.shape_cast %189 : vector<1x8x8x16xf32> to vector<8x8x16xf32>
    %191 = vector.shape_cast %190 : vector<8x8x16xf32> to vector<64x16xf32>
    %192 = vector.extract_strided_slice %155 {offsets = [0, 2, 1, 0], sizes = [1, 8, 8, 16], strides = [1, 1, 1, 1]} : vector<4x10x10x16xf32> to vector<1x8x8x16xf32>
    %193 = vector.shape_cast %192 : vector<1x8x8x16xf32> to vector<8x8x16xf32>
    %194 = vector.shape_cast %193 : vector<8x8x16xf32> to vector<64x16xf32>
    %195 = vector.extract_strided_slice %155 {offsets = [1, 2, 1, 0], sizes = [1, 8, 8, 16], strides = [1, 1, 1, 1]} : vector<4x10x10x16xf32> to vector<1x8x8x16xf32>
    %196 = vector.shape_cast %195 : vector<1x8x8x16xf32> to vector<8x8x16xf32>
    %197 = vector.shape_cast %196 : vector<8x8x16xf32> to vector<64x16xf32>
    %198 = vector.extract_strided_slice %155 {offsets = [1, 2, 0, 0], sizes = [1, 8, 8, 16], strides = [1, 1, 1, 1]} : vector<4x10x10x16xf32> to vector<1x8x8x16xf32>
    %199 = vector.shape_cast %198 : vector<1x8x8x16xf32> to vector<8x8x16xf32>
    %200 = vector.shape_cast %199 : vector<8x8x16xf32> to vector<64x16xf32>
    %201 = vector.extract_strided_slice %155 {offsets = [0, 2, 2, 0], sizes = [1, 8, 8, 16], strides = [1, 1, 1, 1]} : vector<4x10x10x16xf32> to vector<1x8x8x16xf32>
    %202 = vector.shape_cast %201 : vector<1x8x8x16xf32> to vector<8x8x16xf32>
    %203 = vector.shape_cast %202 : vector<8x8x16xf32> to vector<64x16xf32>
    %204 = tpu.concatenate %158, %161, %164, %167, %170, %173, %176, %179, %182, %185, %188, %191, %194, %197, %200, %203 in 1 : vector<64x16xf32>, vector<64x16xf32>, vector<64x16xf32>, vector<64x16xf32>, vector<64x16xf32>, vector<64x16xf32>, vector<64x16xf32>, vector<64x16xf32>, vector<64x16xf32>, vector<64x16xf32>, vector<64x16xf32>, vector<64x16xf32>, vector<64x16xf32>, vector<64x16xf32>, vector<64x16xf32>, vector<64x16xf32> -> vector<64x256xf32>
    %c0_88 = arith.constant 0 : index
    %c0_89 = arith.constant 0 : index
    %205 = vector.load %arg8[%c0_88, %c0_89] : memref<256x128xf32, #tpu.memory_space<vmem>>, vector<256x128xf32>
    %cst_90 = arith.constant dense<0.000000e+00> : vector<64x128xf32>
    %206 = tpu.matmul %204, %205, %cst_90 {dimension_numbers = #tpu.dot_dimension_numbers<[1], [0], [0], [1], [0, 0, 1, 1], [], []>} : vector<64x256xf32>, vector<256x128xf32>, vector<64x128xf32> -> vector<64x128xf32>
    %c0_91 = arith.constant 0 : index
    %c0_92 = arith.constant 0 : index
    %207 = vector.load %arg9[%c0_91, %c0_92] : memref<1x128xf32, #tpu.memory_space<vmem>>, vector<1x128xf32>
    %208 = vector.broadcast %207 : vector<1x128xf32> to vector<64x128xf32>
    %209 = arith.addf %206, %208 : vector<64x128xf32>
    %210 = vector.shape_cast %209 : vector<64x128xf32> to vector<1x8x8x128xf32>
    %c0_93 = arith.constant 0 : index
    %c0_94 = arith.constant 0 : index
    %c0_95 = arith.constant 0 : index
    %c0_96 = arith.constant 0 : index
    %211 = vector.load %arg10[%c0_93, %c0_94, %c0_95, %c0_96] : memref<1x8x8x128xf32, #tpu.memory_space<vmem>>, vector<1x8x8x128xf32>
    tpu.vector_store %arg10[%c0_93, %c0_94, %c0_95, %c0_96], %210 {strides = array<i32>} : memref<1x8x8x128xf32, #tpu.memory_space<vmem>>, vector<1x8x8x128xf32>,
    return
  }
  func.func @transform_0(%arg0: i32) -> (i32, i32, i32, i32) {
    %c0_i32 = arith.constant 0 : i32
    %c0_i32_0 = arith.constant 0 : i32
    %c0_i32_1 = arith.constant 0 : i32
    %c0_i32_2 = arith.constant 0 : i32
    return %arg0, %c0_i32, %c0_i32_0, %c0_i32_1 : i32, i32, i32, i32
  }
  func.func @transform_1(%arg0: i32) -> (i32, i32) {
    %c0_i32 = arith.constant 0 : i32
    %c0_i32_0 = arith.constant 0 : i32
    %c0_i32_1 = arith.constant 0 : i32
    return %c0_i32, %c0_i32_0 : i32, i32
  }
  func.func @transform_2(%arg0: i32) -> (i32, i32) {
    %c0_i32 = arith.constant 0 : i32
    %c0_i32_0 = arith.constant 0 : i32
    %c0_i32_1 = arith.constant 0 : i32
    return %c0_i32, %c0_i32_0 : i32, i32
  }
  func.func @transform_3(%arg0: i32) -> (i32, i32, i32) {
    %c0_i32 = arith.constant 0 : i32
    %c0_i32_0 = arith.constant 0 : i32
    %c0_i32_1 = arith.constant 0 : i32
    %c0_i32_2 = arith.constant 0 : i32
    return %c0_i32, %c0_i32_0, %c0_i32_1 : i32, i32, i32
  }
  func.func @transform_4(%arg0: i32) -> (i32, i32, i32) {
    %c0_i32 = arith.constant 0 : i32
    %c0_i32_0 = arith.constant 0 : i32
    %c0_i32_1 = arith.constant 0 : i32
    %c0_i32_2 = arith.constant 0 : i32
    return %c0_i32, %c0_i32_0, %c0_i32_1 : i32, i32, i32
  }
  func.func @transform_5(%arg0: i32) -> (i32, i32) {
    %c0_i32 = arith.constant 0 : i32
    %c0_i32_0 = arith.constant 0 : i32
    %c0_i32_1 = arith.constant 0 : i32
    return %c0_i32, %c0_i32_0 : i32, i32
  }
  func.func @transform_6(%arg0: i32) -> (i32, i32) {
    %c0_i32 = arith.constant 0 : i32
    %c0_i32_0 = arith.constant 0 : i32
    %c0_i32_1 = arith.constant 0 : i32
    return %c0_i32, %c0_i32_0 : i32, i32
  }
  func.func @transform_7(%arg0: i32) -> (i32, i32) {
    %c0_i32 = arith.constant 0 : i32
    %c0_i32_0 = arith.constant 0 : i32
    %c0_i32_1 = arith.constant 0 : i32
    return %c0_i32, %c0_i32_0 : i32, i32
  }
  func.func @transform_8(%arg0: i32) -> (i32, i32) {
    %c0_i32 = arith.constant 0 : i32
    %c0_i32_0 = arith.constant 0 : i32
    %c0_i32_1 = arith.constant 0 : i32
    return %c0_i32, %c0_i32_0 : i32, i32
  }
  func.func @transform_9(%arg0: i32) -> (i32, i32, i32, i32) {
    %c0_i32 = arith.constant 0 : i32
    %c0_i32_0 = arith.constant 0 : i32
    %c0_i32_1 = arith.constant 0 : i32
    %c0_i32_2 = arith.constant 0 : i32
    return %arg0, %c0_i32, %c0_i32_0, %c0_i32_1 : i32, i32, i32, i32
  }
}

</mosaic_0001>

<bundles_post_ra>
// kernel: tile.13
= control target key start
LH: loop header
LB: loop body
LE: loop exit
PB: predicated region body
PF: predicated region fallthrough
CT: control target
= control target key end

     0   :  { %s22_s0 = inlined_call_operand.vmem [shape: f32[16], index: 0, kind: input, shape index: {}]   ;;  %s23_s1 = inlined_call_operand.vmem [shape: f32[4,16], index: 1, kind: output, shape index: {}]  }
   0x1   :  { %v4_v0 = vld [vmem:[%s22_s0] ss:$0 sm:$0xff] }
   0x2   :  { %5 = vst [vmem:[%s23_s1] sm:$0xf] %v4_v0 }

// kernel: tile.14
= control target key start
LH: loop header
LB: loop body
LE: loop exit
PB: predicated region body
PF: predicated region fallthrough
CT: control target
= control target key end

     0   :  { %vm7_vm0 = vcmask 130048   ;;  %s37_s8 = smov 16   ;;  %s38_s9 = smov 32   ;;  %vm13_vm1 = vcmask 523648   ;;  %vm19_vm2 = vcmask 392448   ;;  %vm25_vm3 = vcmask 261248   ;;  %s55_s0 = inlined_call_operand.vmem [shape: f32[4,16], index: 0, kind: input, shape index: {}]   ;;  %s56_s1 = inlined_call_operand.vmem [shape: f32[1,64], index: 1, kind: output, shape index: {}]  }
   0x1   :  { %v4_v0 = vld [vmem:[%s55_s0] sm:$0xf]  ;;  %s36_s0 = smov 48  }
   0x2   :  { %5 = vst [vmem:[#allocation1] sm:$0xf] %v4_v0 }
   0x9   :  { %v10_v1 = vld [vmem:[#allocation1 + $0x3] sm:$0x1]   ;;  %v22_v2 = vld [vmem:[#allocation1 + $0x1] sm:$0x1]   ;;  %v6_v3 = vld [vmem:[#allocation1] sm:$0x1]  }
   0xa   :  { %11 = vrot.lane.b32.xlu0 %v10_v1, %s36_s0  ;;  %23 = vrot.lane.b32.xlu1 %v22_v2, %s37_s8  ;;  %v16_v4 = vld [vmem:[#allocation1 + $0x2] sm:$0x1]   ;;  %8 = vst.msk [vmem:[#allocation0] sm:$0x1] %vm7_vm0, %v6_v3  }
   0xe   :  { %17 = vrot.lane.b32.xlu0 %v16_v4, %s38_s9 }
  0x7c   :  { %v12_v5 = vpop.permute.xlu0 %11   ;;  %v24_v6 = vpop.permute.xlu1 %23  }
  0x7d   :  { %14 = vst.msk [vmem:[#allocation0] sm:$0x1] %vm13_vm1, %v12_v5  }
  0x80   :  { %v18_v7 = vpop.permute.xlu0 %17  }
  0x81   :  { %20 = vst.msk [vmem:[#allocation0] sm:$0x1] %vm19_vm2, %v18_v7  }
  0x82   :  { %26 = vst.msk [vmem:[#allocation0] sm:$0x1] %vm25_vm3, %v24_v6  }
  0x89   :  { %v30_v8 = vld [vmem:[#allocation0] sm:$0x1] }
  0x8a   :  { %32 = vst [vmem:[%s56_s1] sm:$0x1] %v30_v8 }

// kernel: tile.18
= control target key start
LH: loop header
LB: loop body
LE: loop exit
PB: predicated region body
PF: predicated region fallthrough
CT: control target
= control target key end

     0   :  { %s28_s0 = inlined_call_operand.vmem [shape: f32[8], index: 0, kind: input, shape index: {}]   ;;  %s29_s1 = inlined_call_operand.vmem [shape: f32[16,8], index: 1, kind: output, shape index: {}]  }
   0x1   :  { %v4_v0 = vld [vmem:[%s28_s0] ss:$0 sm:$0xff] }
   0x2   :  { %5 = vst [vmem:[%s29_s1] sm:$0xff] %v4_v0  ;;  %8 = vst [vmem:[%s29_s1 + $0x8] sm:$0xff] %v4_v0 }

// kernel: tile.19
= control target key start
LH: loop header
LB: loop body
LE: loop exit
PB: predicated region body
PF: predicated region fallthrough
CT: control target
= control target key end

     0   :  { %s131_s10 = smov 120   ;;  %s132_s11 = smov 104   ;;  %vm3_vm0 = vcmask 64512   ;;  %vm9_vm1 = vcmask 1048512   ;;  %vm15_vm2 = vcmask 982912   ;;  %vm21_vm3 = vcmask 917312   ;;  %s207_s0 = inlined_call_operand.vmem [shape: f32[16,8], index: 0, kind: input, shape index: {}]   ;;  %s208_s1 = inlined_call_operand.vmem [shape: f32[1,128], index: 1, kind: output, shape index: {}]  }
   0x1   :  { %v101_v0 = vld [vmem:[%s207_s0 + $0xf] sm:$0x1]   ;;  %v103_v1 = vld [vmem:[%s207_s0 + $0xd] sm:$0x1]   ;;  %v102_v2 = vld [vmem:[%s207_s0 + $0xe] sm:$0x1]  }
   0x2   :  { %7 = vrot.lane.b32.xlu0 %v101_v0, %s131_s10  ;;  %19 = vrot.lane.b32.xlu1 %v103_v1, %s132_s11  ;;  %v104_v3 = vld [vmem:[%s207_s0 + $0xc] sm:$0x1]   ;;  %s133_s16 = smov 112   ;;  %s134_s17 = smov 96   ;;  %v105_v4 = vld [vmem:[%s207_s0 + $0xb] sm:$0x1]  }
   0x3   :  { %v106_v5 = vld [vmem:[%s207_s0 + $0xa] sm:$0x1]   ;;  %v2_v6 = vld [vmem:[%s207_s0] sm:$0x1]   ;;  %s135_s24 = smov 88   ;;  %s136_s25 = smov 80  }
   0x4   :  { %4 = vst.msk [vmem:[#allocation0] sm:$0x1] %vm3_vm0, %v2_v6   ;;  %v107_v7 = vld [vmem:[%s207_s0 + $0x9] sm:$0x1]   ;;  %v108_v8 = vld [vmem:[%s207_s0 + $0x8] sm:$0x1]  }
   0x5   :  { %s137_s30 = smov 72   ;;  %s138_s2 = smov 64   ;;  %v109_v9 = vld [vmem:[%s207_s0 + $0x7] sm:$0x1]   ;;  %v110_v10 = vld [vmem:[%s207_s0 + $0x6] sm:$0x1]  }
   0x6   :  { %13 = vrot.lane.b32.xlu0 %v102_v2, %s133_s16  ;;  %25 = vrot.lane.b32.xlu1 %v104_v3, %s134_s17  ;;  %s139_s7 = smov 56   ;;  %s140_s8 = smov 48   ;;  %v111_v11 = vld [vmem:[%s207_s0 + $0x5] sm:$0x1]   ;;  %v112_v12 = vld [vmem:[%s207_s0 + $0x4] sm:$0x1]  }
   0x7   :  { %s141_s13 = smov 40   ;;  %s142_s14 = smov 32   ;;  %v113_v13 = vld [vmem:[%s207_s0 + $0x3] sm:$0x1]   ;;  %v114_v14 = vld [vmem:[%s207_s0 + $0x2] sm:$0x1]  }
   0x8   :  { %s143_s19 = smov 24   ;;  %s144_s20 = smov 16   ;;  %v115_v15 = vld [vmem:[%s207_s0 + $0x1] sm:$0x1]   ;;  %vm27_vm4 = vcmask 851712   ;;  %vm33_vm5 = vcmask 786112  }
   0x9   :  { %s145_s0 = smov 8   ;;  %vm39_vm6 = vcmask 720512   ;;  %vm45_vm7 = vcmask 654912   ;;  %vm51_vm8 = vcmask 589312   ;;  %vm57_vm9 = vcmask 523712  }
   0xa   :  { %31 = vrot.lane.b32.xlu0 %v105_v4, %s135_s24  ;;  %37 = vrot.lane.b32.xlu1 %v106_v5, %s136_s25  ;;  %vm63_vm10 = vcmask 458112   ;;  %vm69_vm11 = vcmask 392512   ;;  %vm75_vm12 = vcmask 326912   ;;  %vm81_vm13 = vcmask 261312  }
   0xb   :  { %vm87_vm14 = vcmask 195712   ;;  %vm93_vm15 = vcmask 130112  }
   0xe   :  { %43 = vrot.lane.b32.xlu0 %v107_v7, %s137_s30  ;;  %49 = vrot.lane.b32.xlu1 %v108_v8, %s138_s2 }
  0x12   :  { %55 = vrot.lane.b32.xlu0 %v109_v9, %s139_s7  ;;  %61 = vrot.lane.b32.xlu1 %v110_v10, %s140_s8 }
  0x16   :  { %67 = vrot.lane.b32.xlu0 %v111_v11, %s141_s13  ;;  %73 = vrot.lane.b32.xlu1 %v112_v12, %s142_s14 }
  0x1a   :  { %79 = vrot.lane.b32.xlu0 %v113_v13, %s143_s19  ;;  %85 = vrot.lane.b32.xlu1 %v114_v14, %s144_s20 }
  0x1e   :  { %91 = vrot.lane.b32.xlu0 %v115_v15, %s145_s0 }
  0x74   :  { %v8_v16 = vpop.permute.xlu0 %7   ;;  %v20_v17 = vpop.permute.xlu1 %19  }
  0x75   :  { %10 = vst.msk [vmem:[#allocation0] sm:$0x1] %vm9_vm1, %v8_v16  }
  0x78   :  { %v14_v18 = vpop.permute.xlu0 %13   ;;  %v26_v19 = vpop.permute.xlu1 %25  }
  0x79   :  { %16 = vst.msk [vmem:[#allocation0] sm:$0x1] %vm15_vm2, %v14_v18  }
  0x7a   :  { %22 = vst.msk [vmem:[#allocation0] sm:$0x1] %vm21_vm3, %v20_v17  }
  0x7b   :  { %28 = vst.msk [vmem:[#allocation0] sm:$0x1] %vm27_vm4, %v26_v19  }
  0x7c   :  { %v32_v20 = vpop.permute.xlu0 %31   ;;  %v38_v21 = vpop.permute.xlu1 %37  }
  0x7d   :  { %34 = vst.msk [vmem:[#allocation0] sm:$0x1] %vm33_vm5, %v32_v20  }
  0x7e   :  { %40 = vst.msk [vmem:[#allocation0] sm:$0x1] %vm39_vm6, %v38_v21  }
  0x80   :  { %v44_v22 = vpop.permute.xlu0 %43   ;;  %v50_v23 = vpop.permute.xlu1 %49  }
  0x81   :  { %46 = vst.msk [vmem:[#allocation0] sm:$0x1] %vm45_vm7, %v44_v22  }
  0x82   :  { %52 = vst.msk [vmem:[#allocation0] sm:$0x1] %vm51_vm8, %v50_v23  }
  0x84   :  { %v56_v24 = vpop.permute.xlu0 %55   ;;  %v62_v25 = vpop.permute.xlu1 %61  }
  0x85   :  { %58 = vst.msk [vmem:[#allocation0] sm:$0x1] %vm57_vm9, %v56_v24  }
  0x86   :  { %64 = vst.msk [vmem:[#allocation0] sm:$0x1] %vm63_vm10, %v62_v25  }
  0x88   :  { %v68_v26 = vpop.permute.xlu0 %67   ;;  %v74_v27 = vpop.permute.xlu1 %73  }
  0x89   :  { %70 = vst.msk [vmem:[#allocation0] sm:$0x1] %vm69_vm11, %v68_v26  }
  0x8a   :  { %76 = vst.msk [vmem:[#allocation0] sm:$0x1] %vm75_vm12, %v74_v27  }
  0x8c   :  { %v80_v28 = vpop.permute.xlu0 %79   ;;  %v86_v29 = vpop.permute.xlu1 %85  }
  0x8d   :  { %82 = vst.msk [vmem:[#allocation0] sm:$0x1] %vm81_vm13, %v80_v28  }
  0x8e   :  { %88 = vst.msk [vmem:[#allocation0] sm:$0x1] %vm87_vm14, %v86_v29  }
  0x90   :  { %v92_v30 = vpop.permute.xlu0 %91  }
  0x91   :  { %94 = vst.msk [vmem:[#allocation0] sm:$0x1] %vm93_vm15, %v92_v30  }
  0x98   :  { %v98_v31 = vld [vmem:[#allocation0] sm:$0x1] }
  0x99   :  { %100 = vst [vmem:[%s208_s1] sm:$0x1] %v98_v31 }

// kernel: decoder_forward.1
= control target key start
LH: loop header
LB: loop body
LE: loop exit
PB: predicated region body
PF: predicated region fallthrough
CT: control target
= control target key end

     0   :  { %s5675_s30 = smov 0   ;;  %s7770_s0 = inlined_call_operand.vmem [shape: f32[2,8,8,4], index: 0, kind: input, shape index: {}]   ;;  %s7771_s1 = inlined_call_operand.vmem [shape: f32[36,32], index: 1, kind: input, shape index: {}]   ;;  %s7772_s2 = inlined_call_operand.vmem [shape: f32[1,32], index: 2, kind: input, shape index: {}]   ;;  %s7773_s3 = inlined_call_operand.vmem [shape: f32[2,288,16], index: 3, kind: input, shape index: {}]   ;;  %s7774_s4 = inlined_call_operand.vmem [shape: f32[2,16,32], index: 4, kind: input, shape index: {}]   ;;  %s7775_s5 = inlined_call_operand.vmem [shape: f32[288,64], index: 5, kind: input, shape index: {}]   ;;  %s7776_s6 = inlined_call_operand.vmem [shape: f32[1,64], index: 6, kind: input, shape index: {}]   ;;  %s7777_s7 = inlined_call_operand.vmem [shape: f32[256,128], index: 7, kind: input, shape index: {}]   ;;  %s7778_s8 = inlined_call_operand.vmem [shape: f32[1,128], index: 8, kind: input, shape index: {}]   ;;  %s7779_s9 = inlined_call_operand.vmem [shape: f32[2,8,8,128], index: 9, kind: output, shape index: {}]  }
   0x1 LB: > { %s4261_s10 = sadd.s32 4294967295, %s5609_s30   ;;  %p4265_p0 = scmp.ge.s32.totalorder %s5609_s30, 1  ;;  %s5609_s30 = sphi %s5675_s30, %s19_s30  }
   0x2   : > { %p287_p1 = scmp.lt.s32.totalorder %s5609_s30, 3 }
   0x4   : > { %p288_p2 = pnand %p4265_p0, %p287_p1 }
   0x5   : > { %vm333_vm0 = vcmask (!%p288_p2), 31744   ;;  %vm335_vm1 = vcmask (!%p288_p2), 25600   ;;  %v5611_v0 = vmov (!%p288_p2), 0.0   ;;  %p323_p3 = scmp.lt.s32.totalorder (!%p288_p2), %s4261_s10, 1  ;;  %vm537_vm2 = vcmask (!%p288_p2), 1045504   ;;  %s5612_s15 = smov (!%p288_p2), 8  }
   0x6   : > { %291 = sbr.rel (%p288_p2) target bundleno = 2530 (0x9e2), region = 56  ;;  %334 = vst.msk [vmem:[#allocation2] sm:$0xff] (!%p288_p2), %vm333_vm0, %v5611_v0  ;;  %337 = vst.msk [vmem:[#allocation2 + $0x10] sm:$0xff] (!%p288_p2), %vm333_vm0, %v5611_v0  ;;  %vm512_vm3 = vcmask (!%p288_p2), 1046528   ;;  %vm377_vm4 = vcmask (!%p288_p2), 130048   ;;  %s5613_s16 = smov (!%p288_p2), 4  }
   0x7   : > { %336 = vst.msk [vmem:[#allocation2 + $0x8] sm:$0x3] (!%p288_p2), %vm335_vm1, %v5611_v0  ;;  %338 = vst.msk [vmem:[#allocation2 + $0x18] sm:$0x3] (!%p288_p2), %vm335_vm1, %v5611_v0  ;;  %s5614_s17 = smov (!%p288_p2), 12   ;;  %s5615_s18 = smov (!%p288_p2), 16  }
   0x8   : > { %339 = vst.msk [vmem:[#allocation2 + $0x20] sm:$0xff] (!%p288_p2), %vm333_vm0, %v5611_v0  ;;  %341 = vst.msk [vmem:[#allocation2 + $0x30] sm:$0xff] (!%p288_p2), %vm333_vm0, %v5611_v0  ;;  %v839_v33 = vld [vmem:[%s7771_s1] sm:$0xff] (!%p288_p2)  ;;  %v840_v34 = vld [vmem:[%s7771_s1 + $0x8] sm:$0xff] (!%p288_p2)  ;;  %s5616_s23 = smov (!%p288_p2), 20   ;;  %vm355_vm5 = vcmask (!%p288_p2), 261120  }
   0x9   : > { %340 = vst.msk [vmem:[#allocation2 + $0x28] sm:$0x3] (!%p288_p2), %vm335_vm1, %v5611_v0  ;;  %342 = vst.msk [vmem:[#allocation2 + $0x38] sm:$0x3] (!%p288_p2), %vm335_vm1, %v5611_v0  ;;  %v4771_v35 = vpack.c.bf16 (!%p288_p2), %v840_v34, %v839_v33  ;;  %v841_v38 = vld [vmem:[%s7771_s1 + $0x10] sm:$0xff] (!%p288_p2)  ;;  %v842_v39 = vld [vmem:[%s7771_s1 + $0x18] sm:$0xff] (!%p288_p2) }
   0xa   : > { %343 = vst.msk [vmem:[#allocation2 + $0x40] sm:$0xff] (!%p288_p2), %vm333_vm0, %v5611_v0  ;;  %345 = vst.msk [vmem:[#allocation2 + $0x50] sm:$0xff] (!%p288_p2), %vm333_vm0, %v5611_v0  ;;  %s5617_s28 = smov (!%p288_p2), 24   ;;  %v4775_v40 = vpack.c.bf16 (!%p288_p2), %v842_v39, %v841_v38  ;;  %v843_v43 = vld [vmem:[%s7771_s1 + $0x20] sm:$0xf] (!%p288_p2)  ;;  %vm876_vm6 = vcmask (!%p288_p2), 1043456  }
   0xb   : > { %344 = vst.msk [vmem:[#allocation2 + $0x48] sm:$0x3] (!%p288_p2), %vm335_vm1, %v5611_v0  ;;  %346 = vst.msk [vmem:[#allocation2 + $0x58] sm:$0x3] (!%p288_p2), %vm335_vm1, %v5611_v0  ;;  %4772 = vmatprep.subr.bf16.mxu1 (!%p288_p2), %v4771_v35  ;;  %s5618_s13 = smov (!%p288_p2), 28   ;;  %vm357_vm7 = vcmask (!%p288_p2), 254976  }
   0xc   : > { %347 = vst.msk [vmem:[#allocation2 + $0x60] sm:$0xff] (!%p288_p2), %vm333_vm0, %v5611_v0  ;;  %349 = vst.msk [vmem:[#allocation2 + $0x70] sm:$0xff] (!%p288_p2), %vm333_vm0, %v5611_v0  ;;  %4774 = vmatpush3.bf16.msra.mxu1 (!%p288_p2), %v4771_v35  ;;  %vm778_vm8 = vcmask (!%p288_p2), 64512   ;;  %vm787_vm9 = vcmask (!%p288_p2), 97280   ;;  %vm804_vm10 = vcmask (!%p288_p2), 162816   ;;  %vm813_vm11 = vcmask (!%p288_p2), 195584  }
   0xd   : > { %348 = vst.msk [vmem:[#allocation2 + $0x68] sm:$0x3] %vm335_vm1, %v5611_v0  ;;  %350 = vst.msk [vmem:[#allocation2 + $0x78] sm:$0x3] %vm335_vm1, %v5611_v0  ;;  %s7781_s10 = smov (!%p323_p3, %s4261_s10), 1  ;;  %v5736_v4 = vld [vmem:[#allocation2] sm:$0xff]  ;;  %4776 = vmatprep.subr.bf16.mxu1 %v4775_v40 }
   0xe   : > { %351 = vst.msk [vmem:[#allocation2 + $0x80] sm:$0xff] %vm333_vm0, %v5611_v0  ;;  %353 = vst.msk [vmem:[#allocation2 + $0x90] sm:$0xff] %vm333_vm0, %v5611_v0  ;;  %s4362_s11 = sshll.u32 %s7781_s10, 6  ;;  %v477_v5 = vld [vmem:[#allocation2 + $0x8] sm:$0x3]  ;;  %v538_v7 = vrot.slane %v5736_v4, 2 }
   0xf   : > { %352 = vst.msk [vmem:[#allocation2 + $0x88] sm:$0x3] %vm335_vm1, %v5611_v0  ;;  %354 = vst.msk [vmem:[#allocation2 + $0x98] sm:$0x3] %vm335_vm1, %v5611_v0  ;;  %s5731_s14 = scalar_lea.vmem %s7770_s0, %s4362_s11  ;;  %v539_v8 = vrot.slane %v477_v5, 2  ;;  %v513_v9 = vrot.slane %v5736_v4, 1 }
  0x10   : > { %v460_v1 = vld [vmem:[%s5731_s14 + $0x8] sm:$0xff]  ;;  %v459_v2 = vld [vmem:[%s5731_s14] sm:$0xff]  ;;  %v461_v3 = vld [vmem:[%s5731_s14 + $0x10] sm:$0xff]  ;;  %v514_v10 = vrot.slane %v477_v5, 1  ;;  %381 = vst.msk [vmem:[#allocation4 + $0x10] sm:$0xff] %vm377_vm4, %v5611_v0  ;;  %4778 = vmatpush3.bf16.msra.mxu1 %v4775_v40  ;;  %vm822_vm12 = vcmask 228352  }
  0x11   : > { %469 = vst.msk [vmem:[#allocation2 + $0x21] sm:$0xff] %vm333_vm0, %v460_v1  ;;  %468 = vst.msk [vmem:[#allocation2 + $0x11] sm:$0xff] %vm333_vm0, %v459_v2  ;;  %v462_v6 = vld [vmem:[%s5731_s14 + $0x18] sm:$0xff]  ;;  %v463_v11 = vld [vmem:[%s5731_s14 + $0x20] sm:$0xff]  ;;  %v540_v15 = vsel %vm537_vm2, %v538_v7, %v539_v8  ;;  %4665 = vmatprep.subr.msk.mxu1 %vm876_vm6, %v843_v43  ;;  %vm851_vm13 = vcmask 293888   ;;  %s5620_s26 = smov 64  }
  0x12   : > { %470 = vst.msk [vmem:[#allocation2 + $0x31] sm:$0xff] %vm333_vm0, %v461_v3  ;;  %471 = vst.msk [vmem:[#allocation2 + $0x41] sm:$0xff] %vm333_vm0, %v462_v6  ;;  %v464_v12 = vld [vmem:[%s5731_s14 + $0x28] sm:$0xff]  ;;  %v465_v13 = vld [vmem:[%s5731_s14 + $0x30] sm:$0xff]  ;;  %v515_v16 = vsel %vm512_vm3, %v513_v9, %v514_v10  ;;  %602 = vrot.lane.b32.xlu1 %v540_v15, %s5612_s15  ;;  %s5621_s27 = smov 96   ;;  %vm1274_vm14 = vcmask 523264  }
  0x13   : > { %383 = vst.msk [vmem:[#allocation4 + $0x20] sm:$0xff] %vm377_vm4, %v5611_v0  ;;  %385 = vst.msk [vmem:[#allocation4 + $0x30] sm:$0xff] %vm377_vm4, %v5611_v0  ;;  %v466_v14 = vld [vmem:[%s5731_s14 + $0x38] sm:$0xff]  ;;  %578 = vrot.lane.b32.xlu0 %v515_v16, %s5613_s16  ;;  %s5619_s14 = smov 32   ;;  %vm1283_vm15 = vcmask 785408   ;;  %s5623_s29 = smov 80  }
  0x14   : > { %387 = vst.msk [vmem:[#allocation4 + $0x40] sm:$0xff] %vm377_vm4, %v5611_v0  ;;  %389 = vst.msk [vmem:[#allocation4 + $0x50] sm:$0xff] %vm377_vm4, %v5611_v0  ;;  %4666 = vmatpush3.msk.msra.mxu1 %vm876_vm6, %v843_v43  ;;  %s5624_s12 = smov 48   ;;  %vm3955_vm1 = vcmask 392192  }
  0x15   : > { %391 = vst.msk [vmem:[#allocation4 + $0x60] sm:$0xff] %vm377_vm4, %v5611_v0  ;;  %393 = vst.msk [vmem:[#allocation4 + $0x70] sm:$0xff] %vm377_vm4, %v5611_v0 }
  0x16   : > { %395 = vst.msk [vmem:[#allocation4 + $0x80] sm:$0xff] %vm377_vm4, %v5611_v0  ;;  %397 = vst.msk [vmem:[#allocation4 + $0x90] sm:$0xff] %vm377_vm4, %v5611_v0 }
  0x17   : > { %401 = vst.msk [vmem:[#allocation4 + $0xb0] sm:$0xff] %vm377_vm4, %v5611_v0  ;;  %403 = vst.msk [vmem:[#allocation4 + $0xc0] sm:$0xff] %vm377_vm4, %v5611_v0 }
  0x18   : > { %405 = vst.msk [vmem:[#allocation4 + $0xd0] sm:$0xff] %vm377_vm4, %v5611_v0  ;;  %407 = vst.msk [vmem:[#allocation4 + $0xe0] sm:$0xff] %vm377_vm4, %v5611_v0  ;;  %v5829_v17 = vld [vmem:[#allocation2 + $0x20] sm:$0xff]  ;;  %v5831_v18 = vld [vmem:[#allocation2 + $0x10] sm:$0xff] }
  0x19   : > { %409 = vst.msk [vmem:[#allocation4 + $0xf0] sm:$0xff] %vm377_vm4, %v5611_v0  ;;  %411 = vst.msk [vmem:[#allocation4 + $0x100] sm:$0xff] %vm377_vm4, %v5611_v0  ;;  %v479_v19 = vld [vmem:[#allocation2 + $0x18] sm:$0x3]  ;;  %628 = vrot.lane.b32.xlu1 %v5829_v17, %s5614_s17  ;;  %626 = vrot.lane.b32.xlu0 %v5831_v18, %s5614_s17  ;;  %v541_v20 = vrot.slane %v5831_v18, 2  ;;  %v516_v22 = vrot.slane %v5831_v18, 1 }
  0x1a   : > { %413 = vst.msk [vmem:[#allocation4 + $0x110] sm:$0xff] %vm377_vm4, %v5611_v0  ;;  %415 = vst.msk [vmem:[#allocation4 + $0x120] sm:$0xff] %vm377_vm4, %v5611_v0  ;;  %v542_v21 = vrot.slane %v479_v19, 2  ;;  %v517_v23 = vrot.slane %v479_v19, 1  ;;  %v481_v24 = vld [vmem:[#allocation2 + $0x28] sm:$0x3] }
  0x1b   : > { %417 = vst.msk [vmem:[#allocation4 + $0x130] sm:$0xff] %vm377_vm4, %v5611_v0  ;;  %419 = vst.msk [vmem:[#allocation4 + $0x140] sm:$0xff] %vm377_vm4, %v5611_v0  ;;  %v519_v25 = vrot.slane %v5829_v17, 1  ;;  %v520_v26 = vrot.slane %v481_v24, 1  ;;  %v544_v30 = vrot.slane %v5829_v17, 2  ;;  %v545_v31 = vrot.slane %v481_v24, 2 }
  0x1c   : > { %421 = vst.msk [vmem:[#allocation4 + $0x150] sm:$0xff] %vm377_vm4, %v5611_v0  ;;  %423 = vst.msk [vmem:[#allocation4 + $0x160] sm:$0xff] %vm377_vm4, %v5611_v0  ;;  %v543_v27 = vsel %vm537_vm2, %v541_v20, %v542_v21  ;;  %v518_v28 = vsel %vm512_vm3, %v516_v22, %v517_v23  ;;  %v5857_v36 = vld [vmem:[#allocation2 + $0x30] sm:$0xff]  ;;  %v483_v37 = vld [vmem:[#allocation2 + $0x38] sm:$0x3] }
  0x1d   : > { %425 = vst.msk [vmem:[#allocation4 + $0x170] sm:$0xff] %vm377_vm4, %v5611_v0  ;;  %427 = vst.msk [vmem:[#allocation4 + $0x180] sm:$0xff] %vm377_vm4, %v5611_v0  ;;  %604 = vrot.lane.b32.xlu1 %v543_v27, %s5612_s15  ;;  %580 = vrot.lane.b32.xlu0 %v518_v28, %s5613_s16  ;;  %v521_v29 = vsel %vm512_vm3, %v519_v25, %v520_v26  ;;  %v546_v32 = vsel %vm537_vm2, %v544_v30, %v545_v31  ;;  %v522_v41 = vrot.slane %v5857_v36, 1  ;;  %v5902_v48 = vld [vmem:[#allocation2 + $0x40] sm:$0xff]  ;;  %v485_v49 = vld [vmem:[#allocation2 + $0x48] sm:$0x3] }
  0x1e   : > { %429 = vst.msk [vmem:[#allocation4 + $0x190] sm:$0xff] %vm377_vm4, %v5611_v0  ;;  %431 = vst.msk [vmem:[#allocation4 + $0x1a0] sm:$0xff] %vm377_vm4, %v5611_v0  ;;  %v523_v42 = vrot.slane %v483_v37, 1  ;;  %v547_v45 = vrot.slane %v5857_v36, 2  ;;  %v548_v46 = vrot.slane %v483_v37, 2  ;;  %v525_v50 = vrot.slane %v5902_v48, 1 }
  0x1f   : > { %433 = vst.msk [vmem:[#allocation4 + $0x1b0] sm:$0xff] %vm377_vm4, %v5611_v0  ;;  %435 = vst.msk [vmem:[#allocation4 + $0x1c0] sm:$0xff] %vm377_vm4, %v5611_v0  ;;  %v526_v51 = vrot.slane %v485_v49, 1  ;;  %v550_v53 = vrot.slane %v5902_v48, 2  ;;  %v551_v54 = vrot.slane %v485_v49, 2 }
  0x20   : > { %439 = vst.msk [vmem:[#allocation4 + $0x1e0] sm:$0xff] %vm377_vm4, %v5611_v0  ;;  %441 = vst.msk [vmem:[#allocation4 + $0x1f0] sm:$0xff] %vm377_vm4, %v5611_v0  ;;  %v524_v44 = vsel %vm512_vm3, %v522_v41, %v523_v42  ;;  %v549_v47 = vsel %vm537_vm2, %v547_v45, %v548_v46 }
  0x21   : > { %443 = vst.msk [vmem:[#allocation4 + $0x200] sm:$0xff] %vm377_vm4, %v5611_v0  ;;  %445 = vst.msk [vmem:[#allocation4 + $0x210] sm:$0xff] %vm377_vm4, %v5611_v0  ;;  %652 = vrot.lane.b32.xlu1 %v521_v29, %s5615_s18  ;;  %650 = vrot.lane.b32.xlu0 %v518_v28, %s5615_s18  ;;  %v527_v52 = vsel %vm512_vm3, %v525_v50, %v526_v51  ;;  %v552_v55 = vsel %vm537_vm2, %v550_v53, %v551_v54  ;;  %v494_v28 = vld [vmem:[#allocation2 + $0x90] sm:$0xff] }
  0x22   : > { %447 = vst.msk [vmem:[#allocation4 + $0x220] sm:$0xff] %vm377_vm4, %v5611_v0  ;;  %449 = vst.msk [vmem:[#allocation4 + $0x230] sm:$0xff] %vm377_vm4, %v5611_v0  ;;  %v572_v30 = vrot.slane %v494_v28, 1  ;;  %v575_v34 = vrot.slane %v494_v28, 2 }
  0x23   : > { %451 = vst.msk [vmem:[#allocation4 + $0x240] sm:$0xff] %vm377_vm4, %v5611_v0  ;;  %453 = vst.msk [vmem:[#allocation4 + $0x250] sm:$0xff] %vm377_vm4, %v5611_v0 }
  0x24   : > { %455 = vst.msk [vmem:[#allocation4 + $0x260] sm:$0xff] %vm377_vm4, %v5611_v0 }
  0x25   : > { %472 = vst.msk [vmem:[#allocation2 + $0x51] sm:$0xff] %vm333_vm0, %v463_v11  ;;  %473 = vst.msk [vmem:[#allocation2 + $0x61] sm:$0xff] %vm333_vm0, %v464_v12  ;;  %676 = vrot.lane.b32.xlu1 %v546_v32, %s5616_s23  ;;  %674 = vrot.lane.b32.xlu0 %v543_v27, %s5616_s23 }
  0x26   : > { %474 = vst.msk [vmem:[#allocation2 + $0x71] sm:$0xff] %vm333_vm0, %v465_v13  ;;  %475 = vst.msk [vmem:[#allocation2 + $0x81] sm:$0xff] %vm333_vm0, %v466_v14 }
  0x27   : > { %356 = vst.msk [vmem:[#allocation3] sm:$0xff] %vm355_vm5, %v5611_v0  ;;  %359 = vst.msk [vmem:[#allocation3 + $0x10] sm:$0xff] %vm355_vm5, %v5611_v0 }
  0x28   : > { %361 = vst.msk [vmem:[#allocation3 + $0x20] sm:$0xff] %vm355_vm5, %v5611_v0  ;;  %363 = vst.msk [vmem:[#allocation3 + $0x30] sm:$0xff] %vm355_vm5, %v5611_v0 }
  0x29   : > { %365 = vst.msk [vmem:[#allocation3 + $0x40] sm:$0xff] %vm355_vm5, %v5611_v0  ;;  %367 = vst.msk [vmem:[#allocation3 + $0x50] sm:$0xff] %vm355_vm5, %v5611_v0  ;;  %582 = vrot.lane.b32.xlu1 %v521_v29, %s5613_s16  ;;  %698 = vrot.lane.b32.xlu0 %v5829_v17, %s5617_s28 }
  0x2a   : > { %369 = vst.msk [vmem:[#allocation3 + $0x60] sm:$0xff] %vm355_vm5, %v5611_v0  ;;  %371 = vst.msk [vmem:[#allocation3 + $0x70] sm:$0xff] %vm355_vm5, %v5611_v0 }
  0x2b   : > { %373 = vst.msk [vmem:[#allocation3 + $0x80] sm:$0xff] %vm355_vm5, %v5611_v0  ;;  %375 = vst.msk [vmem:[#allocation3 + $0x90] sm:$0xff] %vm355_vm5, %v5611_v0 }
  0x2c   : > { %v5916_v56 = vld [vmem:[#allocation2 + $0x50] sm:$0xff]  ;;  %v487_v57 = vld [vmem:[#allocation2 + $0x58] sm:$0x3]  ;;  %v5934_v1 = vld [vmem:[#allocation2 + $0x60] sm:$0xff]  ;;  %362 = vst.msk [vmem:[#allocation3 + $0x28] sm:$0x3] %vm357_vm7, %v5611_v0 }
  0x2d   : > { %722 = vrot.lane.b32.xlu1 %v521_v29, %s5618_s13  ;;  %700 = vrot.lane.b32.xlu0 %v5857_v36, %s5617_s28  ;;  %v528_v58 = vrot.slane %v5916_v56, 1  ;;  %v529_v59 = vrot.slane %v487_v57, 1  ;;  %v553_v61 = vrot.slane %v5916_v56, 2  ;;  %v554_v62 = vrot.slane %v487_v57, 2  ;;  %v489_v2 = vld [vmem:[#allocation2 + $0x68] sm:$0x3] }
  0x2e   : > { %v531_v3 = vrot.slane %v5934_v1, 1  ;;  %v532_v5 = vrot.slane %v489_v2, 1  ;;  %v556_v7 = vrot.slane %v5934_v1, 2  ;;  %v557_v8 = vrot.slane %v489_v2, 2  ;;  %v5948_v10 = vld [vmem:[#allocation2 + $0x70] sm:$0xff]  ;;  %v492_v20 = vld [vmem:[#allocation2 + $0x80] sm:$0xff] }
  0x2f   : > { %v530_v60 = vsel %vm512_vm3, %v528_v58, %v529_v59  ;;  %v555_v63 = vsel %vm537_vm2, %v553_v61, %v554_v62  ;;  %v491_v11 = vld [vmem:[#allocation2 + $0x78] sm:$0x3]  ;;  %v534_v12 = vrot.slane %v5948_v10, 1  ;;  %v559_v15 = vrot.slane %v5948_v10, 2  ;;  %v493_v21 = vld [vmem:[#allocation2 + $0x88] sm:$0x3] }
  0x30   : > { %v533_v6 = vsel %vm512_vm3, %v531_v3, %v532_v5  ;;  %v558_v9 = vsel %vm537_vm2, %v556_v7, %v557_v8  ;;  %v535_v13 = vrot.slane %v491_v11, 1  ;;  %v560_v16 = vrot.slane %v491_v11, 2  ;;  %v495_v29 = vld [vmem:[#allocation2 + $0x98] sm:$0x3]  ;;  %358 = vst.msk [vmem:[#allocation3 + $0x8] sm:$0x3] %vm357_vm7, %v5611_v0 }
  0x31   : > { %606 = vrot.lane.b32.xlu1 %v546_v32, %s5612_s15  ;;  %584 = vrot.lane.b32.xlu0 %v524_v44, %s5613_s16  ;;  %v564_v22 = vrot.slane %v492_v20, 1  ;;  %v565_v23 = vrot.slane %v493_v21, 1  ;;  %v567_v25 = vrot.slane %v492_v20, 2  ;;  %v568_v26 = vrot.slane %v493_v21, 2  ;;  %360 = vst.msk [vmem:[#allocation3 + $0x18] sm:$0x3] %vm357_vm7, %v5611_v0 }
  0x32   : > { %v536_v14 = vsel %vm512_vm3, %v534_v12, %v535_v13  ;;  %v561_v19 = vsel %vm537_vm2, %v559_v15, %v560_v16  ;;  %v573_v31 = vrot.slane %v495_v29, 1  ;;  %364 = vst.msk [vmem:[#allocation3 + $0x38] sm:$0x3] %vm357_vm7, %v5611_v0  ;;  %366 = vst.msk [vmem:[#allocation3 + $0x48] sm:$0x3] %vm357_vm7, %v5611_v0  ;;  %v576_v37 = vrot.slane %v495_v29, 2 }
  0x33   : > { %v566_v24 = vsel %vm512_vm3, %v564_v22, %v565_v23  ;;  %v569_v27 = vsel %vm537_vm2, %v567_v25, %v568_v26  ;;  %368 = vst.msk [vmem:[#allocation3 + $0x58] sm:$0x3] %vm357_vm7, %v5611_v0  ;;  %370 = vst.msk [vmem:[#allocation3 + $0x68] sm:$0x3] %vm357_vm7, %v5611_v0 }
  0x34   : > { %372 = vst.msk [vmem:[#allocation3 + $0x78] sm:$0x3] %vm357_vm7, %v5611_v0  ;;  %374 = vst.msk [vmem:[#allocation3 + $0x88] sm:$0x3] %vm357_vm7, %v5611_v0  ;;  %v574_v35 = vsel %vm512_vm3, %v572_v30, %v573_v31  ;;  %v577_v40 = vsel %vm537_vm2, %v575_v34, %v576_v37 }
  0x35   : > { %746 = vrot.lane.b32.xlu1 %v546_v32, %s5619_s14  ;;  %724 = vrot.lane.b32.xlu0 %v524_v44, %s5618_s13  ;;  %376 = vst.msk [vmem:[#allocation3 + $0x98] sm:$0x3] %vm357_vm7, %v5611_v0 }
  0x39   : > { %630 = vrot.lane.b32.xlu1 %v5857_v36, %s5614_s17  ;;  %608 = vrot.lane.b32.xlu0 %v549_v47, %s5612_s15 }
  0x3d   : > { %632 = vrot.lane.b32.xlu1 %v5902_v48, %s5614_s17  ;;  %748 = vrot.lane.b32.xlu0 %v549_v47, %s5619_s14 }
  0x41   : > { %656 = vrot.lane.b32.xlu1 %v527_v52, %s5615_s18  ;;  %654 = vrot.lane.b32.xlu0 %v524_v44, %s5615_s18 }
  0x45   : > { %680 = vrot.lane.b32.xlu1 %v552_v55, %s5616_s23  ;;  %678 = vrot.lane.b32.xlu0 %v549_v47, %s5616_s23 }
  0x49   : > { %704 = vrot.lane.b32.xlu1 %v5916_v56, %s5617_s28  ;;  %702 = vrot.lane.b32.xlu0 %v5902_v48, %s5617_s28 }
  0x4d   : > { %728 = vrot.lane.b32.xlu1 %v530_v60, %s5618_s13  ;;  %726 = vrot.lane.b32.xlu0 %v527_v52, %s5618_s13 }
  0x51   : > { %586 = vrot.lane.b32.xlu1 %v527_v52, %s5613_s16  ;;  %750 = vrot.lane.b32.xlu0 %v552_v55, %s5619_s14 }
  0x55   : > { %588 = vrot.lane.b32.xlu1 %v530_v60, %s5613_s16  ;;  %752 = vrot.lane.b32.xlu0 %v555_v63, %s5619_s14 }
  0x59   : > { %612 = vrot.lane.b32.xlu1 %v555_v63, %s5612_s15  ;;  %610 = vrot.lane.b32.xlu0 %v552_v55, %s5612_s15 }
  0x5d   : > { %636 = vrot.lane.b32.xlu1 %v5934_v1, %s5614_s17  ;;  %634 = vrot.lane.b32.xlu0 %v5916_v56, %s5614_s17 }
  0x61   : > { %660 = vrot.lane.b32.xlu1 %v533_v6, %s5615_s18  ;;  %658 = vrot.lane.b32.xlu0 %v530_v60, %s5615_s18 }
  0x65   : > { %684 = vrot.lane.b32.xlu1 %v558_v9, %s5616_s23  ;;  %682 = vrot.lane.b32.xlu0 %v555_v63, %s5616_s23 }
  0x69   : > { %708 = vrot.lane.b32.xlu1 %v5948_v10, %s5617_s28  ;;  %706 = vrot.lane.b32.xlu0 %v5934_v1, %s5617_s28 }
  0x6d   : > { %732 = vrot.lane.b32.xlu1 %v536_v14, %s5618_s13  ;;  %730 = vrot.lane.b32.xlu0 %v533_v6, %s5618_s13 }
  0x71   : > { %590 = vrot.lane.b32.xlu1 %v533_v6, %s5613_s16  ;;  %754 = vrot.lane.b32.xlu0 %v558_v9, %s5619_s14 }
  0x75   : > { %592 = vrot.lane.b32.xlu1 %v536_v14, %s5613_s16  ;;  %756 = vrot.lane.b32.xlu0 %v561_v19, %s5619_s14 }
  0x79   : > { %616 = vrot.lane.b32.xlu1 %v561_v19, %s5612_s15  ;;  %614 = vrot.lane.b32.xlu0 %v558_v9, %s5612_s15 }
  0x7d   : > { %640 = vrot.lane.b32.xlu1 %v492_v20, %s5614_s17  ;;  %638 = vrot.lane.b32.xlu0 %v5948_v10, %s5614_s17 }
  0x81   : > { %664 = vrot.lane.b32.xlu1 %v566_v24, %s5615_s18  ;;  %662 = vrot.lane.b32.xlu0 %v536_v14, %s5615_s18 }
  0x84   : > { %v603_v32 = vpop.permute.xlu1 %602 }
  0x85   : > { %688 = vrot.lane.b32.xlu1 %v569_v27, %s5616_s23  ;;  %686 = vrot.lane.b32.xlu0 %v561_v19, %s5616_s23  ;;  %v579_v33 = vpop.permute.xlu0 %578 }
  0x86   : > { %v770_v50 = vsel %vm333_vm0, %v5736_v4, %v579_v33 }
  0x87   : > { %v779_v53 = vsel %vm778_vm8, %v770_v50, %v603_v32 }
  0x89   : > { %712 = vrot.lane.b32.xlu1 %v494_v28, %s5617_s28  ;;  %710 = vrot.lane.b32.xlu0 %v492_v20, %s5617_s28  ;;  %s5622_s28 = smov 112  }
  0x8b   : > { %v629_v38 = vpop.permute.xlu1 %628  ;;  %v627_v39 = vpop.permute.xlu0 %626 }
  0x8c   : > { %v788_v54 = vsel %vm787_vm9, %v779_v53, %v627_v39 }
  0x8d   : > { %736 = vrot.lane.b32.xlu1 %v574_v35, %s5618_s13  ;;  %734 = vrot.lane.b32.xlu0 %v566_v24, %s5618_s13 }
  0x8f   : > { %v605_v41 = vpop.permute.xlu1 %604  ;;  %v581_v42 = vpop.permute.xlu0 %580 }
  0x90   : > { %v771_v55 = vsel %vm333_vm0, %v5831_v18, %v581_v42 }
  0x91   : > { %760 = vrot.lane.b32.xlu1 %v577_v40, %s5619_s14  ;;  %758 = vrot.lane.b32.xlu0 %v569_v27, %s5619_s14  ;;  %v780_v60 = vsel %vm778_vm8, %v771_v55, %v605_v41 }
  0x92   : > { %v789_v18 = vsel %vm787_vm9, %v780_v60, %v629_v38 }
  0x93   : > { %v653_v43 = vpop.permute.xlu1 %652  ;;  %v651_v44 = vpop.permute.xlu0 %650 }
  0x94   : > { %v796_v59 = vsel %vm377_vm4, %v788_v54, %v651_v44  ;;  %v797_v7 = vsel %vm377_vm4, %v789_v18, %v653_v43 }
  0x97   : > { %v677_v45 = vpop.permute.xlu1 %676  ;;  %v675_v46 = vpop.permute.xlu0 %674 }
  0x98   : > { %v805_v4 = vsel %vm804_vm10, %v796_v59, %v675_v46  ;;  %v806_v8 = vsel %vm804_vm10, %v797_v7, %v677_v45 }
  0x9b   : > { %v583_v47 = vpop.permute.xlu1 %582  ;;  %v699_v49 = vpop.permute.xlu0 %698 }
  0x9c   : > { %v814_v61 = vsel %vm813_vm11, %v805_v4, %v699_v49  ;;  %v772_v23 = vsel %vm333_vm0, %v5829_v17, %v583_v47 }
  0x9f   : > { %v723_v51 = vpop.permute.xlu1 %722  ;;  %v701_v52 = vpop.permute.xlu0 %700 }
  0xa0   : > { %v823_v62 = vsel %vm822_vm12, %v814_v61, %v723_v51  ;;  %v815_v9 = vsel %vm813_vm11, %v806_v8, %v701_v52 }
  0xa3   : > { %v607_v57 = vpop.permute.xlu1 %606  ;;  %v585_v58 = vpop.permute.xlu0 %584 }
  0xa4   : > { %v781_v24 = vsel %vm778_vm8, %v772_v23, %v607_v57  ;;  %v773_v29 = vsel %vm333_vm0, %v5857_v36, %v585_v58 }
  0xa7   : > { %v747_v63 = vpop.permute.xlu1 %746  ;;  %v725_v2 = vpop.permute.xlu0 %724 }
  0xa8   : > { %v831_v3 = vsel %vm355_vm5, %v823_v62, %v747_v63  ;;  %v824_v11 = vsel %vm822_vm12, %v815_v9, %v725_v2 }
  0xa9   : > { %4667 = vmatprep.mubr.msk.f32.mxu1 %vm851_vm13, %v831_v3 }
  0xab   : > { %v631_v5 = vpop.permute.xlu1 %630  ;;  %v609_v6 = vpop.permute.xlu0 %608 }
  0xac   : > { %v790_v25 = vsel %vm787_vm9, %v781_v24, %v631_v5  ;;  %v782_v31 = vsel %vm778_vm8, %v773_v29, %v609_v6 }
  0xaf   : > { %v633_v12 = vpop.permute.xlu1 %632  ;;  %v749_v13 = vpop.permute.xlu0 %748 }
  0xb0   : > { %v832_v14 = vsel %vm355_vm5, %v824_v11, %v749_v13  ;;  %v791_v33 = vsel %vm787_vm9, %v782_v31, %v633_v12 }
  0xb1   : > { %4668 = vmatmul.mubr.msk.f32.vlgmr.msra.gmra.mrb[0].mxu1 %vm851_vm13, %v832_v14 }
  0xb3   : > { %v657_v15 = vpop.permute.xlu1 %656  ;;  %v655_v16 = vpop.permute.xlu0 %654 }
  0xb4   : > { %v798_v28 = vsel %vm377_vm4, %v790_v25, %v655_v16  ;;  %v799_v37 = vsel %vm377_vm4, %v791_v33, %v657_v15 }
  0xb7   : > { %v681_v19 = vpop.permute.xlu1 %680  ;;  %v679_v20 = vpop.permute.xlu0 %678 }
  0xb8   : > { %v807_v30 = vsel %vm804_vm10, %v798_v28, %v679_v20  ;;  %v808_v39 = vsel %vm804_vm10, %v799_v37, %v681_v19 }
  0xbb   : > { %v705_v21 = vpop.permute.xlu1 %704  ;;  %v703_v22 = vpop.permute.xlu0 %702 }
  0xbc   : > { %v816_v32 = vsel %vm813_vm11, %v807_v30, %v703_v22  ;;  %v817_v36 = vsel %vm813_vm11, %v808_v39, %v705_v21 }
  0xbf   : > { %v729_v26 = vpop.permute.xlu1 %728  ;;  %v727_v27 = vpop.permute.xlu0 %726 }
  0xc0   : > { %v825_v17 = vsel %vm822_vm12, %v816_v32, %v727_v27  ;;  %v826_v40 = vsel %vm822_vm12, %v817_v36, %v729_v26 }
  0xc3   : > { %v587_v34 = vpop.permute.xlu1 %586  ;;  %v751_v35 = vpop.permute.xlu0 %750 }
  0xc4   : > { %v833_v38 = vsel %vm355_vm5, %v825_v17, %v751_v35  ;;  %v774_v55 = vsel %vm333_vm0, %v5902_v48, %v587_v34 }
  0xc5   : > { %4670 = vmatprep.mubr.msk.f32.mxu1 %vm851_vm13, %v833_v38 }
  0xc7   : > { %v589_v41 = vpop.permute.xlu1 %588  ;;  %v753_v42 = vpop.permute.xlu0 %752 }
  0xc8   : > { %v834_v43 = vsel %vm355_vm5, %v826_v40, %v753_v42  ;;  %v775_v61 = vsel %vm333_vm0, %v5916_v56, %v589_v41 }
  0xc9   : > { %4671 = vmatmul.mubr.msk.f32.gmra.mrb[2].mxu1 %vm851_vm13, %v834_v43  ;;  %v1348_v43 = vld [vmem:[%s7773_s3 + $0x100] sm:$0xff] }
  0xcb   : > { %v613_v44 = vpop.permute.xlu1 %612  ;;  %v611_v45 = vpop.permute.xlu0 %610 }
  0xcc   : > { %v783_v57 = vsel %vm778_vm8, %v774_v55, %v611_v45  ;;  %v784_v63 = vsel %vm778_vm8, %v775_v61, %v613_v44  ;;  %v1349_v44 = vld [vmem:[%s7773_s3 + $0x108] sm:$0xff]  ;;  %v1350_v45 = vld [vmem:[%s7773_s3 + $0x110] sm:$0xff]  ;;  %v1336_v61 = vld [vmem:[%s7773_s3 + $0xa0] sm:$0xff] }
  0xcf   : > { %v637_v46 = vpop.permute.xlu1 %636  ;;  %v635_v47 = vpop.permute.xlu0 %634 }
  0xd0   : > { %v792_v58 = vsel %vm787_vm9, %v783_v57, %v635_v47  ;;  %v793_v3 = vsel %vm787_vm9, %v784_v63, %v637_v46  ;;  %v4811_v46 = vpack.c.bf16 %v1349_v44, %v1348_v43  ;;  %v1351_v47 = vld [vmem:[%s7773_s3 + $0x118] sm:$0xff]  ;;  %v1334_v57 = vld [vmem:[%s7773_s3 + $0x90] sm:$0xff] }
  0xd1   : > { %v1346_v43 = vld [vmem:[%s7773_s3 + $0xf0] sm:$0xff] }
  0xd2   : > { %4812 = vmatprep.subr.bf16.mxu0 %v4811_v46 }
  0xd3   : > { %v661_v49 = vpop.permute.xlu1 %660  ;;  %v659_v50 = vpop.permute.xlu0 %658  ;;  %4814 = vmatpush3.bf16.msra.mxu0 %v4811_v46 }
  0xd4   : > { %v800_v60 = vsel %vm377_vm4, %v792_v58, %v659_v50  ;;  %v801_v6 = vsel %vm377_vm4, %v793_v3, %v661_v49  ;;  %v4815_v49 = vpack.c.bf16 %v1351_v47, %v1350_v45  ;;  %v1332_v50 = vld [vmem:[%s7773_s3 + $0x80] sm:$0xff]  ;;  %v1335_v58 = vld [vmem:[%s7773_s3 + $0x98] sm:$0xff] }
  0xd5   : > { %v1320_v3 = vld [vmem:[%s7773_s3 + $0x20] sm:$0xff] }
  0xd6   : > { %4816 = vmatprep.subr.bf16.mxu0 %v4815_v49 }
  0xd7   : > { %v685_v51 = vpop.permute.xlu1 %684  ;;  %v683_v52 = vpop.permute.xlu0 %682  ;;  %4818 = vmatpush3.bf16.msra.mxu0 %v4815_v49  ;;  %v1347_v49 = vld [vmem:[%s7773_s3 + $0xf8] sm:$0xff] }
  0xd8   : > { %v809_v62 = vsel %vm804_vm10, %v800_v60, %v683_v52  ;;  %v810_v8 = vsel %vm804_vm10, %v801_v6, %v685_v51  ;;  %v1333_v51 = vld [vmem:[%s7773_s3 + $0x88] sm:$0xff]  ;;  %v1316_v52 = vld [vmem:[%s7773_s3] sm:$0xff]  ;;  %v1319_v60 = vld [vmem:[%s7773_s3 + $0x18] sm:$0xff] }
  0xdb   : > { %v709_v53 = vpop.permute.xlu1 %708  ;;  %v707_v54 = vpop.permute.xlu0 %706 }
  0xdc   : > { %v818_v2 = vsel %vm813_vm11, %v809_v62, %v707_v54  ;;  %v819_v56 = vsel %vm813_vm11, %v810_v8, %v709_v53  ;;  %v4779_v53 = vpack.c.bf16 %v1333_v51, %v1332_v50  ;;  %v1317_v54 = vld [vmem:[%s7773_s3 + $0x8] sm:$0xff]  ;;  %v1322_v8 = vld [vmem:[%s7773_s3 + $0x30] sm:$0xff] }
  0xdd   : > { %v4781_v55 = vpack.c.bf16 %v1317_v54, %v1316_v52  ;;  %v1337_v62 = vld [vmem:[%s7773_s3 + $0xa8] sm:$0xff]  ;;  %v1330_v54 = vld [vmem:[%s7773_s3 + $0x70] sm:$0xff] }
  0xde   : > { %4780 = vmatprep.subr.bf16.mxu1 %v4779_v53  ;;  %v4807_v53 = vpack.c.bf16 %v1347_v49, %v1346_v43 }
  0xdf   : > { %v733_v59 = vpop.permute.xlu1 %732  ;;  %v731_v4 = vpop.permute.xlu0 %730  ;;  %4782 = vmatpush3.bf16.msra.mxu1 %v4781_v55  ;;  %v1331_v55 = vld [vmem:[%s7773_s3 + $0x78] sm:$0xff] }
  0xe0   : > { %v827_v48 = vsel %vm822_vm12, %v818_v2, %v731_v4  ;;  %v828_v9 = vsel %vm822_vm12, %v819_v56, %v733_v59  ;;  %v1318_v59 = vld [vmem:[%s7773_s3 + $0x10] sm:$0xff]  ;;  %v4783_v4 = vpack.c.bf16 %v1335_v58, %v1334_v57  ;;  %v4787_v2 = vpack.c.bf16 %v1337_v62, %v1336_v61  ;;  %v1323_v56 = vld [vmem:[%s7773_s3 + $0x38] sm:$0xff] }
  0xe1   : > { %v4785_v63 = vpack.c.bf16 %v1319_v60, %v1318_v59 }
  0xe2   : > { %4784 = vmatprep.subr.bf16.mxu1 %v4783_v4 }
  0xe3   : > { %v591_v18 = vpop.permute.xlu1 %590  ;;  %v755_v5 = vpop.permute.xlu0 %754  ;;  %4786 = vmatpush3.bf16.msra.mxu1 %v4785_v63 }
  0xe4   : > { %v835_v7 = vsel %vm355_vm5, %v827_v48, %v755_v5  ;;  %v776_v26 = vsel %vm333_vm0, %v5934_v1, %v591_v18  ;;  %v1321_v48 = vld [vmem:[%s7773_s3 + $0x28] sm:$0xff]  ;;  %v1338_v18 = vld [vmem:[%s7773_s3 + $0xb0] sm:$0xff]  ;;  %v1339_v5 = vld [vmem:[%s7773_s3 + $0xb8] sm:$0xff]  ;;  %4788 = vmatprep.subr.bf16.mxu1 %v4787_v2 }
  0xe5   : > { %4673 = vmatprep.mubr.msk.f32.mxu1 %vm851_vm13, %v835_v7  ;;  %v4789_v6 = vpack.c.bf16 %v1321_v48, %v1320_v3  ;;  %v4791_v7 = vpack.c.bf16 %v1339_v5, %v1338_v18  ;;  %v4809_v48 = vpack.c.bf16 %v1331_v55, %v1330_v54 }
  0xe7   : > { %v593_v11 = vpop.permute.xlu1 %592  ;;  %v757_v12 = vpop.permute.xlu0 %756  ;;  %4790 = vmatpush3.bf16.msra.mxu1 %v4789_v6 }
  0xe8   : > { %v836_v13 = vsel %vm355_vm5, %v828_v9, %v757_v12  ;;  %v777_v27 = vsel %vm333_vm0, %v5948_v10, %v593_v11  ;;  %v1340_v9 = vld [vmem:[%s7773_s3 + $0xc0] sm:$0xff]  ;;  %v1341_v11 = vld [vmem:[%s7773_s3 + $0xc8] sm:$0xff]  ;;  %v4793_v12 = vpack.c.bf16 %v1323_v56, %v1322_v8  ;;  %4792 = vmatprep.subr.bf16.mxu1 %v4791_v7  ;;  %vm379_vm0 = vcmask 123904  }
  0xe9   : > { %4674 = vmatmul.mubr.msk.f32.gmra.mrb[4].mxu1 %vm851_vm13, %v836_v13  ;;  %v4795_v13 = vpack.c.bf16 %v1341_v11, %v1340_v9  ;;  %382 = vst.msk [vmem:[#allocation4 + $0x18] sm:$0x3] %vm379_vm0, %v5611_v0  ;;  %384 = vst.msk [vmem:[#allocation4 + $0x28] sm:$0x3] %vm379_vm0, %v5611_v0 }
  0xea   : > { %386 = vst.msk [vmem:[#allocation4 + $0x38] sm:$0x3] %vm379_vm0, %v5611_v0  ;;  %388 = vst.msk [vmem:[#allocation4 + $0x48] sm:$0x3] %vm379_vm0, %v5611_v0 }
  0xeb   : > { %v617_v14 = vpop.permute.xlu1 %616  ;;  %v615_v15 = vpop.permute.xlu0 %614  ;;  %4794 = vmatpush3.bf16.msra.mxu1 %v4793_v12  ;;  %390 = vst.msk [vmem:[#allocation4 + $0x58] sm:$0x3] %vm379_vm0, %v5611_v0  ;;  %392 = vst.msk [vmem:[#allocation4 + $0x68] sm:$0x3] %vm379_vm0, %v5611_v0 }
  0xec   : > { %v786_v28 = vsel %vm778_vm8, %v777_v27, %v617_v14  ;;  %v785_v29 = vsel %vm778_vm8, %v776_v26, %v615_v15  ;;  %v1324_v14 = vld [vmem:[%s7773_s3 + $0x40] sm:$0xff]  ;;  %v1325_v15 = vld [vmem:[%s7773_s3 + $0x48] sm:$0xff]  ;;  %4796 = vmatprep.subr.bf16.mxu1 %v4795_v13  ;;  %394 = vst.msk [vmem:[#allocation4 + $0x78] sm:$0x3] %vm379_vm0, %v5611_v0  ;;  %396 = vst.msk [vmem:[#allocation4 + $0x88] sm:$0x3] %vm379_vm0, %v5611_v0 }
  0xed   : > { %398 = vst.msk [vmem:[#allocation4 + $0x98] sm:$0x3] %vm379_vm0, %v5611_v0  ;;  %402 = vst.msk [vmem:[#allocation4 + $0xb8] sm:$0x3] %vm379_vm0, %v5611_v0 }
  0xee   : > { %404 = vst.msk [vmem:[#allocation4 + $0xc8] sm:$0x3] %vm379_vm0, %v5611_v0  ;;  %406 = vst.msk [vmem:[#allocation4 + $0xd8] sm:$0x3] %vm379_vm0, %v5611_v0 }
  0xef   : > { %v641_v16 = vpop.permute.xlu1 %640  ;;  %v639_v19 = vpop.permute.xlu0 %638  ;;  %408 = vst.msk [vmem:[#allocation4 + $0xe8] sm:$0x3] %vm379_vm0, %v5611_v0  ;;  %410 = vst.msk [vmem:[#allocation4 + $0xf8] sm:$0x3] %vm379_vm0, %v5611_v0 }
  0xf0   : > { %v795_v30 = vsel %vm787_vm9, %v786_v28, %v641_v16  ;;  %v794_v31 = vsel %vm787_vm9, %v785_v29, %v639_v19  ;;  %v4797_v16 = vpack.c.bf16 %v1325_v15, %v1324_v14  ;;  %v6150_v19 = vld [vmem:[%s7772_s2] ss:$0 sm:$0xff]  ;;  %v1342_v28 = vld [vmem:[%s7773_s3 + $0xd0] sm:$0xff]  ;;  %v1343_v29 = vld [vmem:[%s7773_s3 + $0xd8] sm:$0xff]  ;;  %412 = vst.msk [vmem:[#allocation4 + $0x108] sm:$0x3] %vm379_vm0, %v5611_v0 }
  0xf1   : > { %414 = vst.msk [vmem:[#allocation4 + $0x118] sm:$0x3] %vm379_vm0, %v5611_v0  ;;  %416 = vst.msk [vmem:[#allocation4 + $0x128] sm:$0x3] %vm379_vm0, %v5611_v0 }
  0xf2   : > { %4798 = vmatpush3.bf16.msra.mxu1 %v4797_v16  ;;  %418 = vst.msk [vmem:[#allocation4 + $0x138] sm:$0x3] %vm379_vm0, %v5611_v0  ;;  %420 = vst.msk [vmem:[#allocation4 + $0x148] sm:$0x3] %vm379_vm0, %v5611_v0 }
  0xf3   : > { %v665_v20 = vpop.permute.xlu1 %664  ;;  %v663_v21 = vpop.permute.xlu0 %662  ;;  %422 = vst.msk [vmem:[#allocation4 + $0x158] sm:$0x3] %vm379_vm0, %v5611_v0  ;;  %424 = vst.msk [vmem:[#allocation4 + $0x168] sm:$0x3] %vm379_vm0, %v5611_v0 }
  0xf4   : > { %v803_v17 = vsel %vm377_vm4, %v795_v30, %v665_v20  ;;  %v802_v34 = vsel %vm377_vm4, %v794_v31, %v663_v21  ;;  %v994_v20 = vld [vmem:[#allocation3] sm:$0xff]  ;;  %v995_v21 = vld [vmem:[#allocation3 + $0x8] sm:$0x3]  ;;  %v1326_v30 = vld [vmem:[%s7773_s3 + $0x50] sm:$0xff]  ;;  %v4799_v31 = vpack.c.bf16 %v1343_v29, %v1342_v28  ;;  %426 = vst.msk [vmem:[#allocation4 + $0x178] sm:$0x3] %vm379_vm0, %v5611_v0 }
  0xf5   : > { %v6154_v26 = vmax.f32 %v994_v20, 0.0  ;;  %v1015_v27 = vmax.f32 %v995_v21, 0.0  ;;  %428 = vst.msk [vmem:[#allocation4 + $0x188] sm:$0x3] %vm379_vm0, %v5611_v0  ;;  %430 = vst.msk [vmem:[#allocation4 + $0x198] sm:$0x3] %vm379_vm0, %v5611_v0 }
  0xf6   : > { %4800 = vmatprep.subr.bf16.mxu1 %v4799_v31  ;;  %432 = vst.msk [vmem:[#allocation4 + $0x1a8] sm:$0x3] %vm379_vm0, %v5611_v0  ;;  %434 = vst.msk [vmem:[#allocation4 + $0x1b8] sm:$0x3] %vm379_vm0, %v5611_v0 }
  0xf7   : > { %v689_v22 = vpop.permute.xlu1 %688  ;;  %v687_v23 = vpop.permute.xlu0 %686  ;;  %v1051_v52 = vrot.slane %v1015_v27, 1  ;;  %436 = vst.msk [vmem:[#allocation4 + $0x1c8] sm:$0x3] %vm379_vm0, %v5611_v0  ;;  %440 = vst.msk [vmem:[#allocation4 + $0x1e8] sm:$0x3] %vm379_vm0, %v5611_v0 }
  0xf8   : > { %v812_v35 = vsel %vm804_vm10, %v803_v17, %v689_v22  ;;  %v811_v1 = vsel %vm804_vm10, %v802_v34, %v687_v23  ;;  %v1074_v17 = vrot.slane %v6154_v26, 2  ;;  %v1075_v34 = vrot.slane %v1015_v27, 2  ;;  %442 = vst.msk [vmem:[#allocation4 + $0x1f8] sm:$0x3] %vm379_vm0, %v5611_v0  ;;  %444 = vst.msk [vmem:[#allocation4 + $0x208] sm:$0x3] %vm379_vm0, %v5611_v0 }
  0xf9   : > { %446 = vst.msk [vmem:[#allocation4 + $0x218] sm:$0x3] %vm379_vm0, %v5611_v0  ;;  %448 = vst.msk [vmem:[#allocation4 + $0x228] sm:$0x3] %vm379_vm0, %v5611_v0 }
  0xfa   : > { %450 = vst.msk [vmem:[#allocation4 + $0x238] sm:$0x3] %vm379_vm0, %v5611_v0  ;;  %452 = vst.msk [vmem:[#allocation4 + $0x248] sm:$0x3] %vm379_vm0, %v5611_v0 }
  0xfb   : > { %v713_v24 = vpop.permute.xlu1 %712  ;;  %v711_v25 = vpop.permute.xlu0 %710  ;;  %454 = vst.msk [vmem:[#allocation4 + $0x258] sm:$0x3] %vm379_vm0, %v5611_v0  ;;  %456 = vst.msk [vmem:[#allocation4 + $0x268] sm:$0x3] %vm379_vm0, %v5611_v0 }
  0xfc   : > { %v821_v10 = vsel %vm813_vm11, %v812_v35, %v713_v24  ;;  %v820_v37 = vsel %vm813_vm11, %v811_v1, %v711_v25  ;;  %v1344_v35 = vld [vmem:[%s7773_s3 + $0xe0] sm:$0xff]  ;;  %v1345_v1 = vld [vmem:[%s7773_s3 + $0xe8] sm:$0xff] }
  0xff   : > { %v737_v32 = vpop.permute.xlu1 %736  ;;  %v735_v33 = vpop.permute.xlu0 %734 }
 0x100   : > { %v830_v38 = vsel %vm822_vm12, %v821_v10, %v737_v32  ;;  %v829_v39 = vsel %vm822_vm12, %v820_v37, %v735_v33  ;;  %v1327_v32 = vld [vmem:[%s7773_s3 + $0x58] sm:$0xff]  ;;  %v1328_v10 = vld [vmem:[%s7773_s3 + $0x60] sm:$0xff]  ;;  %v4803_v37 = vpack.c.bf16 %v1345_v1, %v1344_v35 }
 0x101   : > { %v4801_v33 = vpack.c.bf16 %v1327_v32, %v1326_v30 }
 0x103   : > { %v761_v36 = vpop.permute.xlu1 %760  ;;  %v759_v40 = vpop.permute.xlu0 %758  ;;  %4802 = vmatpush3.bf16.msra.mxu1 %v4801_v33 }
 0x104   : > { %v838_v41 = vsel %vm355_vm5, %v830_v38, %v761_v36  ;;  %v837_v42 = vsel %vm355_vm5, %v829_v39, %v759_v40  ;;  %v1329_v38 = vld [vmem:[%s7773_s3 + $0x68] sm:$0xff]  ;;  %4804 = vmatprep.subr.bf16.mxu1 %v4803_v37  ;;  %v1076_v40 = vsel %vm537_vm2, %v1074_v17, %v1075_v34 }
 0x105   : > { %4676 = vmatprep.mubr.msk.f32.mxu1 %vm851_vm13, %v837_v42  ;;  %v4805_v39 = vpack.c.bf16 %v1329_v38, %v1328_v10  ;;  %v1050_v42 = vrot.slane %v6154_v26, 1 }
 0x106   : > { %4677 = vmatmul.mubr.msk.f32.gmra.mrb[6].mxu1 %vm851_vm13, %v838_v41 }
 0x107   : > { %4806 = vmatpush3.bf16.msra.mxu1 %v4805_v39  ;;  %v1052_v8 = vsel %vm512_vm3, %v1050_v42, %v1051_v52 }
 0x108   : > { %4808 = vmatprep.subr.bf16.mxu1 %v4807_v53 }
 0x10b   : > { %4810 = vmatpush3.bf16.msra.mxu1 %v4809_v48 }
 0x184   : > { %v4669_v22 = vpop.f32.mrb[0].mxu1 }
 0x185   : > { %v952_v23 = vadd.f32 %v4669_v22, %v6150_v19  ;;  %v946_v24 = vpop.f32.mrb[1].mxu1 }
 0x186   : > { %v947_v25 = vadd.f32 %v6150_v19, %v946_v24 }
 0x187   : > { %987 = vst.msk [vmem:[#allocation3 + $0x21] sm:$0xff] %vm355_vm5, %v952_v23 }
 0x188   : > { %986 = vst.msk [vmem:[#allocation3 + $0x11] sm:$0xff] %vm355_vm5, %v947_v25 }
 0x18e   : > { %v6183_v36 = vld [vmem:[#allocation3 + $0x20] sm:$0xff]  ;;  %v6188_v41 = vld [vmem:[#allocation3 + $0x28] sm:$0x3] }
 0x18f   : > { %v6195_v44 = vmax.f32 %v6183_v36, 0.0  ;;  %v1019_v45 = vmax.f32 %v6188_v41, 0.0  ;;  %v6198_v46 = vld [vmem:[#allocation3 + $0x10] sm:$0xff]  ;;  %v6200_v47 = vld [vmem:[#allocation3 + $0x18] sm:$0x3] }
 0x190   : > { %v6206_v50 = vmax.f32 %v6198_v46, 0.0  ;;  %v1017_v51 = vmax.f32 %v6200_v47, 0.0 }
 0x191   : > { %v4961_v57 = vpack.i.bf16 %v1076_v40, %v6195_v44  ;;  %v1057_v58 = vrot.slane %v1019_v45, 1  ;;  %v1080_v59 = vrot.slane %v6195_v44, 2  ;;  %v1081_v4 = vrot.slane %v1019_v45, 2 }
 0x192   : > { %v1056_v60 = vrot.slane %v6195_v44, 1  ;;  %v1053_v61 = vrot.slane %v6206_v50, 1  ;;  %v1054_v62 = vrot.slane %v1017_v51, 1  ;;  %v1077_v63 = vrot.slane %v6206_v50, 2 }
 0x193   : > { %4962 = vrot.lane.b32.xlu1 %v4961_v57, %s5620_s26  ;;  %v1082_v2 = vsel %vm537_vm2, %v1080_v59, %v1081_v4  ;;  %v1078_v3 = vrot.slane %v1017_v51, 2 }
 0x194   : > { %4687 = vmatprep.mubr.msk.f32.mxu0 %vm355_vm5, %v1082_v2  ;;  %v6224_v18 = vsel %vm512_vm3, %v1056_v60, %v1057_v58  ;;  %v6227_v5 = vsel %vm512_vm3, %v1053_v61, %v1054_v62 }
 0x195   : > { %v4966_v6 = vpack.i.bf16 %v6206_v50, %v6224_v18  ;;  %v4976_v7 = vpack.i.bf16 %v6227_v5, %v1082_v2  ;;  %v1079_v56 = vsel %vm537_vm2, %v1077_v63, %v1078_v3 }
 0x196   : > { %v4971_v9 = vpack.i.bf16 %v1052_v8, %v1079_v56 }
 0x197   : > { %4967 = vrot.lane.b32.xlu0 %v4966_v6, %s5621_s27  ;;  %4977 = vrot.lane.b32.xlu1 %v4976_v7, %s5619_s14 }
 0x19b   : > { %4972 = vrot.lane.b32.xlu0 %v4971_v9, %s5619_s14 }
 0x19c   : > { %v4672_v11 = vpop.f32.mrb[2].mxu1 }
 0x19d   : > { %v962_v12 = vadd.f32 %v4672_v11, %v6150_v19  ;;  %v956_v13 = vpop.f32.mrb[3].mxu1 }
 0x19e   : > { %v957_v14 = vadd.f32 %v6150_v19, %v956_v13 }
 0x19f   : > { %989 = vst.msk [vmem:[#allocation3 + $0x41] sm:$0xff] %vm355_vm5, %v962_v12 }
 0x1a0   : > { %988 = vst.msk [vmem:[#allocation3 + $0x31] sm:$0xff] %vm355_vm5, %v957_v14 }
 0x1a6   : > { %v6243_v15 = vld [vmem:[#allocation3 + $0x40] sm:$0xff]  ;;  %v6245_v16 = vld [vmem:[#allocation3 + $0x48] sm:$0x3] }
 0x1a7   : > { %v6248_v20 = vmax.f32 %v6243_v15, 0.0  ;;  %v6250_v21 = vld [vmem:[#allocation3 + $0x30] sm:$0xff]  ;;  %v6252_v22 = vld [vmem:[#allocation3 + $0x38] sm:$0x3]  ;;  %v1023_v23 = vmax.f32 %v6245_v16, 0.0 }
 0x1a8   : > { %v6256_v24 = vmax.f32 %v6250_v21, 0.0  ;;  %v1021_v25 = vmax.f32 %v6252_v22, 0.0 }
 0x1a9   : > { %v4981_v27 = vpack.i.bf16 %v1082_v2, %v6248_v20  ;;  %v1086_v28 = vrot.slane %v6248_v20, 2  ;;  %v1087_v29 = vrot.slane %v1023_v23, 2  ;;  %v1062_v30 = vrot.slane %v6248_v20, 1 }
 0x1aa   : > { %v4986_v31 = vpack.i.bf16 %v1079_v56, %v6256_v24  ;;  %v1083_v32 = vrot.slane %v6256_v24, 2  ;;  %v1084_v33 = vrot.slane %v1021_v25, 2  ;;  %v1059_v34 = vrot.slane %v6256_v24, 1 }
 0x1ab   : > { %4982 = vrot.lane.b32.xlu1 %v4981_v27, %s5620_s26  ;;  %v1060_v35 = vrot.slane %v1021_v25, 1  ;;  %v1063_v1 = vrot.slane %v1023_v23, 1  ;;  %v1088_v37 = vsel %vm537_vm2, %v1086_v28, %v1087_v29 }
 0x1ac   : > { %4987 = vrot.lane.b32.xlu0 %v4986_v31, %s5620_s26  ;;  %v1085_v10 = vsel %vm537_vm2, %v1083_v32, %v1084_v33 }
 0x1ad   : > { %4688 = vmatmul.mubr.msk.f32.vlgmr.msra.gmra.mrb[0].mxu0 %vm355_vm5, %v1085_v10  ;;  %v6271_v38 = vsel %vm512_vm3, %v1059_v34, %v1060_v35  ;;  %v6274_v39 = vsel %vm512_vm3, %v1062_v30, %v1063_v1  ;;  %v5001_v49 = vpack.i.bf16 %v6224_v18, %v1085_v10  ;;  %v1012_v34 = vld [vmem:[#allocation3 + $0x90] sm:$0xff] }
 0x1ae   : > { %4690 = vmatprep.mubr.msk.f32.mxu0 %vm355_vm5, %v1088_v37  ;;  %v4996_v40 = vpack.i.bf16 %v6195_v44, %v6271_v38  ;;  %v4991_v43 = vpack.i.bf16 %v6256_v24, %v6274_v39  ;;  %v5006_v45 = vpack.i.bf16 %v6271_v38, %v1088_v37 }
 0x1b0   : > { %4997 = vrot.lane.b32.xlu1 %v4996_v40, %s5621_s27  ;;  %4992 = vrot.lane.b32.xlu0 %v4991_v43, %s5621_s27 }
 0x1b4   : > { %5007 = vrot.lane.b32.xlu1 %v5006_v45, %s5619_s14  ;;  %5002 = vrot.lane.b32.xlu0 %v5001_v49, %s5619_s14 }
 0x1bc   : > { %v4675_v51 = vpop.f32.mrb[4].mxu1 }
 0x1bd   : > { %v972_v52 = vadd.f32 %v4675_v51, %v6150_v19  ;;  %v966_v53 = vpop.f32.mrb[5].mxu1  ;;  %v6353_v51 = vmax.f32 %v1012_v34, 0.0 }
 0x1be   : > { %v967_v54 = vadd.f32 %v6150_v19, %v966_v53 }
 0x1bf   : > { %991 = vst.msk [vmem:[#allocation3 + $0x61] sm:$0xff] %vm355_vm5, %v972_v52 }
 0x1c0   : > { %990 = vst.msk [vmem:[#allocation3 + $0x51] sm:$0xff] %vm355_vm5, %v967_v54 }
 0x1c6   : > { %v6291_v55 = vld [vmem:[#allocation3 + $0x60] sm:$0xff]  ;;  %v6293_v57 = vld [vmem:[#allocation3 + $0x68] sm:$0x3] }
 0x1c7   : > { %v6296_v58 = vmax.f32 %v6291_v55, 0.0  ;;  %v6298_v59 = vld [vmem:[#allocation3 + $0x50] sm:$0xff]  ;;  %v6300_v4 = vld [vmem:[#allocation3 + $0x58] sm:$0x3]  ;;  %v1027_v60 = vmax.f32 %v6293_v57, 0.0 }
 0x1c8   : > { %v6304_v61 = vmax.f32 %v6298_v59, 0.0  ;;  %v1025_v62 = vmax.f32 %v6300_v4, 0.0 }
 0x1c9   : > { %v5011_v63 = vpack.i.bf16 %v1088_v37, %v6296_v58  ;;  %v1092_v2 = vrot.slane %v6296_v58, 2  ;;  %v1093_v3 = vrot.slane %v1027_v60, 2  ;;  %v1068_v48 = vrot.slane %v6296_v58, 1 }
 0x1ca   : > { %v5016_v6 = vpack.i.bf16 %v1085_v10, %v6304_v61  ;;  %v1089_v7 = vrot.slane %v6304_v61, 2  ;;  %v1090_v8 = vrot.slane %v1025_v62, 2  ;;  %v1065_v56 = vrot.slane %v6304_v61, 1  ;;  %v1013_v10 = vld [vmem:[#allocation3 + $0x98] sm:$0x3] }
 0x1cb   : > { %5012 = vrot.lane.b32.xlu1 %v5011_v63, %s5620_s26  ;;  %v1066_v9 = vrot.slane %v1025_v62, 1  ;;  %v1069_v11 = vrot.slane %v1027_v60, 1  ;;  %v1094_v13 = vsel %vm537_vm2, %v1092_v2, %v1093_v3  ;;  %v1033_v60 = vmax.f32 %v1013_v10, 0.0 }
 0x1cc   : > { %5017 = vrot.lane.b32.xlu0 %v5016_v6, %s5620_s26  ;;  %v1091_v12 = vsel %vm537_vm2, %v1089_v7, %v1090_v8 }
 0x1cd   : > { %4691 = vmatmul.mubr.msk.f32.gmra.mrb[2].mxu0 %vm355_vm5, %v1091_v12  ;;  %v6319_v14 = vsel %vm512_vm3, %v1065_v56, %v1066_v9  ;;  %v6322_v23 = vsel %vm512_vm3, %v1068_v48, %v1069_v11  ;;  %v5031_v29 = vpack.i.bf16 %v6274_v39, %v1091_v12  ;;  %v1119_v56 = vrot.slane %v6353_v51, 2 }
 0x1ce   : > { %4693 = vmatprep.mubr.msk.f32.mxu0 %vm355_vm5, %v1094_v13  ;;  %v5026_v25 = vpack.i.bf16 %v6248_v20, %v6319_v14  ;;  %v5021_v27 = vpack.i.bf16 %v6304_v61, %v6322_v23  ;;  %v5036_v28 = vpack.i.bf16 %v6319_v14, %v1094_v13  ;;  %v1120_v9 = vrot.slane %v1033_v60, 2 }
 0x1d0   : > { %5027 = vrot.lane.b32.xlu1 %v5026_v25, %s5621_s27  ;;  %5022 = vrot.lane.b32.xlu0 %v5021_v27, %s5621_s27  ;;  %v1121_v27 = vsel %vm537_vm2, %v1119_v56, %v1120_v9 }
 0x1d4   : > { %5037 = vrot.lane.b32.xlu1 %v5036_v28, %s5619_s14  ;;  %5032 = vrot.lane.b32.xlu0 %v5031_v29, %s5619_s14  ;;  %v1116_v29 = vrot.slane %v6353_v51, 1 }
 0x1d9   : > { %v4678_v30 = vpop.f32.mrb[6].mxu1 }
 0x1da   : > { %v982_v31 = vadd.f32 %v4678_v30, %v6150_v19  ;;  %v976_v32 = vpop.f32.mrb[7].mxu1  ;;  %v1117_v30 = vrot.slane %v1033_v60, 1 }
 0x1db   : > { %v977_v33 = vadd.f32 %v6150_v19, %v976_v32 }
 0x1dc   : > { %993 = vst.msk [vmem:[#allocation3 + $0x81] sm:$0xff] %vm355_vm5, %v982_v31 }
 0x1dd   : > { %992 = vst.msk [vmem:[#allocation3 + $0x71] sm:$0xff] %vm355_vm5, %v977_v33  ;;  %v1118_v33 = vsel %vm512_vm3, %v1116_v29, %v1117_v30 }
 0x1e3   : > { %v6339_v35 = vld [vmem:[#allocation3 + $0x80] sm:$0xff]  ;;  %v6341_v1 = vld [vmem:[#allocation3 + $0x88] sm:$0x3] }
 0x1e4   : > { %v1030_v37 = vmax.f32 %v6339_v35, 0.0  ;;  %v6344_v40 = vld [vmem:[#allocation3 + $0x70] sm:$0xff]  ;;  %v6346_v43 = vld [vmem:[#allocation3 + $0x78] sm:$0x3]  ;;  %v1031_v45 = vmax.f32 %v6341_v1, 0.0 }
 0x1e5   : > { %v6350_v19 = vmax.f32 %v6344_v40, 0.0  ;;  %v1029_v49 = vmax.f32 %v6346_v43, 0.0 }
 0x1e6   : > { %v5041_v52 = vpack.i.bf16 %v1094_v13, %v1030_v37  ;;  %v1111_v53 = vrot.slane %v1030_v37, 2  ;;  %v1112_v54 = vrot.slane %v1031_v45, 2  ;;  %v1100_v6 = vrot.slane %v1030_v37, 1 }
 0x1e7   : > { %v5046_v62 = vpack.i.bf16 %v1091_v12, %v6350_v19  ;;  %v1095_v63 = vrot.slane %v6350_v19, 2  ;;  %v1096_v2 = vrot.slane %v1029_v49, 2  ;;  %v1071_v3 = vrot.slane %v6350_v19, 1 }
 0x1e8   : > { %5042 = vrot.lane.b32.xlu1 %v5041_v52, %s5620_s26  ;;  %v1072_v48 = vrot.slane %v1029_v49, 1  ;;  %v1101_v7 = vrot.slane %v1031_v45, 1  ;;  %v1113_v11 = vsel %vm537_vm2, %v1111_v53, %v1112_v54  ;;  %v5076_v34 = vpack.i.bf16 %v1030_v37, %v1118_v33 }
 0x1e9   : > { %5047 = vrot.lane.b32.xlu0 %v5046_v62, %s5620_s26  ;;  %v1097_v8 = vsel %vm537_vm2, %v1095_v63, %v1096_v2 }
 0x1ea   : > { %4694 = vmatmul.mubr.msk.f32.gmra.mrb[4].mxu0 %vm355_vm5, %v1097_v8  ;;  %v6365_v12 = vsel %vm512_vm3, %v1071_v3, %v1072_v48  ;;  %v5056_v13 = vpack.i.bf16 %v6322_v23, %v1097_v8  ;;  %v6375_v28 = vsel %vm512_vm3, %v1100_v6, %v1101_v7  ;;  %v5071_v10 = vpack.i.bf16 %v1097_v8, %v6353_v51 }
 0x1eb   : > { %4696 = vmatprep.mubr.msk.f32.mxu0 %vm355_vm5, %v1113_v11  ;;  %v5051_v25 = vpack.i.bf16 %v6296_v58, %v6365_v12  ;;  %v5066_v31 = vpack.i.bf16 %v6365_v12, %v1113_v11  ;;  %v5061_v32 = vpack.i.bf16 %v6350_v19, %v6375_v28 }
 0x1ed   : > { %5052 = vrot.lane.b32.xlu1 %v5051_v25, %s5621_s27  ;;  %5057 = vrot.lane.b32.xlu0 %v5056_v13, %s5619_s14 }
 0x1ee   : > { %4697 = vmatmul.mubr.msk.f32.gmra.mrb[6].mxu0 %vm355_vm5, %v1121_v27 }
 0x1f1   : > { %5067 = vrot.lane.b32.xlu1 %v5066_v31, %s5619_s14  ;;  %5062 = vrot.lane.b32.xlu0 %v5061_v32, %s5621_s27 }
 0x1f5   : > { %5077 = vrot.lane.b32.xlu1 %v5076_v34, %s5621_s27  ;;  %5072 = vrot.lane.b32.xlu0 %v5071_v10, %s5620_s26 }
 0x205   : > { %v4963_v49 = vpop.permute.xlu1 %4962 }
 0x206   : > { %v4965_v60 = vunpack.i.h.bf16 %v4963_v49  ;;  %v4964_v62 = vunpack.i.l.bf16 %v4963_v49 }
 0x209   : > { %v4968_v45 = vpop.permute.xlu0 %4967  ;;  %v4978_v9 = vpop.permute.xlu1 %4977 }
 0x20a   : > { %v4970_v63 = vunpack.i.h.bf16 %v4968_v45  ;;  %v4969_v2 = vunpack.i.l.bf16 %v4968_v45  ;;  %v4980_v25 = vunpack.i.h.bf16 %v4978_v9  ;;  %v4979_v27 = vunpack.i.l.bf16 %v4978_v9 }
 0x20c   : > { %v1293_v10 = vsel %vm355_vm5, %v6224_v18, %v4979_v27  ;;  %v1267_v45 = vsel %vm355_vm5, %v6206_v50, %v4980_v25 }
 0x20d   : > { %v4973_v52 = vpop.permute.xlu0 %4972 }
 0x20e   : > { %v4975_v53 = vunpack.i.h.bf16 %v4973_v52  ;;  %v4974_v54 = vunpack.i.l.bf16 %v4973_v52 }
 0x210   : > { %v1266_v37 = vsel %vm355_vm5, %v6154_v26, %v4975_v53  ;;  %v1292_v3 = vsel %vm355_vm5, %v6227_v5, %v4974_v54 }
 0x211   : > { %v1300_v48 = vsel %vm1274_vm14, %v1292_v3, %v4964_v62  ;;  %v1275_v6 = vsel %vm1274_vm14, %v1266_v37, %v4965_v60 }
 0x212   : > { %v1308_v7 = vsel %vm1283_vm15, %v1300_v48, %v4969_v2  ;;  %v1284_v8 = vsel %vm1283_vm15, %v1275_v6, %v4970_v63 }
 0x213   : > { %1432 = vmatprep.mubr.f32.mxu1 %v1308_v7 }
 0x214   : > { %1433 = vmatmul.mubr.f32.vlgmr.msra.gmra.mrb[8].mxu1 %v1284_v8 }
 0x21d   : > { %v4983_v11 = vpop.permute.xlu1 %4982 }
 0x21e   : > { %v4988_v13 = vpop.permute.xlu0 %4987  ;;  %v4985_v2 = vunpack.i.h.bf16 %v4983_v11  ;;  %v4984_v37 = vunpack.i.l.bf16 %v4983_v11 }
 0x21f   : > { %v4990_v30 = vunpack.i.h.bf16 %v4988_v13  ;;  %v4989_v31 = vunpack.i.l.bf16 %v4988_v13 }
 0x221   : > { %v1301_v49 = vsel %vm1274_vm14, %v1293_v10, %v4989_v31  ;;  %v1276_v52 = vsel %vm1274_vm14, %v1267_v45, %v4990_v30 }
 0x222   : > { %v4998_v32 = vpop.permute.xlu1 %4997  ;;  %v4993_v33 = vpop.permute.xlu0 %4992 }
 0x223   : > { %v5000_v5 = vunpack.i.h.bf16 %v4998_v32  ;;  %v4999_v34 = vunpack.i.l.bf16 %v4998_v32  ;;  %v4995_v3 = vunpack.i.h.bf16 %v4993_v33  ;;  %v4994_v18 = vunpack.i.l.bf16 %v4993_v33 }
 0x225   : > { %v1309_v53 = vsel %vm1283_vm15, %v1301_v49, %v4999_v34  ;;  %v1285_v54 = vsel %vm1283_vm15, %v1276_v52, %v5000_v5 }
 0x226   : > { %1437 = vmatprep.mubr.f32.mxu1 %v1309_v53  ;;  %v5003_v60 = vpop.permute.xlu0 %5002  ;;  %v5008_v13 = vpop.permute.xlu1 %5007 }
 0x227   : > { %v5005_v62 = vunpack.i.h.bf16 %v5003_v60  ;;  %v5004_v63 = vunpack.i.l.bf16 %v5003_v60  ;;  %1438 = vmatmul.mubr.f32.gmra.mrb[10].mxu1 %v1285_v54  ;;  %v5010_v27 = vunpack.i.h.bf16 %v5008_v13  ;;  %v5009_v30 = vunpack.i.l.bf16 %v5008_v13 }
 0x229   : > { %v1294_v50 = vsel %vm355_vm5, %v6271_v38, %v5004_v63  ;;  %v1268_v48 = vsel %vm355_vm5, %v6195_v44, %v5005_v62  ;;  %v1295_v34 = vsel %vm355_vm5, %v6274_v39, %v5009_v30  ;;  %v1269_v10 = vsel %vm355_vm5, %v6256_v24, %v5010_v27 }
 0x22a   : > { %v1302_v6 = vsel %vm1274_vm14, %v1294_v50, %v4984_v37  ;;  %v1277_v7 = vsel %vm1274_vm14, %v1268_v48, %v4985_v2 }
 0x22b   : > { %v1310_v8 = vsel %vm1283_vm15, %v1302_v6, %v4994_v18  ;;  %v1286_v9 = vsel %vm1283_vm15, %v1277_v7, %v4995_v3 }
 0x22c   : > { %1442 = vmatprep.mubr.f32.mxu1 %v1310_v8 }
 0x22d   : > { %1443 = vmatmul.mubr.f32.gmra.mrb[12].mxu1 %v1286_v9 }
 0x23d   : > { %v5013_v11 = vpop.permute.xlu1 %5012 }
 0x23e   : > { %v5018_v25 = vpop.permute.xlu0 %5017  ;;  %v5015_v63 = vunpack.i.h.bf16 %v5013_v11  ;;  %v5014_v2 = vunpack.i.l.bf16 %v5013_v11 }
 0x23f   : > { %v5020_v31 = vunpack.i.h.bf16 %v5018_v25  ;;  %v5019_v38 = vunpack.i.l.bf16 %v5018_v25 }
 0x241   : > { %v1303_v45 = vsel %vm1274_vm14, %v1295_v34, %v5019_v38  ;;  %v1278_v49 = vsel %vm1274_vm14, %v1269_v10, %v5020_v31 }
 0x242   : > { %v5028_v32 = vpop.permute.xlu1 %5027  ;;  %v5023_v33 = vpop.permute.xlu0 %5022 }
 0x243   : > { %v5030_v44 = vunpack.i.h.bf16 %v5028_v32  ;;  %v5029_v5 = vunpack.i.l.bf16 %v5028_v32  ;;  %v5025_v37 = vunpack.i.h.bf16 %v5023_v33  ;;  %v5024_v39 = vunpack.i.l.bf16 %v5023_v33 }
 0x245   : > { %v1311_v52 = vsel %vm1283_vm15, %v1303_v45, %v5029_v5  ;;  %v1287_v53 = vsel %vm1283_vm15, %v1278_v49, %v5030_v44 }
 0x246   : > { %1447 = vmatprep.mubr.f32.mxu1 %v1311_v52  ;;  %v5033_v54 = vpop.permute.xlu0 %5032  ;;  %v5038_v7 = vpop.permute.xlu1 %5037 }
 0x247   : > { %v5035_v60 = vunpack.i.h.bf16 %v5033_v54  ;;  %v5034_v62 = vunpack.i.l.bf16 %v5033_v54  ;;  %1448 = vmatmul.mubr.f32.gmra.mrb[14].mxu1 %v1287_v53  ;;  %v5040_v9 = vunpack.i.h.bf16 %v5038_v7  ;;  %v5039_v13 = vunpack.i.l.bf16 %v5038_v7 }
 0x249   : > { %v1296_v24 = vsel %vm355_vm5, %v6319_v14, %v5034_v62  ;;  %v1270_v3 = vsel %vm355_vm5, %v6248_v20, %v5035_v60  ;;  %v1297_v20 = vsel %vm355_vm5, %v6322_v23, %v5039_v13  ;;  %v1271_v31 = vsel %vm355_vm5, %v6304_v61, %v5040_v9 }
 0x24a   : > { %v1304_v18 = vsel %vm1274_vm14, %v1296_v24, %v5014_v2  ;;  %v1279_v50 = vsel %vm1274_vm14, %v1270_v3, %v5015_v63 }
 0x24b   : > { %v1312_v48 = vsel %vm1283_vm15, %v1304_v18, %v5024_v39  ;;  %v1288_v6 = vsel %vm1283_vm15, %v1279_v50, %v5025_v37 }
 0x24c   : > { %1452 = vmatprep.mubr.f32.mxu1 %v1312_v48 }
 0x24d   : > { %1453 = vmatmul.mubr.f32.gmra.mrb[16].mxu1 %v1288_v6 }
 0x25a   : > { %v5043_v8 = vpop.permute.xlu1 %5042 }
 0x25b   : > { %v5048_v11 = vpop.permute.xlu0 %5047  ;;  %v5045_v52 = vunpack.i.h.bf16 %v5043_v8  ;;  %v5044_v61 = vunpack.i.l.bf16 %v5043_v8 }
 0x25c   : > { %v5050_v25 = vunpack.i.h.bf16 %v5048_v11  ;;  %v5049_v14 = vunpack.i.l.bf16 %v5048_v11 }
 0x25e   : > { %v1305_v5 = vsel %vm1274_vm14, %v1297_v20, %v5049_v14  ;;  %v1280_v34 = vsel %vm1274_vm14, %v1271_v31, %v5050_v25  ;;  %v1586_v14 = vld [vmem:[%s7774_s4] sm:$0xff] }
 0x25f   : > { %v5053_v27 = vpop.permute.xlu1 %5052  ;;  %v5058_v30 = vpop.permute.xlu0 %5057 }
 0x260   : > { %v5055_v38 = vunpack.i.h.bf16 %v5053_v27  ;;  %v5054_v32 = vunpack.i.l.bf16 %v5053_v27  ;;  %v5060_v33 = vunpack.i.h.bf16 %v5058_v30  ;;  %v5059_v44 = vunpack.i.l.bf16 %v5058_v30 }
 0x262   : > { %v1313_v10 = vsel %vm1283_vm15, %v1305_v5, %v5054_v32  ;;  %v1289_v45 = vsel %vm1283_vm15, %v1280_v34, %v5055_v38  ;;  %v1298_v49 = vsel %vm355_vm5, %v6365_v12, %v5059_v44  ;;  %v1272_v23 = vsel %vm355_vm5, %v6296_v58, %v5060_v33 }
 0x263   : > { %v5068_v53 = vpop.permute.xlu1 %5067  ;;  %1457 = vmatprep.mubr.f32.mxu1 %v1313_v10  ;;  %v5063_v54 = vpop.permute.xlu0 %5062  ;;  %v1306_v37 = vsel %vm1274_vm14, %v1298_v49, %v5044_v61  ;;  %v1281_v39 = vsel %vm1274_vm14, %v1272_v23, %v5045_v52 }
 0x264   : > { %v5065_v60 = vunpack.i.h.bf16 %v5063_v54  ;;  %v5064_v62 = vunpack.i.l.bf16 %v5063_v54  ;;  %1458 = vmatmul.mubr.f32.gmra.mrb[18].mxu1 %v1289_v45  ;;  %v5070_v63 = vunpack.i.h.bf16 %v5068_v53  ;;  %v5069_v2 = vunpack.i.l.bf16 %v5068_v53 }
 0x266   : > { %v1314_v24 = vsel %vm1283_vm15, %v1306_v37, %v5064_v62  ;;  %v1290_v12 = vsel %vm1283_vm15, %v1281_v39, %v5065_v60  ;;  %v1299_v7 = vsel %vm355_vm5, %v6375_v28, %v5069_v2  ;;  %v1273_v8 = vsel %vm355_vm5, %v6350_v19, %v5070_v63  ;;  %v1587_v28 = vld [vmem:[%s7774_s4 + $0x8] sm:$0xff] }
 0x267   : > { %v5078_v3 = vpop.permute.xlu1 %5077  ;;  %v5073_v58 = vpop.permute.xlu0 %5072  ;;  %1462 = vmatprep.mubr.f32.mxu1 %v1314_v24  ;;  %v4819_v27 = vpack.c.bf16 %v1587_v28, %v1586_v14 }
 0x268   : > { %v5075_v18 = vunpack.i.h.bf16 %v5073_v58  ;;  %v5074_v50 = vunpack.i.l.bf16 %v5073_v58  ;;  %1463 = vmatmul.mubr.f32.gmra.mrb[20].mxu1 %v1290_v12  ;;  %v5080_v48 = vunpack.i.h.bf16 %v5078_v3  ;;  %v5079_v6 = vunpack.i.l.bf16 %v5078_v3 }
 0x269   : > { %4820 = vmatprep.subr.bf16.mxu0 %v4819_v27 }
 0x26a   : > { %v1307_v9 = vsel %vm1274_vm14, %v1299_v7, %v5074_v50  ;;  %v1282_v13 = vsel %vm1274_vm14, %v1273_v8, %v5075_v18  ;;  %4822 = vmatpush3.bf16.msra.mxu0 %v4819_v27 }
 0x26b   : > { %v1315_v11 = vsel %vm1283_vm15, %v1307_v9, %v5079_v6  ;;  %v1291_v25 = vsel %vm1283_vm15, %v1282_v13, %v5080_v48 }
 0x26c   : > { %1467 = vmatprep.mubr.f32.mxu1 %v1315_v11 }
 0x26d   : > { %1468 = vmatmul.mubr.f32.gmra.mrb[22].mxu1 %v1291_v25 }
 0x280   : > { %v4689_v19 = vpop.f32.mrb[0].mxu0 }
 0x281   : > { %v1539_v30 = vpop.f32.mrb[1].mxu0 }
 0x2a0   : > { %v4692_v20 = vpop.f32.mrb[2].mxu0 }
 0x2a1   : > { %v1549_v31 = vpop.f32.mrb[3].mxu0 }
 0x2bd   : > { %v4695_v38 = vpop.f32.mrb[4].mxu0 }
 0x2be   : > { %v1559_v32 = vpop.f32.mrb[5].mxu0 }
 0x2c1   : > { %v4698_v33 = vpop.f32.mrb[6].mxu0 }
 0x2c2   : > { %v1569_v44 = vpop.f32.mrb[7].mxu0 }
 0x2e7   : > { %v4409_v5 = vpop.f32.mrb[8].mxu1 }
 0x2e8   : > { %v4410_v34 = vpop.f32.mrb[9].mxu1 }
 0x2e9   : > { %v4411_v10 = vadd.f32 %v4410_v34, %v4409_v5 }
 0x2eb   : > { %v1540_v45 = vadd.f32 %v4411_v10, %v1539_v30  ;;  %v4330_v10 = vld [vmem:[%s7773_s3 + $0x230] sm:$0xff] }
 0x2ed   : > { %v1578_v49 = vmax.f32 %v1540_v45, 0.0 }
 0x2ef   : > { %4703 = vmatprep.mubr.msk.f32.mxu0 %vm377_vm4, %v1578_v49 }
 0x2fa   : > { %v4412_v23 = vpop.f32.mrb[10].mxu1 }
 0x2fb   : > { %v4413_v52 = vpop.f32.mrb[11].mxu1 }
 0x2fc   : > { %v4414_v61 = vadd.f32 %v4413_v52, %v4412_v23  ;;  %v4312_v23 = vld [vmem:[%s7773_s3 + $0x1a0] sm:$0xff]  ;;  %v4313_v52 = vld [vmem:[%s7773_s3 + $0x1a8] sm:$0xff] }
 0x2fe   : > { %v1545_v53 = vadd.f32 %v4689_v19, %v4414_v61  ;;  %v4296_v61 = vld [vmem:[%s7773_s3 + $0x120] sm:$0xff] }
 0x300   : > { %v1579_v54 = vmax.f32 %v1545_v53, 0.0  ;;  %v4415_v60 = vpop.f32.mrb[12].mxu1  ;;  %v4823_v53 = vpack.c.bf16 %v4313_v52, %v4312_v23  ;;  %v4307_v52 = vld [vmem:[%s7773_s3 + $0x178] sm:$0xff] }
 0x301   : > { %v4416_v62 = vpop.f32.mrb[13].mxu1 }
 0x302   : > { %v4417_v63 = vadd.f32 %v4416_v62, %v4415_v60  ;;  %4704 = vmatmul.mubr.msk.f32.vlgmr.msra.gmra.mrb[8].mxu0 %vm377_vm4, %v1579_v54  ;;  %v4297_v54 = vld [vmem:[%s7773_s3 + $0x128] sm:$0xff]  ;;  %v4314_v60 = vld [vmem:[%s7773_s3 + $0x1b0] sm:$0xff]  ;;  %v4315_v62 = vld [vmem:[%s7773_s3 + $0x1b8] sm:$0xff]  ;;  %4824 = vmatprep.subr.bf16.mxu1 %v4823_v53 }
 0x304   : > { %v1550_v2 = vadd.f32 %v4417_v63, %v1549_v31  ;;  %v4825_v63 = vpack.c.bf16 %v4297_v54, %v4296_v61  ;;  %v4324_v54 = vld [vmem:[%s7773_s3 + $0x200] sm:$0xff] }
 0x306   : > { %v1580_v37 = vmax.f32 %v1550_v2, 0.0  ;;  %v4827_v2 = vpack.c.bf16 %v4315_v62, %v4314_v60  ;;  %4826 = vmatpush3.bf16.msra.mxu1 %v4825_v63  ;;  %v4325_v60 = vld [vmem:[%s7773_s3 + $0x208] sm:$0xff]  ;;  %v4308_v62 = vld [vmem:[%s7773_s3 + $0x180] sm:$0xff] }
 0x307   : > { %v4847_v63 = vpack.c.bf16 %v4325_v60, %v4324_v54 }
 0x308   : > { %4706 = vmatprep.mubr.msk.f32.mxu0 %vm377_vm4, %v1580_v37  ;;  %v4298_v37 = vld [vmem:[%s7773_s3 + $0x130] sm:$0xff]  ;;  %4828 = vmatprep.subr.bf16.mxu1 %v4827_v2  ;;  %v4309_v2 = vld [vmem:[%s7773_s3 + $0x188] sm:$0xff] }
 0x31a   : > { %v4418_v39 = vpop.f32.mrb[14].mxu1 }
 0x31b   : > { %v4419_v24 = vpop.f32.mrb[15].mxu1 }
 0x31c   : > { %v4420_v12 = vadd.f32 %v4419_v24, %v4418_v39  ;;  %v4299_v39 = vld [vmem:[%s7773_s3 + $0x138] sm:$0xff]  ;;  %v4316_v24 = vld [vmem:[%s7773_s3 + $0x1c0] sm:$0xff] }
 0x31e   : > { %v1555_v3 = vadd.f32 %v4692_v20, %v4420_v12  ;;  %v4317_v12 = vld [vmem:[%s7773_s3 + $0x1c8] sm:$0xff] }
 0x320   : > { %v1581_v58 = vmax.f32 %v1555_v3, 0.0  ;;  %v4421_v18 = vpop.f32.mrb[16].mxu1  ;;  %v4829_v3 = vpack.c.bf16 %v4299_v39, %v4298_v37  ;;  %v4849_v37 = vpack.c.bf16 %v4309_v2, %v4308_v62 }
 0x321   : > { %v4422_v50 = vpop.f32.mrb[17].mxu1 }
 0x322   : > { %v4423_v48 = vadd.f32 %v4422_v50, %v4421_v18  ;;  %4707 = vmatmul.mubr.msk.f32.gmra.mrb[10].mxu0 %vm377_vm4, %v1581_v58  ;;  %v4831_v58 = vpack.c.bf16 %v4317_v12, %v4316_v24  ;;  %v4300_v18 = vld [vmem:[%s7773_s3 + $0x140] sm:$0xff]  ;;  %v4301_v50 = vld [vmem:[%s7773_s3 + $0x148] sm:$0xff]  ;;  %4830 = vmatpush3.bf16.msra.mxu1 %v4829_v3 }
 0x324   : > { %v1560_v6 = vadd.f32 %v4423_v48, %v1559_v32  ;;  %v4318_v48 = vld [vmem:[%s7773_s3 + $0x1d0] sm:$0xff]  ;;  %4832 = vmatprep.subr.bf16.mxu1 %v4831_v58 }
 0x326   : > { %v1582_v7 = vmax.f32 %v1560_v6, 0.0  ;;  %v4319_v6 = vld [vmem:[%s7773_s3 + $0x1d8] sm:$0xff] }
 0x328   : > { %4709 = vmatprep.mubr.msk.f32.mxu0 %vm377_vm4, %v1582_v7  ;;  %v4833_v7 = vpack.c.bf16 %v4301_v50, %v4300_v18 }
 0x32a   : > { %4834 = vmatpush3.bf16.msra.mxu1 %v4833_v7 }
 0x337   : > { %v4424_v8 = vpop.f32.mrb[18].mxu1 }
 0x338   : > { %v4425_v9 = vpop.f32.mrb[19].mxu1 }
 0x339   : > { %v4426_v13 = vadd.f32 %v4425_v9, %v4424_v8  ;;  %v4835_v8 = vpack.c.bf16 %v4319_v6, %v4318_v48  ;;  %v4302_v9 = vld [vmem:[%s7773_s3 + $0x150] sm:$0xff] }
 0x33b   : > { %v1565_v11 = vadd.f32 %v4695_v38, %v4426_v13  ;;  %v4427_v25 = vpop.f32.mrb[20].mxu1  ;;  %v4328_v38 = vld [vmem:[%s7773_s3 + $0x220] sm:$0xff]  ;;  %v4303_v13 = vld [vmem:[%s7773_s3 + $0x158] sm:$0xff]  ;;  %4836 = vmatprep.subr.bf16.mxu1 %v4835_v8 }
 0x33c   : > { %v4428_v14 = vpop.f32.mrb[21].mxu1  ;;  %v4327_v8 = vld [vmem:[%s7773_s3 + $0x218] sm:$0xff] }
 0x33d   : > { %v1583_v28 = vmax.f32 %v1565_v11, 0.0  ;;  %v4429_v27 = vadd.f32 %v4428_v14, %v4427_v25  ;;  %v4320_v11 = vld [vmem:[%s7773_s3 + $0x1e0] sm:$0xff]  ;;  %v4321_v25 = vld [vmem:[%s7773_s3 + $0x1e8] sm:$0xff]  ;;  %v4837_v14 = vpack.c.bf16 %v4303_v13, %v4302_v9  ;;  %v4310_v9 = vld [vmem:[%s7773_s3 + $0x190] sm:$0xff] }
 0x33f   : > { %v1570_v19 = vadd.f32 %v4429_v27, %v1569_v44  ;;  %4710 = vmatmul.mubr.msk.f32.gmra.mrb[12].mxu0 %vm377_vm4, %v1583_v28  ;;  %v4329_v44 = vld [vmem:[%s7773_s3 + $0x228] sm:$0xff]  ;;  %v4839_v28 = vpack.c.bf16 %v4321_v25, %v4320_v11  ;;  %v4304_v27 = vld [vmem:[%s7773_s3 + $0x160] sm:$0xff]  ;;  %4838 = vmatpush3.bf16.msra.mxu1 %v4837_v14 }
 0x340   : > { %v4430_v30 = vpop.f32.mrb[22].mxu1  ;;  %v4855_v45 = vpack.c.bf16 %v4329_v44, %v4328_v38 }
 0x341   : > { %v1584_v20 = vmax.f32 %v1570_v19, 0.0  ;;  %v4431_v31 = vpop.f32.mrb[23].mxu1  ;;  %v4305_v19 = vld [vmem:[%s7773_s3 + $0x168] sm:$0xff]  ;;  %4840 = vmatprep.subr.bf16.mxu1 %v4839_v28  ;;  %v4311_v28 = vld [vmem:[%s7773_s3 + $0x198] sm:$0xff] }
 0x342   : > { %v4432_v5 = vadd.f32 %v4431_v31, %v4430_v30  ;;  %4856 = vmatprep.subr.bf16.mxu0 %v4855_v45  ;;  %v4841_v30 = vpack.c.bf16 %v4305_v19, %v4304_v27  ;;  %v1737_v31 = vrot.slane %v6188_v41, 1  ;;  %v4323_v41 = vld [vmem:[%s7773_s3 + $0x1f8] sm:$0xff] }
 0x343   : > { %4712 = vmatprep.mubr.msk.f32.mxu0 %vm377_vm4, %v1584_v20  ;;  %4858 = vmatpush3.bf16.msra.mxu0 %v4855_v45  ;;  %v1736_v20 = vrot.slane %v6183_v36, 1  ;;  %v4322_v36 = vld [vmem:[%s7773_s3 + $0x1f0] sm:$0xff] }
 0x344   : > { %v1575_v32 = vadd.f32 %v4698_v33, %v4432_v5  ;;  %v4331_v33 = vld [vmem:[%s7773_s3 + $0x238] sm:$0xff]  ;;  %4842 = vmatpush3.bf16.msra.mxu1 %v4841_v30  ;;  %v1733_v5 = vrot.slane %v6198_v46, 1  ;;  %v4306_v46 = vld [vmem:[%s7773_s3 + $0x170] sm:$0xff] }
 0x345   : > { %v4859_v49 = vpack.c.bf16 %v4331_v33, %v4330_v10  ;;  %v1738_v44 = vsel %vm512_vm3, %v1736_v20, %v1737_v31  ;;  %v4845_v61 = vpack.c.bf16 %v4307_v52, %v4306_v46  ;;  %v1739_v46 = vrot.slane %v6250_v21, 1 }
 0x346   : > { %v1585_v34 = vmax.f32 %v1575_v32, 0.0  ;;  %v1734_v32 = vrot.slane %v6200_v47, 1  ;;  %v4843_v47 = vpack.c.bf16 %v4323_v41, %v4322_v36  ;;  %v1742_v36 = vrot.slane %v6243_v15, 1 }
 0x347   : > { %4860 = vmatprep.subr.bf16.mxu0 %v4859_v49  ;;  %v1743_v41 = vrot.slane %v6245_v16, 1 }
 0x348   : > { %4713 = vmatmul.mubr.msk.f32.gmra.mrb[14].mxu0 %vm377_vm4, %v1585_v34  ;;  %v1782_v34 = vld [vmem:[#allocation3 + $0x8] sm:$0x3]  ;;  %v1735_v33 = vsel %vm512_vm3, %v1733_v5, %v1734_v32  ;;  %4844 = vmatprep.subr.bf16.mxu1 %v4843_v47  ;;  %v1740_v47 = vrot.slane %v6252_v22, 1 }
 0x349   : > { %4862 = vmatpush3.bf16.msra.mxu0 %v4859_v49  ;;  %v1802_v23 = vmax.f32 %v1782_v34, 0.0  ;;  %4846 = vmatpush3.bf16.msra.mxu1 %v4845_v61  ;;  %v4853_v34 = vpack.c.bf16 %v4311_v28, %v4310_v9 }
 0x34a   : > { %4848 = vmatprep.subr.bf16.mxu1 %v4847_v63  ;;  %v1741_v54 = vsel %vm512_vm3, %v1739_v46, %v1740_v47 }
 0x34b   : > { %v1862_v53 = vrot.slane %v1802_v23, 2  ;;  %v1838_v7 = vrot.slane %v1802_v23, 1 }
 0x34d   : > { %v1863_v24 = vsel %vm537_vm2, %v1074_v17, %v1862_v53  ;;  %4850 = vmatpush3.bf16.msra.mxu1 %v4849_v37  ;;  %v4326_v17 = vld [vmem:[%s7773_s3 + $0x210] sm:$0xff] }
 0x34e   : > { %v4851_v32 = vpack.c.bf16 %v4327_v8, %v4326_v17 }
 0x350   : > { %4852 = vmatprep.subr.bf16.mxu1 %v4851_v32  ;;  %v1748_v32 = vrot.slane %v6291_v55, 1  ;;  %v1754_v55 = vrot.slane %v6339_v35, 1 }
 0x351   : > { %4854 = vmatpush3.bf16.msra.mxu1 %v4853_v34  ;;  %v1749_v34 = vrot.slane %v6293_v57, 1  ;;  %v1755_v57 = vrot.slane %v6341_v1, 1 }
 0x3d5   : > { %v4705_v38 = vpop.f32.mrb[8].mxu0 }
 0x3d6   : > { %v1766_v10 = vadd.f32 %v4705_v38, %v1738_v44  ;;  %v1678_v45 = vpop.f32.mrb[9].mxu0 }
 0x3d7   : > { %v1765_v49 = vadd.f32 %v1735_v33, %v1678_v45  ;;  %v1839_v33 = vsel %vm512_vm3, %v1050_v42, %v1838_v7  ;;  %v1744_v42 = vsel %vm512_vm3, %v1742_v36, %v1743_v41 }
 0x3d8   : > { %1774 = vst.msk [vmem:[#allocation3 + $0x21] sm:$0xff] %vm355_vm5, %v1766_v10 }
 0x3d9   : > { %1773 = vst.msk [vmem:[#allocation3 + $0x11] sm:$0xff] %vm355_vm5, %v1765_v49 }
 0x3df   : > { %v6574_v39 = vld [vmem:[#allocation3 + $0x20] sm:$0xff]  ;;  %v6579_v12 = vld [vmem:[#allocation3 + $0x28] sm:$0x3] }
 0x3e0   : > { %v6582_v3 = vmax.f32 %v6574_v39, 0.0  ;;  %v1806_v58 = vmax.f32 %v6579_v12, 0.0  ;;  %v6585_v18 = vld [vmem:[#allocation3 + $0x10] sm:$0xff]  ;;  %v6587_v50 = vld [vmem:[#allocation3 + $0x18] sm:$0x3] }
 0x3e1   : > { %v6590_v48 = vmax.f32 %v6585_v18, 0.0  ;;  %v1804_v6 = vmax.f32 %v6587_v50, 0.0 }
 0x3e2   : > { %v5081_v13 = vpack.i.bf16 %v1863_v24, %v6582_v3  ;;  %v1867_v11 = vrot.slane %v6582_v3, 2  ;;  %v1868_v25 = vrot.slane %v1806_v58, 2  ;;  %v1843_v14 = vrot.slane %v6582_v3, 1 }
 0x3e3   : > { %v1844_v27 = vrot.slane %v1806_v58, 1  ;;  %v1840_v19 = vrot.slane %v6590_v48, 1  ;;  %v1841_v30 = vrot.slane %v1804_v6, 1  ;;  %v1864_v20 = vrot.slane %v6590_v48, 2 }
 0x3e4   : > { %5082 = vrot.lane.b32.xlu1 %v5081_v13, %s5620_s26  ;;  %v1869_v31 = vsel %vm537_vm2, %v1867_v11, %v1868_v25  ;;  %v1865_v5 = vrot.slane %v1804_v6, 2 }
 0x3e5   : > { %4723 = vmatprep.mubr.msk.f32.mxu0 %vm355_vm5, %v1869_v31  ;;  %v6614_v38 = vsel %vm512_vm3, %v1843_v14, %v1844_v27  ;;  %v6617_v44 = vsel %vm512_vm3, %v1840_v19, %v1841_v30 }
 0x3e6   : > { %v5086_v10 = vpack.i.bf16 %v6590_v48, %v6614_v38  ;;  %v5096_v45 = vpack.i.bf16 %v6617_v44, %v1869_v31  ;;  %v1866_v49 = vsel %vm537_vm2, %v1864_v20, %v1865_v5 }
 0x3e7   : > { %v5091_v23 = vpack.i.bf16 %v1839_v33, %v1866_v49 }
 0x3e8   : > { %5087 = vrot.lane.b32.xlu0 %v5086_v10, %s5621_s27  ;;  %5097 = vrot.lane.b32.xlu1 %v5096_v45, %s5619_s14  ;;  %v1745_v10 = vrot.slane %v6298_v59, 1  ;;  %v1746_v45 = vrot.slane %v6300_v4, 1  ;;  %v1751_v59 = vrot.slane %v6344_v40, 1  ;;  %v1752_v4 = vrot.slane %v6346_v43, 1 }
 0x3ea   : > { %v1747_v41 = vsel %vm512_vm3, %v1745_v10, %v1746_v45 }
 0x3ec   : > { %5092 = vrot.lane.b32.xlu0 %v5091_v23, %s5619_s14 }
 0x3f5   : > { %v4708_v52 = vpop.f32.mrb[10].mxu0 }
 0x3f6   : > { %v1768_v61 = vadd.f32 %v4708_v52, %v1744_v42  ;;  %v1688_v53 = vpop.f32.mrb[11].mxu0  ;;  %v1756_v52 = vsel %vm512_vm3, %v1754_v55, %v1755_v57 }
 0x3f7   : > { %v1767_v60 = vadd.f32 %v1741_v54, %v1688_v53  ;;  %v1753_v53 = vsel %vm512_vm3, %v1751_v59, %v1752_v4  ;;  %v1800_v4 = vld [vmem:[#allocation3 + $0x98] sm:$0x3] }
 0x3f8   : > { %1776 = vst.msk [vmem:[#allocation3 + $0x41] sm:$0xff] %vm355_vm5, %v1768_v61 }
 0x3f9   : > { %1775 = vst.msk [vmem:[#allocation3 + $0x31] sm:$0xff] %vm355_vm5, %v1767_v60 }
 0x3ff   : > { %v6637_v62 = vld [vmem:[#allocation3 + $0x40] sm:$0xff]  ;;  %v6639_v15 = vld [vmem:[#allocation3 + $0x48] sm:$0x3] }
 0x400   : > { %v6642_v16 = vmax.f32 %v6637_v62, 0.0  ;;  %v6644_v21 = vld [vmem:[#allocation3 + $0x30] sm:$0xff]  ;;  %v6646_v22 = vld [vmem:[#allocation3 + $0x38] sm:$0x3]  ;;  %v1810_v63 = vmax.f32 %v6639_v15, 0.0 }
 0x401   : > { %v6650_v2 = vmax.f32 %v6644_v21, 0.0  ;;  %v1808_v37 = vmax.f32 %v6646_v22, 0.0 }
 0x402   : > { %v5101_v24 = vpack.i.bf16 %v1869_v31, %v6642_v16  ;;  %v1873_v58 = vrot.slane %v6642_v16, 2  ;;  %v1874_v6 = vrot.slane %v1810_v63, 2  ;;  %v1849_v7 = vrot.slane %v6642_v16, 1 }
 0x403   : > { %v5106_v17 = vpack.i.bf16 %v1866_v49, %v6650_v2  ;;  %v1870_v8 = vrot.slane %v6650_v2, 2  ;;  %v1871_v9 = vrot.slane %v1808_v37, 2  ;;  %v1846_v13 = vrot.slane %v6650_v2, 1 }
 0x404   : > { %5102 = vrot.lane.b32.xlu1 %v5101_v24, %s5620_s26  ;;  %v1847_v11 = vrot.slane %v1808_v37, 1  ;;  %v1850_v25 = vrot.slane %v1810_v63, 1  ;;  %v1875_v28 = vsel %vm537_vm2, %v1873_v58, %v1874_v6  ;;  %v1750_v49 = vsel %vm512_vm3, %v1748_v32, %v1749_v34 }
 0x405   : > { %5107 = vrot.lane.b32.xlu0 %v5106_v17, %s5620_s26  ;;  %v1872_v14 = vsel %vm537_vm2, %v1870_v8, %v1871_v9 }
 0x406   : > { %4724 = vmatmul.mubr.msk.f32.vlgmr.msra.gmra.mrb[16].mxu0 %vm355_vm5, %v1872_v14  ;;  %v6665_v27 = vsel %vm512_vm3, %v1846_v13, %v1847_v11  ;;  %v6668_v19 = vsel %vm512_vm3, %v1849_v7, %v1850_v25  ;;  %v5121_v5 = vpack.i.bf16 %v6614_v38, %v1872_v14 }
 0x407   : > { %4726 = vmatprep.mubr.msk.f32.mxu0 %vm355_vm5, %v1875_v28  ;;  %v5116_v30 = vpack.i.bf16 %v6582_v3, %v6665_v27  ;;  %v5111_v20 = vpack.i.bf16 %v6650_v2, %v6668_v19  ;;  %v5126_v31 = vpack.i.bf16 %v6665_v27, %v1875_v28 }
 0x409   : > { %5117 = vrot.lane.b32.xlu1 %v5116_v30, %s5621_s27  ;;  %5112 = vrot.lane.b32.xlu0 %v5111_v20, %s5621_s27 }
 0x40d   : > { %5127 = vrot.lane.b32.xlu1 %v5126_v31, %s5619_s14  ;;  %5122 = vrot.lane.b32.xlu0 %v5121_v5, %s5619_s14 }
 0x412   : > { %v4711_v33 = vpop.f32.mrb[12].mxu0 }
 0x413   : > { %v1770_v23 = vadd.f32 %v4711_v33, %v1750_v49  ;;  %v1698_v36 = vpop.f32.mrb[13].mxu0 }
 0x414   : > { %v1769_v46 = vadd.f32 %v1747_v41, %v1698_v36 }
 0x415   : > { %1778 = vst.msk [vmem:[#allocation3 + $0x61] sm:$0xff] %vm355_vm5, %v1770_v23 }
 0x416   : > { %1777 = vst.msk [vmem:[#allocation3 + $0x51] sm:$0xff] %vm355_vm5, %v1769_v46 }
 0x41b   : > { %v4714_v47 = vpop.f32.mrb[14].mxu0 }
 0x41c   : > { %v1772_v42 = vadd.f32 %v4714_v47, %v1756_v52  ;;  %v1708_v61 = vpop.f32.mrb[15].mxu0  ;;  %v6695_v54 = vld [vmem:[#allocation3 + $0x60] sm:$0xff]  ;;  %v6697_v60 = vld [vmem:[#allocation3 + $0x68] sm:$0x3] }
 0x41d   : > { %v1771_v63 = vadd.f32 %v1753_v53, %v1708_v61  ;;  %v6700_v35 = vmax.f32 %v6695_v54, 0.0  ;;  %v6702_v1 = vld [vmem:[#allocation3 + $0x50] sm:$0xff]  ;;  %v6704_v40 = vld [vmem:[#allocation3 + $0x58] sm:$0x3]  ;;  %v1814_v43 = vmax.f32 %v6697_v60, 0.0 }
 0x41e   : > { %1780 = vst.msk [vmem:[#allocation3 + $0x81] sm:$0xff] %vm355_vm5, %v1772_v42  ;;  %v6709_v37 = vmax.f32 %v6702_v1, 0.0  ;;  %v1812_v24 = vmax.f32 %v6704_v40, 0.0 }
 0x41f   : > { %1779 = vst.msk [vmem:[#allocation3 + $0x71] sm:$0xff] %vm355_vm5, %v1771_v63  ;;  %v5131_v58 = vpack.i.bf16 %v1875_v28, %v6700_v35  ;;  %v1856_v6 = vrot.slane %v1814_v43, 1  ;;  %v1879_v7 = vrot.slane %v6700_v35, 2  ;;  %v1880_v17 = vrot.slane %v1814_v43, 2 }
 0x420   : > { %v5136_v8 = vpack.i.bf16 %v1872_v14, %v6709_v37  ;;  %v1853_v9 = vrot.slane %v1812_v24, 1  ;;  %v1876_v13 = vrot.slane %v6709_v37, 2  ;;  %v1877_v11 = vrot.slane %v1812_v24, 2 }
 0x421   : > { %5132 = vrot.lane.b32.xlu1 %v5131_v58, %s5620_s26  ;;  %v1852_v25 = vrot.slane %v6709_v37, 1  ;;  %v1855_v30 = vrot.slane %v6700_v35, 1  ;;  %v1881_v14 = vsel %vm537_vm2, %v1879_v7, %v1880_v17  ;;  %v1820_v63 = vmax.f32 %v1800_v4, 0.0 }
 0x422   : > { %5137 = vrot.lane.b32.xlu0 %v5136_v8, %s5620_s26  ;;  %v1878_v28 = vsel %vm537_vm2, %v1876_v13, %v1877_v11 }
 0x423   : > { %4727 = vmatmul.mubr.msk.f32.gmra.mrb[18].mxu0 %vm355_vm5, %v1878_v28  ;;  %v6724_v20 = vsel %vm512_vm3, %v1852_v25, %v1853_v9  ;;  %v6728_v31 = vsel %vm512_vm3, %v1855_v30, %v1856_v6  ;;  %v5151_v46 = vpack.i.bf16 %v6668_v19, %v1878_v28  ;;  %v1907_v8 = vrot.slane %v1820_v63, 2 }
 0x424   : > { %4729 = vmatprep.mubr.msk.f32.mxu0 %vm355_vm5, %v1881_v14  ;;  %v5146_v5 = vpack.i.bf16 %v6642_v16, %v6724_v20  ;;  %v5141_v32 = vpack.i.bf16 %v6709_v37, %v6728_v31  ;;  %v5156_v55 = vpack.i.bf16 %v6724_v20, %v1881_v14  ;;  %v1904_v30 = vrot.slane %v1820_v63, 1 }
 0x425   : > { %v6735_v34 = vld [vmem:[#allocation3 + $0x80] sm:$0xff]  ;;  %v6737_v10 = vld [vmem:[#allocation3 + $0x88] sm:$0x3]  ;;  %v1908_v9 = vsel %vm537_vm2, %v1119_v56, %v1907_v8 }
 0x426   : > { %v6739_v45 = vld [vmem:[#allocation3 + $0x70] sm:$0xff]  ;;  %v1817_v33 = vmax.f32 %v6735_v34, 0.0  ;;  %5147 = vrot.lane.b32.xlu1 %v5146_v5, %s5621_s27  ;;  %5142 = vrot.lane.b32.xlu0 %v5141_v32, %s5621_s27  ;;  %v6744_v49 = vld [vmem:[#allocation3 + $0x78] sm:$0x3]  ;;  %v1818_v23 = vmax.f32 %v6737_v10, 0.0 }
 0x427   : > { %v6748_v36 = vmax.f32 %v6739_v45, 0.0  ;;  %v1816_v41 = vmax.f32 %v6744_v49, 0.0 }
 0x428   : > { %v1898_v57 = vrot.slane %v1817_v33, 2  ;;  %v1899_v59 = vrot.slane %v1818_v23, 2  ;;  %v5161_v24 = vpack.i.bf16 %v1881_v14, %v1817_v33  ;;  %v1888_v7 = vrot.slane %v1818_v23, 1 }
 0x429   : > { %v1882_v47 = vrot.slane %v6748_v36, 2  ;;  %v1883_v52 = vrot.slane %v1816_v41, 2  ;;  %v1858_v42 = vrot.slane %v6748_v36, 1  ;;  %v1859_v61 = vrot.slane %v1816_v41, 1 }
 0x42a   : > { %5157 = vrot.lane.b32.xlu1 %v5156_v55, %s5619_s14  ;;  %5152 = vrot.lane.b32.xlu0 %v5151_v46, %s5619_s14  ;;  %v5166_v43 = vpack.i.bf16 %v1878_v28, %v6748_v36  ;;  %v1900_v58 = vsel %vm537_vm2, %v1898_v57, %v1899_v59  ;;  %v1887_v17 = vrot.slane %v1817_v33, 1  ;;  %v1905_v14 = vsel %vm512_vm3, %v1116_v29, %v1904_v30 }
 0x42b   : > { %v1884_v53 = vsel %vm537_vm2, %v1882_v47, %v1883_v52  ;;  %v6762_v6 = vsel %vm512_vm3, %v1858_v42, %v1859_v61  ;;  %v5196_v32 = vpack.i.bf16 %v1817_v33, %v1905_v14 }
 0x42c   : > { %4730 = vmatmul.mubr.msk.f32.gmra.mrb[20].mxu0 %vm355_vm5, %v1884_v53  ;;  %v5176_v13 = vpack.i.bf16 %v6728_v31, %v1884_v53  ;;  %v5171_v11 = vpack.i.bf16 %v6700_v35, %v6762_v6  ;;  %v6775_v25 = vsel %vm512_vm3, %v1887_v17, %v1888_v7  ;;  %v5186_v28 = vpack.i.bf16 %v6762_v6, %v1900_v58 }
 0x42d   : > { %4732 = vmatprep.mubr.msk.f32.mxu0 %vm355_vm5, %v1900_v58  ;;  %v5181_v56 = vpack.i.bf16 %v6748_v36, %v6775_v25  ;;  %v5191_v5 = vpack.i.bf16 %v1884_v53, %v6353_v51 }
 0x42e   : > { %5162 = vrot.lane.b32.xlu1 %v5161_v24, %s5620_s26  ;;  %5167 = vrot.lane.b32.xlu0 %v5166_v43, %s5620_s26 }
 0x430   : > { %4733 = vmatmul.mubr.msk.f32.gmra.mrb[22].mxu0 %vm355_vm5, %v1908_v9 }
 0x432   : > { %5172 = vrot.lane.b32.xlu1 %v5171_v11, %s5621_s27  ;;  %5177 = vrot.lane.b32.xlu0 %v5176_v13, %s5619_s14 }
 0x436   : > { %5187 = vrot.lane.b32.xlu1 %v5186_v28, %s5619_s14  ;;  %5182 = vrot.lane.b32.xlu0 %v5181_v56, %s5621_s27 }
 0x43a   : > { %5197 = vrot.lane.b32.xlu1 %v5196_v32, %s5621_s27  ;;  %5192 = vrot.lane.b32.xlu0 %v5191_v5, %s5620_s26 }
 0x456   : > { %v5083_v41 = vpop.permute.xlu1 %5082 }
 0x457   : > { %v5085_v59 = vunpack.i.h.bf16 %v5083_v41  ;;  %v5084_v4 = vunpack.i.l.bf16 %v5083_v41 }
 0x45a   : > { %v5088_v23 = vpop.permute.xlu0 %5087  ;;  %v5098_v63 = vpop.permute.xlu1 %5097 }
 0x45b   : > { %v5090_v47 = vunpack.i.h.bf16 %v5088_v23  ;;  %v5089_v29 = vunpack.i.l.bf16 %v5088_v23  ;;  %v5100_v58 = vunpack.i.h.bf16 %v5098_v63  ;;  %v5099_v7 = vunpack.i.l.bf16 %v5098_v63 }
 0x45d   : > { %v2078_v11 = vsel %vm355_vm5, %v6614_v38, %v5099_v7  ;;  %v2054_v30 = vsel %vm355_vm5, %v6590_v48, %v5100_v58 }
 0x45e   : > { %v5093_v46 = vpop.permute.xlu0 %5092 }
 0x45f   : > { %v5095_v55 = vunpack.i.h.bf16 %v5093_v46  ;;  %v5094_v57 = vunpack.i.l.bf16 %v5093_v46 }
 0x461   : > { %v2053_v52 = vsel %vm355_vm5, %v6154_v26, %v5095_v55  ;;  %v2077_v51 = vsel %vm355_vm5, %v6617_v44, %v5094_v57 }
 0x462   : > { %v2085_v33 = vsel %vm1274_vm14, %v2077_v51, %v5084_v4  ;;  %v2061_v42 = vsel %vm1274_vm14, %v2053_v52, %v5085_v59 }
 0x463   : > { %v2093_v61 = vsel %vm1283_vm15, %v2085_v33, %v5089_v29  ;;  %v2069_v53 = vsel %vm1283_vm15, %v2061_v42, %v5090_v47 }
 0x464   : > { %2218 = vmatprep.mubr.f32.mxu1 %v2093_v61 }
 0x465   : > { %2219 = vmatmul.mubr.f32.vlgmr.msra.gmra.mrb[24].mxu1 %v2069_v53 }
 0x476   : > { %v5103_v43 = vpop.permute.xlu1 %5102 }
 0x477   : > { %v5108_v24 = vpop.permute.xlu0 %5107  ;;  %v5105_v46 = vunpack.i.h.bf16 %v5103_v43  ;;  %v5104_v55 = vunpack.i.l.bf16 %v5103_v43 }
 0x478   : > { %v5110_v17 = vunpack.i.h.bf16 %v5108_v24  ;;  %v5109_v26 = vunpack.i.l.bf16 %v5108_v24 }
 0x47a   : > { %v2086_v28 = vsel %vm1274_vm14, %v2078_v11, %v5109_v26  ;;  %v2062_v56 = vsel %vm1274_vm14, %v2054_v30, %v5110_v17 }
 0x47b   : > { %v5118_v8 = vpop.permute.xlu1 %5117  ;;  %v5113_v9 = vpop.permute.xlu0 %5112 }
 0x47c   : > { %v5120_v44 = vunpack.i.h.bf16 %v5118_v8  ;;  %v5119_v13 = vunpack.i.l.bf16 %v5118_v8  ;;  %v5115_v57 = vunpack.i.h.bf16 %v5113_v9  ;;  %v5114_v38 = vunpack.i.l.bf16 %v5113_v9 }
 0x47e   : > { %v2094_v14 = vsel %vm1283_vm15, %v2086_v28, %v5119_v13  ;;  %v2070_v5 = vsel %vm1283_vm15, %v2062_v56, %v5120_v44 }
 0x47f   : > { %2223 = vmatprep.mubr.f32.mxu1 %v2094_v14  ;;  %v5123_v32 = vpop.permute.xlu0 %5122  ;;  %v5128_v51 = vpop.permute.xlu1 %5127 }
 0x480   : > { %v5125_v23 = vunpack.i.h.bf16 %v5123_v32  ;;  %v5124_v41 = vunpack.i.l.bf16 %v5123_v32  ;;  %2224 = vmatmul.mubr.f32.gmra.mrb[26].mxu1 %v2070_v5  ;;  %v5130_v61 = vunpack.i.h.bf16 %v5128_v51  ;;  %v5129_v53 = vunpack.i.l.bf16 %v5128_v51 }
 0x482   : > { %v2079_v48 = vsel %vm355_vm5, %v6665_v27, %v5124_v41  ;;  %v2055_v59 = vsel %vm355_vm5, %v6582_v3, %v5125_v23  ;;  %v2080_v7 = vsel %vm355_vm5, %v6668_v19, %v5129_v53  ;;  %v2056_v17 = vsel %vm355_vm5, %v6650_v2, %v5130_v61 }
 0x483   : > { %v2087_v4 = vsel %vm1274_vm14, %v2079_v48, %v5104_v55  ;;  %v2063_v47 = vsel %vm1274_vm14, %v2055_v59, %v5105_v46 }
 0x484   : > { %v2095_v29 = vsel %vm1283_vm15, %v2087_v4, %v5114_v38  ;;  %v2071_v52 = vsel %vm1283_vm15, %v2063_v47, %v5115_v57 }
 0x485   : > { %2228 = vmatprep.mubr.f32.mxu1 %v2095_v29 }
 0x486   : > { %2229 = vmatmul.mubr.f32.gmra.mrb[28].mxu1 %v2071_v52 }
 0x493   : > { %v5133_v33 = vpop.permute.xlu1 %5132 }
 0x494   : > { %v5138_v42 = vpop.permute.xlu0 %5137  ;;  %v5135_v56 = vunpack.i.h.bf16 %v5133_v33  ;;  %v5134_v14 = vunpack.i.l.bf16 %v5133_v33 }
 0x495   : > { %v5140_v63 = vunpack.i.h.bf16 %v5138_v42  ;;  %v5139_v27 = vunpack.i.l.bf16 %v5138_v42 }
 0x497   : > { %v2088_v26 = vsel %vm1274_vm14, %v2080_v7, %v5139_v27  ;;  %v2064_v8 = vsel %vm1274_vm14, %v2056_v17, %v5140_v63 }
 0x498   : > { %v5148_v43 = vpop.permute.xlu1 %5147  ;;  %v5143_v24 = vpop.permute.xlu0 %5142 }
 0x499   : > { %v5150_v3 = vunpack.i.h.bf16 %v5148_v43  ;;  %v5149_v58 = vunpack.i.l.bf16 %v5148_v43  ;;  %v5145_v19 = vunpack.i.h.bf16 %v5143_v24  ;;  %v5144_v5 = vunpack.i.l.bf16 %v5143_v24 }
 0x49b   : > { %v2096_v9 = vsel %vm1283_vm15, %v2088_v26, %v5149_v58  ;;  %v2072_v44 = vsel %vm1283_vm15, %v2064_v8, %v5150_v3 }
 0x49c   : > { %v5158_v13 = vpop.permute.xlu1 %5157  ;;  %2233 = vmatprep.mubr.f32.mxu1 %v2096_v9  ;;  %v5153_v11 = vpop.permute.xlu0 %5152 }
 0x49d   : > { %v5155_v30 = vunpack.i.h.bf16 %v5153_v11  ;;  %v5154_v28 = vunpack.i.l.bf16 %v5153_v11  ;;  %2234 = vmatmul.mubr.f32.gmra.mrb[30].mxu1 %v2072_v44  ;;  %v5160_v23 = vunpack.i.h.bf16 %v5158_v13  ;;  %v5159_v41 = vunpack.i.l.bf16 %v5158_v13 }
 0x49f   : > { %v2081_v2 = vsel %vm355_vm5, %v6724_v20, %v5154_v28  ;;  %v2057_v32 = vsel %vm355_vm5, %v6642_v16, %v5155_v30  ;;  %v2082_v16 = vsel %vm355_vm5, %v6728_v31, %v5159_v41  ;;  %v2058_v52 = vsel %vm355_vm5, %v6709_v37, %v5160_v23 }
 0x4a0   : > { %v5163_v46 = vpop.permute.xlu1 %5162  ;;  %v5168_v55 = vpop.permute.xlu0 %5167  ;;  %v2089_v57 = vsel %vm1274_vm14, %v2081_v2, %v5134_v14  ;;  %v2065_v38 = vsel %vm1274_vm14, %v2057_v32, %v5135_v56 }
 0x4a1   : > { %v5170_v48 = vunpack.i.h.bf16 %v5168_v55  ;;  %v5169_v59 = vunpack.i.l.bf16 %v5168_v55  ;;  %v2097_v4 = vsel %vm1283_vm15, %v2089_v57, %v5144_v5  ;;  %v2073_v47 = vsel %vm1283_vm15, %v2065_v38, %v5145_v19  ;;  %v4340_v57 = vld [vmem:[%s7774_s4 + $0x10] sm:$0xff] }
 0x4a2   : > { %2238 = vmatprep.mubr.f32.mxu1 %v2097_v4  ;;  %v5165_v3 = vunpack.i.h.bf16 %v5163_v46  ;;  %v5164_v37 = vunpack.i.l.bf16 %v5163_v46 }
 0x4a3   : > { %2239 = vmatmul.mubr.f32.gmra.mrb[32].mxu1 %v2073_v47  ;;  %v2090_v53 = vsel %vm1274_vm14, %v2082_v16, %v5169_v59  ;;  %v2066_v63 = vsel %vm1274_vm14, %v2058_v52, %v5170_v48 }
 0x4a4   : > { %v5173_v20 = vpop.permute.xlu1 %5172  ;;  %v5178_v29 = vpop.permute.xlu0 %5177 }
 0x4a5   : > { %v5175_v51 = vunpack.i.h.bf16 %v5173_v20  ;;  %v5174_v33 = vunpack.i.l.bf16 %v5173_v20  ;;  %v5180_v42 = vunpack.i.h.bf16 %v5178_v29  ;;  %v5179_v61 = vunpack.i.l.bf16 %v5178_v29 }
 0x4a7   : > { %v2098_v27 = vsel %vm1283_vm15, %v2090_v53, %v5174_v33  ;;  %v2074_v43 = vsel %vm1283_vm15, %v2066_v63, %v5175_v51  ;;  %v2083_v24 = vsel %vm355_vm5, %v6762_v6, %v5179_v61  ;;  %v2059_v31 = vsel %vm355_vm5, %v6700_v35, %v5180_v42 }
 0x4a8   : > { %v5188_v58 = vpop.permute.xlu1 %5187  ;;  %2243 = vmatprep.mubr.f32.mxu1 %v2098_v27  ;;  %v5183_v7 = vpop.permute.xlu0 %5182  ;;  %v2091_v44 = vsel %vm1274_vm14, %v2083_v24, %v5164_v37  ;;  %v2067_v13 = vsel %vm1274_vm14, %v2059_v31, %v5165_v3 }
 0x4a9   : > { %v5185_v17 = vunpack.i.h.bf16 %v5183_v7  ;;  %v5184_v26 = vunpack.i.l.bf16 %v5183_v7  ;;  %2244 = vmatmul.mubr.f32.gmra.mrb[34].mxu1 %v2074_v43  ;;  %v5190_v8 = vunpack.i.h.bf16 %v5188_v58  ;;  %v5189_v9 = vunpack.i.l.bf16 %v5188_v58 }
 0x4ab   : > { %v2099_v11 = vsel %vm1283_vm15, %v2091_v44, %v5184_v26  ;;  %v2075_v6 = vsel %vm1283_vm15, %v2067_v13, %v5185_v17  ;;  %v2084_v5 = vsel %vm355_vm5, %v6775_v25, %v5189_v9  ;;  %v2060_v2 = vsel %vm355_vm5, %v6748_v36, %v5190_v8  ;;  %v4341_v25 = vld [vmem:[%s7774_s4 + $0x18] sm:$0xff] }
 0x4ac   : > { %v5198_v30 = vpop.permute.xlu1 %5197  ;;  %v5193_v35 = vpop.permute.xlu0 %5192  ;;  %2248 = vmatprep.mubr.f32.mxu1 %v2099_v11  ;;  %v4863_v38 = vpack.c.bf16 %v4341_v25, %v4340_v57 }
 0x4ad   : > { %v5195_v28 = vunpack.i.h.bf16 %v5193_v35  ;;  %v5194_v56 = vunpack.i.l.bf16 %v5193_v35  ;;  %2249 = vmatmul.mubr.f32.gmra.mrb[36].mxu1 %v2075_v6  ;;  %v5200_v14 = vunpack.i.h.bf16 %v5198_v30  ;;  %v5199_v19 = vunpack.i.l.bf16 %v5198_v30 }
 0x4ae   : > { %4864 = vmatprep.subr.bf16.mxu0 %v4863_v38 }
 0x4af   : > { %v2092_v32 = vsel %vm1274_vm14, %v2084_v5, %v5194_v56  ;;  %v2068_v23 = vsel %vm1274_vm14, %v2060_v2, %v5195_v28  ;;  %4866 = vmatpush3.bf16.msra.mxu0 %v4863_v38  ;;  %v2920_v38 = vld [vmem:[%s7775_s5 + $0x100] sm:$0xff] }
 0x4b0   : > { %v2100_v41 = vsel %vm1283_vm15, %v2092_v32, %v5199_v19  ;;  %v2076_v46 = vsel %vm1283_vm15, %v2068_v23, %v5200_v14 }
 0x4b1   : > { %2253 = vmatprep.mubr.f32.mxu1 %v2100_v41 }
 0x4b2   : > { %2254 = vmatmul.mubr.f32.gmra.mrb[38].mxu1 %v2076_v46 }
 0x4d9   : > { %v4725_v55 = vpop.f32.mrb[16].mxu0 }
 0x4da   : > { %v2325_v36 = vpop.f32.mrb[17].mxu0 }
 0x4f6   : > { %v4728_v48 = vpop.f32.mrb[18].mxu0 }
 0x4f7   : > { %v2335_v59 = vpop.f32.mrb[19].mxu0 }
 0x4ff   : > { %v4731_v4 = vpop.f32.mrb[20].mxu0 }
 0x500   : > { %v2345_v47 = vpop.f32.mrb[21].mxu0 }
 0x503   : > { %v4734_v20 = vpop.f32.mrb[22].mxu0 }
 0x504   : > { %v2355_v29 = vpop.f32.mrb[23].mxu0 }
 0x538   : > { %v4487_v16 = vpop.f32.mrb[24].mxu1 }
 0x539   : > { %v4488_v52 = vpop.f32.mrb[25].mxu1 }
 0x53a   : > { %v4489_v51 = vadd.f32 %v4488_v52, %v4487_v16  ;;  %v2905_v16 = vld [vmem:[%s7775_s5 + $0x88] sm:$0xff]  ;;  %v2888_v52 = vld [vmem:[%s7775_s5] sm:$0xff] }
 0x53c   : > { %v2326_v33 = vadd.f32 %v4489_v51, %v2325_v36 }
 0x53e   : > { %v2364_v42 = vmax.f32 %v2326_v33, 0.0  ;;  %v2889_v33 = vld [vmem:[%s7775_s5 + $0x8] sm:$0xff] }
 0x540   : > { %4739 = vmatprep.mubr.msk.f32.mxu0 %vm377_vm4, %v2364_v42  ;;  %v2906_v42 = vld [vmem:[%s7775_s5 + $0x90] sm:$0xff] }
 0x553   : > { %v4490_v61 = vpop.f32.mrb[26].mxu1 }
 0x554   : > { %v4491_v53 = vpop.f32.mrb[27].mxu1 }
 0x555   : > { %v4492_v63 = vadd.f32 %v4491_v53, %v4490_v61  ;;  %v2907_v61 = vld [vmem:[%s7775_s5 + $0x98] sm:$0xff]  ;;  %v4869_v53 = vpack.c.bf16 %v2889_v33, %v2888_v52  ;;  %v2917_v52 = vld [vmem:[%s7775_s5 + $0xe8] sm:$0xff] }
 0x557   : > { %v2331_v27 = vadd.f32 %v4725_v55, %v4492_v63  ;;  %v4871_v63 = vpack.c.bf16 %v2907_v61, %v2906_v42  ;;  %v2901_v42 = vld [vmem:[%s7775_s5 + $0x68] sm:$0xff] }
 0x559   : > { %v2365_v43 = vmax.f32 %v2331_v27, 0.0  ;;  %v4493_v24 = vpop.f32.mrb[28].mxu1  ;;  %v2890_v27 = vld [vmem:[%s7775_s5 + $0x10] sm:$0xff] }
 0x55a   : > { %v4494_v31 = vpop.f32.mrb[29].mxu1 }
 0x55b   : > { %v4495_v3 = vadd.f32 %v4494_v31, %v4493_v24  ;;  %4740 = vmatmul.mubr.msk.f32.vlgmr.msra.gmra.mrb[24].mxu0 %vm377_vm4, %v2365_v43  ;;  %v2891_v43 = vld [vmem:[%s7775_s5 + $0x18] sm:$0xff]  ;;  %v2908_v24 = vld [vmem:[%s7775_s5 + $0xa0] sm:$0xff]  ;;  %v2909_v31 = vld [vmem:[%s7775_s5 + $0xa8] sm:$0xff] }
 0x55d   : > { %v2336_v37 = vadd.f32 %v4495_v3, %v2335_v59  ;;  %v4873_v3 = vpack.c.bf16 %v2891_v43, %v2890_v27 }
 0x55f   : > { %v2366_v58 = vmax.f32 %v2336_v37, 0.0  ;;  %v4875_v37 = vpack.c.bf16 %v2909_v31, %v2908_v24 }
 0x561   : > { %4742 = vmatprep.mubr.msk.f32.mxu0 %vm377_vm4, %v2366_v58  ;;  %v2892_v58 = vld [vmem:[%s7775_s5 + $0x20] sm:$0xff] }
 0x570   : > { %v4496_v7 = vpop.f32.mrb[30].mxu1 }
 0x571   : > { %v4497_v17 = vpop.f32.mrb[31].mxu1 }
 0x572   : > { %v4498_v26 = vadd.f32 %v4497_v17, %v4496_v7  ;;  %v2893_v7 = vld [vmem:[%s7775_s5 + $0x28] sm:$0xff]  ;;  %v2910_v17 = vld [vmem:[%s7775_s5 + $0xb0] sm:$0xff] }
 0x574   : > { %v2341_v8 = vadd.f32 %v4728_v48, %v4498_v26  ;;  %v2921_v48 = vld [vmem:[%s7775_s5 + $0x108] sm:$0xff]  ;;  %v2911_v26 = vld [vmem:[%s7775_s5 + $0xb8] sm:$0xff] }
 0x575   : > { %v4899_v59 = vpack.c.bf16 %v2921_v48, %v2920_v38 }
 0x576   : > { %v2367_v9 = vmax.f32 %v2341_v8, 0.0  ;;  %v4499_v44 = vpop.f32.mrb[32].mxu1  ;;  %v4877_v8 = vpack.c.bf16 %v2893_v7, %v2892_v58 }
 0x577   : > { %v4500_v13 = vpop.f32.mrb[33].mxu1  ;;  %4900 = vmatprep.subr.bf16.mxu0 %v4899_v59 }
 0x578   : > { %4743 = vmatmul.mubr.msk.f32.gmra.mrb[26].mxu0 %vm377_vm4, %v2367_v9  ;;  %v4501_v11 = vadd.f32 %v4500_v13, %v4499_v44  ;;  %v4879_v9 = vpack.c.bf16 %v2911_v26, %v2910_v17  ;;  %v2894_v44 = vld [vmem:[%s7775_s5 + $0x30] sm:$0xff]  ;;  %v2895_v13 = vld [vmem:[%s7775_s5 + $0x38] sm:$0xff] }
 0x579   : > { %4902 = vmatpush3.bf16.msra.mxu0 %v4899_v59  ;;  %v2918_v26 = vld [vmem:[%s7775_s5 + $0xf0] sm:$0xff] }
 0x57a   : > { %v2346_v6 = vadd.f32 %v4501_v11, %v2345_v47  ;;  %v2923_v47 = vld [vmem:[%s7775_s5 + $0x118] sm:$0xff]  ;;  %v2912_v11 = vld [vmem:[%s7775_s5 + $0xc0] sm:$0xff] }
 0x57c   : > { %v4502_v30 = vpop.f32.mrb[34].mxu1  ;;  %v2368_v35 = vmax.f32 %v2346_v6, 0.0  ;;  %v2913_v6 = vld [vmem:[%s7775_s5 + $0xc8] sm:$0xff] }
 0x57d   : > { %v4503_v28 = vpop.f32.mrb[35].mxu1 }
 0x57e   : > { %v4504_v56 = vadd.f32 %v4503_v28, %v4502_v30  ;;  %4745 = vmatprep.mubr.msk.f32.mxu0 %vm377_vm4, %v2368_v35  ;;  %v4881_v30 = vpack.c.bf16 %v2895_v13, %v2894_v44  ;;  %v4883_v35 = vpack.c.bf16 %v2913_v6, %v2912_v11  ;;  %v2896_v28 = vld [vmem:[%s7775_s5 + $0x40] sm:$0xff] }
 0x580   : > { %v2351_v14 = vadd.f32 %v4731_v4, %v4504_v56  ;;  %v4505_v19 = vpop.f32.mrb[36].mxu1  ;;  %v2922_v4 = vld [vmem:[%s7775_s5 + $0x110] sm:$0xff]  ;;  %v2897_v56 = vld [vmem:[%s7775_s5 + $0x48] sm:$0xff] }
 0x581   : > { %v4506_v5 = vpop.f32.mrb[37].mxu1 }
 0x582   : > { %v2369_v2 = vmax.f32 %v2351_v14, 0.0  ;;  %v4507_v32 = vadd.f32 %v4506_v5, %v4505_v19  ;;  %v4885_v14 = vpack.c.bf16 %v2897_v56, %v2896_v28  ;;  %v2523_v19 = vrot.slane %v6574_v39, 1  ;;  %v2914_v39 = vld [vmem:[%s7775_s5 + $0xd0] sm:$0xff] }
 0x583   : > { %v2524_v5 = vrot.slane %v6579_v12, 1  ;;  %v2915_v12 = vld [vmem:[%s7775_s5 + $0xd8] sm:$0xff] }
 0x584   : > { %v2356_v23 = vadd.f32 %v4507_v32, %v2355_v29  ;;  %4746 = vmatmul.mubr.msk.f32.gmra.mrb[28].mxu0 %vm377_vm4, %v2369_v2  ;;  %v2904_v29 = vld [vmem:[%s7775_s5 + $0x80] sm:$0xff]  ;;  %v2520_v2 = vrot.slane %v6585_v18, 1  ;;  %v2521_v32 = vrot.slane %v6587_v50, 1  ;;  %v2898_v18 = vld [vmem:[%s7775_s5 + $0x50] sm:$0xff]  ;;  %v4887_v50 = vpack.c.bf16 %v2915_v12, %v2914_v39 }
 0x585   : > { %v4508_v41 = vpop.f32.mrb[38].mxu1  ;;  %v4867_v51 = vpack.c.bf16 %v2905_v16, %v2904_v29  ;;  %v2916_v16 = vld [vmem:[%s7775_s5 + $0xe0] sm:$0xff]  ;;  %v2526_v39 = vrot.slane %v6644_v21, 1  ;;  %v2527_v12 = vrot.slane %v6646_v22, 1  ;;  %v2532_v21 = vrot.slane %v6702_v1, 1 }
 0x586   : > { %v2370_v46 = vmax.f32 %v2356_v23, 0.0  ;;  %v4509_v55 = vpop.f32.mrb[39].mxu1  ;;  %v2568_v23 = vld [vmem:[#allocation3] sm:$0xff]  ;;  %v4891_v33 = vpack.c.bf16 %v2917_v52, %v2916_v16  ;;  %v2533_v22 = vrot.slane %v6704_v40, 1 }
 0x587   : > { %v4510_v57 = vadd.f32 %v4509_v55, %v4508_v41  ;;  %4868 = vmatprep.subr.bf16.mxu1 %v4867_v51  ;;  %v2569_v41 = vld [vmem:[#allocation3 + $0x8] sm:$0x3]  ;;  %v2525_v55 = vsel %vm512_vm3, %v2523_v19, %v2524_v5  ;;  %v6946_v48 = vmax.f32 %v2568_v23, 0.0  ;;  %v2900_v51 = vld [vmem:[%s7775_s5 + $0x60] sm:$0xff] }
 0x588   : > { %4748 = vmatprep.mubr.msk.f32.mxu0 %vm377_vm4, %v2370_v46  ;;  %4870 = vmatpush3.bf16.msra.mxu1 %v4869_v53  ;;  %v2589_v59 = vmax.f32 %v2569_v41, 0.0  ;;  %v4893_v61 = vpack.c.bf16 %v2901_v42, %v2900_v51 }
 0x589   : > { %v2361_v25 = vadd.f32 %v4734_v20, %v4510_v57  ;;  %v4903_v20 = vpack.c.bf16 %v2923_v47, %v2922_v4  ;;  %4872 = vmatprep.subr.bf16.mxu1 %v4871_v63  ;;  %v2899_v4 = vld [vmem:[%s7775_s5 + $0x58] sm:$0xff] }
 0x58a   : > { %v4889_v47 = vpack.c.bf16 %v2899_v4, %v2898_v18  ;;  %v2649_v29 = vrot.slane %v2589_v59, 2  ;;  %v2625_v17 = vrot.slane %v2589_v59, 1  ;;  %v2530_v59 = vrot.slane %v6639_v15, 1 }
 0x58b   : > { %v2371_v36 = vmax.f32 %v2361_v25, 0.0  ;;  %4904 = vmatprep.subr.bf16.mxu0 %v4903_v20  ;;  %v2536_v15 = vrot.slane %v6697_v60, 1 }
 0x58c   : > { %4906 = vmatpush3.bf16.msra.mxu0 %v4903_v20  ;;  %4874 = vmatpush3.bf16.msra.mxu1 %v4873_v3  ;;  %v2648_v20 = vrot.slane %v6946_v48, 2 }
 0x58d   : > { %4749 = vmatmul.mubr.msk.f32.gmra.mrb[30].mxu0 %vm377_vm4, %v2371_v36  ;;  %4876 = vmatprep.subr.bf16.mxu1 %v4875_v37  ;;  %v2522_v36 = vsel %vm512_vm3, %v2520_v2, %v2521_v32  ;;  %v2624_v37 = vrot.slane %v6946_v48, 1 }
 0x58e   : > { %v2650_v63 = vsel %vm537_vm2, %v2648_v20, %v2649_v29  ;;  %v2528_v20 = vsel %vm512_vm3, %v2526_v39, %v2527_v12 }
 0x590   : > { %4878 = vmatpush3.bf16.msra.mxu1 %v4877_v8  ;;  %v2919_v8 = vld [vmem:[%s7775_s5 + $0xf8] sm:$0xff] }
 0x591   : > { %4880 = vmatprep.subr.bf16.mxu1 %v4879_v9  ;;  %v2902_v9 = vld [vmem:[%s7775_s5 + $0x70] sm:$0xff]  ;;  %v4895_v2 = vpack.c.bf16 %v2919_v8, %v2918_v26 }
 0x594   : > { %4882 = vmatpush3.bf16.msra.mxu1 %v4881_v30  ;;  %v2903_v30 = vld [vmem:[%s7775_s5 + $0x78] sm:$0xff] }
 0x595   : > { %4884 = vmatprep.subr.bf16.mxu1 %v4883_v35  ;;  %v4897_v32 = vpack.c.bf16 %v2903_v30, %v2902_v9 }
 0x598   : > { %4886 = vmatpush3.bf16.msra.mxu1 %v4885_v14 }
 0x599   : > { %4888 = vmatprep.subr.bf16.mxu1 %v4887_v50 }
 0x59c   : > { %4890 = vmatpush3.bf16.msra.mxu1 %v4889_v47 }
 0x59d   : > { %4892 = vmatprep.subr.bf16.mxu1 %v4891_v33 }
 0x5a0   : > { %4894 = vmatpush3.bf16.msra.mxu1 %v4893_v61 }
 0x5a1   : > { %4896 = vmatprep.subr.bf16.mxu1 %v4895_v2 }
 0x5a4   : > { %4898 = vmatpush3.bf16.msra.mxu1 %v4897_v32 }
 0x62e   : > { %v4741_v46 = vpop.f32.mrb[24].mxu0 }
 0x62f   : > { %v2553_v57 = vadd.f32 %v4741_v46, %v2525_v55  ;;  %v2465_v25 = vpop.f32.mrb[25].mxu0 }
 0x630   : > { %v2552_v38 = vadd.f32 %v2522_v36, %v2465_v25 }
 0x631   : > { %2561 = vst.msk [vmem:[#allocation3 + $0x21] sm:$0xff] %vm355_vm5, %v2553_v57  ;;  %v2626_v57 = vsel %vm512_vm3, %v2624_v37, %v2625_v17 }
 0x632   : > { %2560 = vst.msk [vmem:[#allocation3 + $0x11] sm:$0xff] %vm355_vm5, %v2552_v38  ;;  %v2529_v38 = vrot.slane %v6637_v62, 1  ;;  %v2535_v62 = vrot.slane %v6695_v54, 1 }
 0x634   : > { %v2531_v50 = vsel %vm512_vm3, %v2529_v38, %v2530_v59 }
 0x638   : > { %v2572_v53 = vld [vmem:[#allocation3 + $0x20] sm:$0xff]  ;;  %v2573_v27 = vld [vmem:[#allocation3 + $0x28] sm:$0x3] }
 0x639   : > { %v6976_v43 = vmax.f32 %v2572_v53, 0.0  ;;  %v2570_v24 = vld [vmem:[#allocation3 + $0x10] sm:$0xff]  ;;  %v2571_v31 = vld [vmem:[#allocation3 + $0x18] sm:$0x3]  ;;  %v2593_v3 = vmax.f32 %v2573_v27, 0.0  ;;  %v2534_v27 = vsel %vm512_vm3, %v2532_v21, %v2533_v22 }
 0x63a   : > { %v6979_v58 = vmax.f32 %v2570_v24, 0.0  ;;  %v2591_v7 = vmax.f32 %v2571_v31, 0.0 }
 0x63b   : > { %v5201_v44 = vpack.i.bf16 %v2650_v63, %v6976_v43  ;;  %v2631_v13 = vrot.slane %v2593_v3, 1  ;;  %v2654_v11 = vrot.slane %v6976_v43, 2  ;;  %v2655_v6 = vrot.slane %v2593_v3, 2 }
 0x63c   : > { %v2627_v35 = vrot.slane %v6979_v58, 1  ;;  %v2628_v28 = vrot.slane %v2591_v7, 1  ;;  %v2630_v56 = vrot.slane %v6976_v43, 1  ;;  %v2651_v14 = vrot.slane %v6979_v58, 2 }
 0x63d   : > { %5202 = vrot.lane.b32.xlu1 %v5201_v44, %s5620_s26  ;;  %v2656_v19 = vsel %vm537_vm2, %v2654_v11, %v2655_v6  ;;  %v2652_v5 = vrot.slane %v2591_v7, 2  ;;  %v2537_v63 = vsel %vm512_vm3, %v2535_v62, %v2536_v15  ;;  %v2541_v6 = vrot.slane %v6735_v34, 1 }
 0x63e   : > { %v7001_v23 = vsel %vm512_vm3, %v2627_v35, %v2628_v28  ;;  %4759 = vmatprep.mubr.msk.f32.mxu0 %vm355_vm5, %v2656_v19  ;;  %v7005_v41 = vsel %vm512_vm3, %v2630_v56, %v2631_v13  ;;  %v2542_v56 = vrot.slane %v6737_v10, 1 }
 0x63f   : > { %v5216_v46 = vpack.i.bf16 %v7001_v23, %v2656_v19  ;;  %v5206_v55 = vpack.i.bf16 %v6979_v58, %v7005_v41  ;;  %v2653_v25 = vsel %vm537_vm2, %v2651_v14, %v2652_v5  ;;  %v2539_v5 = vrot.slane %v6744_v49, 1 }
 0x640   : > { %v5211_v36 = vpack.i.bf16 %v2626_v57, %v2653_v25  ;;  %v2543_v32 = vsel %vm512_vm3, %v2541_v6, %v2542_v56  ;;  %v2587_v56 = vld [vmem:[#allocation3 + $0x98] sm:$0x3] }
 0x641   : > { %5207 = vrot.lane.b32.xlu0 %v5206_v55, %s5621_s27  ;;  %5217 = vrot.lane.b32.xlu1 %v5216_v46, %s5619_s14 }
 0x645   : > { %5212 = vrot.lane.b32.xlu0 %v5211_v36, %s5619_s14 }
 0x64b   : > { %v4744_v18 = vpop.f32.mrb[26].mxu0 }
 0x64c   : > { %v2555_v4 = vadd.f32 %v4744_v18, %v2531_v50  ;;  %v2475_v47 = vpop.f32.mrb[27].mxu0 }
 0x64d   : > { %v2554_v29 = vadd.f32 %v2528_v20, %v2475_v47 }
 0x64e   : > { %2563 = vst.msk [vmem:[#allocation3 + $0x41] sm:$0xff] %vm355_vm5, %v2555_v4 }
 0x64f   : > { %2562 = vst.msk [vmem:[#allocation3 + $0x31] sm:$0xff] %vm355_vm5, %v2554_v29 }
 0x655   : > { %v2576_v16 = vld [vmem:[#allocation3 + $0x40] sm:$0xff]  ;;  %v2577_v52 = vld [vmem:[#allocation3 + $0x48] sm:$0x3] }
 0x656   : > { %v7027_v51 = vmax.f32 %v2576_v16, 0.0  ;;  %v2574_v33 = vld [vmem:[#allocation3 + $0x30] sm:$0xff]  ;;  %v2575_v42 = vld [vmem:[#allocation3 + $0x38] sm:$0x3]  ;;  %v2597_v61 = vmax.f32 %v2577_v52, 0.0 }
 0x657   : > { %v4747_v53 = vpop.f32.mrb[28].mxu0  ;;  %v7031_v24 = vmax.f32 %v2574_v33, 0.0  ;;  %v2595_v54 = vmax.f32 %v2575_v42, 0.0 }
 0x658   : > { %v2557_v60 = vadd.f32 %v4747_v53, %v2537_v63  ;;  %v2485_v31 = vpop.f32.mrb[29].mxu0  ;;  %v5221_v1 = vpack.i.bf16 %v2656_v19, %v7027_v51  ;;  %v2637_v40 = vrot.slane %v2597_v61, 1  ;;  %v2660_v3 = vrot.slane %v7027_v51, 2 }
 0x659   : > { %v2556_v37 = vadd.f32 %v2534_v27, %v2485_v31  ;;  %v5226_v7 = vpack.i.bf16 %v2653_v25, %v7031_v24  ;;  %v2657_v17 = vrot.slane %v7031_v24, 2  ;;  %v2658_v26 = vrot.slane %v2595_v54, 2 }
 0x65a   : > { %2565 = vst.msk [vmem:[#allocation3 + $0x61] sm:$0xff] %vm355_vm5, %v2557_v60  ;;  %5222 = vrot.lane.b32.xlu1 %v5221_v1, %s5620_s26  ;;  %v2633_v8 = vrot.slane %v7031_v24, 1  ;;  %v2634_v9 = vrot.slane %v2595_v54, 1  ;;  %v2661_v44 = vrot.slane %v2597_v61, 2  ;;  %v2636_v13 = vrot.slane %v7027_v51, 1 }
 0x65b   : > { %2564 = vst.msk [vmem:[#allocation3 + $0x51] sm:$0xff] %vm355_vm5, %v2556_v37  ;;  %5227 = vrot.lane.b32.xlu0 %v5226_v7, %s5620_s26  ;;  %v2659_v11 = vsel %vm537_vm2, %v2657_v17, %v2658_v26  ;;  %v2538_v19 = vrot.slane %v6739_v45, 1 }
 0x65c   : > { %4760 = vmatmul.mubr.msk.f32.vlgmr.msra.gmra.mrb[32].mxu0 %vm355_vm5, %v2659_v11  ;;  %v7047_v30 = vsel %vm512_vm3, %v2633_v8, %v2634_v9  ;;  %v2662_v35 = vsel %vm537_vm2, %v2660_v3, %v2661_v44  ;;  %v7051_v28 = vsel %vm512_vm3, %v2636_v13, %v2637_v40  ;;  %v5241_v36 = vpack.i.bf16 %v7005_v41, %v2659_v11  ;;  %v2586_v44 = vld [vmem:[#allocation3 + $0x90] sm:$0xff] }
 0x65d   : > { %4762 = vmatprep.mubr.msk.f32.mxu0 %vm355_vm5, %v2662_v35  ;;  %v5236_v14 = vpack.i.bf16 %v6976_v43, %v7047_v30  ;;  %v5231_v34 = vpack.i.bf16 %v7031_v24, %v7051_v28  ;;  %v5246_v10 = vpack.i.bf16 %v7047_v30, %v2662_v35  ;;  %v2540_v25 = vsel %vm512_vm3, %v2538_v19, %v2539_v5 }
 0x65e   : > { %v2606_v5 = vmax.f32 %v2586_v44, 0.0 }
 0x65f   : > { %5237 = vrot.lane.b32.xlu1 %v5236_v14, %s5621_s27  ;;  %5232 = vrot.lane.b32.xlu0 %v5231_v34, %s5621_s27 }
 0x660   : > { %v4750_v2 = vpop.f32.mrb[30].mxu0 }
 0x661   : > { %v2580_v46 = vld [vmem:[#allocation3 + $0x60] sm:$0xff]  ;;  %v2559_v55 = vadd.f32 %v4750_v2, %v2543_v32  ;;  %v2495_v57 = vpop.f32.mrb[31].mxu0  ;;  %v2581_v38 = vld [vmem:[#allocation3 + $0x68] sm:$0x3] }
 0x662   : > { %v7067_v45 = vmax.f32 %v2580_v46, 0.0  ;;  %v2558_v49 = vadd.f32 %v2540_v25, %v2495_v57  ;;  %v2578_v59 = vld [vmem:[#allocation3 + $0x50] sm:$0xff]  ;;  %v2579_v39 = vld [vmem:[#allocation3 + $0x58] sm:$0x3]  ;;  %v2601_v12 = vmax.f32 %v2581_v38, 0.0 }
 0x663   : > { %2567 = vst.msk [vmem:[#allocation3 + $0x81] sm:$0xff] %vm355_vm5, %v2559_v55  ;;  %5247 = vrot.lane.b32.xlu1 %v5246_v10, %s5619_s14  ;;  %5242 = vrot.lane.b32.xlu0 %v5241_v36, %s5619_s14  ;;  %v7072_v18 = vmax.f32 %v2578_v59, 0.0  ;;  %v2599_v50 = vmax.f32 %v2579_v39, 0.0  ;;  %v2607_v55 = vmax.f32 %v2587_v56, 0.0  ;;  %v2690_v36 = vrot.slane %v2606_v5, 1 }
 0x664   : > { %v5251_v4 = vpack.i.bf16 %v2662_v35, %v7067_v45  ;;  %2566 = vst.msk [vmem:[#allocation3 + $0x71] sm:$0xff] %vm355_vm5, %v2558_v49  ;;  %v2643_v47 = vrot.slane %v2601_v12, 1  ;;  %v2666_v20 = vrot.slane %v7067_v45, 2  ;;  %v2667_v29 = vrot.slane %v2601_v12, 2 }
 0x665   : > { %v5256_v62 = vpack.i.bf16 %v2659_v11, %v7072_v18  ;;  %v2640_v15 = vrot.slane %v2599_v50, 1  ;;  %v2663_v21 = vrot.slane %v7072_v18, 2  ;;  %v2664_v22 = vrot.slane %v2599_v50, 2 }
 0x666   : > { %v2639_v16 = vrot.slane %v7072_v18, 1  ;;  %v2642_v52 = vrot.slane %v7067_v45, 1  ;;  %v2668_v61 = vsel %vm537_vm2, %v2666_v20, %v2667_v29  ;;  %v2691_v49 = vrot.slane %v2607_v55, 1 }
 0x667   : > { %5252 = vrot.lane.b32.xlu1 %v5251_v4, %s5620_s26  ;;  %5257 = vrot.lane.b32.xlu0 %v5256_v62, %s5620_s26  ;;  %v2665_v33 = vsel %vm537_vm2, %v2663_v21, %v2664_v22  ;;  %v2693_v59 = vrot.slane %v2606_v5, 2  ;;  %v2694_v39 = vrot.slane %v2607_v55, 2 }
 0x668   : > { %4763 = vmatmul.mubr.msk.f32.gmra.mrb[34].mxu0 %vm355_vm5, %v2665_v33  ;;  %v7086_v42 = vsel %vm512_vm3, %v2639_v16, %v2640_v15  ;;  %v7090_v53 = vsel %vm512_vm3, %v2642_v52, %v2643_v47  ;;  %v5271_v17 = vpack.i.bf16 %v7051_v28, %v2665_v33  ;;  %v2692_v47 = vsel %vm512_vm3, %v2690_v36, %v2691_v49 }
 0x669   : > { %4765 = vmatprep.mubr.msk.f32.mxu0 %vm355_vm5, %v2668_v61  ;;  %v5266_v63 = vpack.i.bf16 %v7027_v51, %v7086_v42  ;;  %v5261_v27 = vpack.i.bf16 %v7072_v18, %v7090_v53  ;;  %v5276_v26 = vpack.i.bf16 %v7086_v42, %v2668_v61  ;;  %v2695_v12 = vsel %vm537_vm2, %v2693_v59, %v2694_v39 }
 0x66a   : > { %v2584_v54 = vld [vmem:[#allocation3 + $0x80] sm:$0xff]  ;;  %v2585_v60 = vld [vmem:[#allocation3 + $0x88] sm:$0x3] }
 0x66b   : > { %v2582_v31 = vld [vmem:[#allocation3 + $0x70] sm:$0xff]  ;;  %v2604_v1 = vmax.f32 %v2584_v54, 0.0  ;;  %5267 = vrot.lane.b32.xlu1 %v5266_v63, %s5621_s27  ;;  %5262 = vrot.lane.b32.xlu0 %v5261_v27, %s5621_s27  ;;  %v2583_v40 = vld [vmem:[#allocation3 + $0x78] sm:$0x3]  ;;  %v2605_v3 = vmax.f32 %v2585_v60, 0.0 }
 0x66c   : > { %v7099_v37 = vmax.f32 %v2582_v31, 0.0  ;;  %v2603_v7 = vmax.f32 %v2583_v40, 0.0 }
 0x66d   : > { %v2685_v8 = vrot.slane %v2604_v1, 2  ;;  %v2686_v9 = vrot.slane %v2605_v3, 2  ;;  %v5281_v19 = vpack.i.bf16 %v2668_v61, %v2604_v1  ;;  %v2675_v10 = vrot.slane %v2605_v3, 1 }
 0x66e   : > { %v2669_v13 = vrot.slane %v7099_v37, 2  ;;  %v2670_v11 = vrot.slane %v2603_v7, 2  ;;  %v2645_v6 = vrot.slane %v7099_v37, 1  ;;  %v2646_v35 = vrot.slane %v2603_v7, 1 }
 0x66f   : > { %5277 = vrot.lane.b32.xlu1 %v5276_v26, %s5619_s14  ;;  %5272 = vrot.lane.b32.xlu0 %v5271_v17, %s5619_s14  ;;  %v5286_v34 = vpack.i.bf16 %v2665_v33, %v7099_v37  ;;  %v2687_v2 = vsel %vm537_vm2, %v2685_v8, %v2686_v9  ;;  %v2674_v46 = vrot.slane %v2604_v1, 1  ;;  %v5316_v29 = vpack.i.bf16 %v2604_v1, %v2692_v47 }
 0x670   : > { %v2671_v14 = vsel %vm537_vm2, %v2669_v13, %v2670_v11  ;;  %v7112_v32 = vsel %vm512_vm3, %v2645_v6, %v2646_v35 }
 0x671   : > { %4766 = vmatmul.mubr.msk.f32.gmra.mrb[36].mxu0 %vm355_vm5, %v2671_v14  ;;  %v5296_v57 = vpack.i.bf16 %v7090_v53, %v2671_v14  ;;  %v5291_v25 = vpack.i.bf16 %v7067_v45, %v7112_v32  ;;  %v7121_v38 = vsel %vm512_vm3, %v2674_v46, %v2675_v10  ;;  %v5306_v50 = vpack.i.bf16 %v7112_v32, %v2687_v2 }
 0x672   : > { %4768 = vmatprep.mubr.msk.f32.mxu0 %vm355_vm5, %v2687_v2  ;;  %v5301_v4 = vpack.i.bf16 %v7099_v37, %v7121_v38  ;;  %v5311_v20 = vpack.i.bf16 %v2671_v14, %v2606_v5 }
 0x673   : > { %5282 = vrot.lane.b32.xlu1 %v5281_v19, %s5620_s26  ;;  %5287 = vrot.lane.b32.xlu0 %v5286_v34, %s5620_s26 }
 0x675   : > { %4769 = vmatmul.mubr.msk.f32.gmra.mrb[38].mxu0 %vm355_vm5, %v2695_v12 }
 0x677   : > { %5292 = vrot.lane.b32.xlu1 %v5291_v25, %s5621_s27  ;;  %5297 = vrot.lane.b32.xlu0 %v5296_v57, %s5619_s14 }
 0x67b   : > { %5307 = vrot.lane.b32.xlu1 %v5306_v50, %s5619_s14  ;;  %5302 = vrot.lane.b32.xlu0 %v5301_v4, %s5621_s27 }
 0x67f   : > { %5317 = vrot.lane.b32.xlu1 %v5316_v29, %s5621_s27  ;;  %5312 = vrot.lane.b32.xlu0 %v5311_v20, %s5620_s26 }
 0x6af   : > { %v5203_v15 = vpop.permute.xlu1 %5202 }
 0x6b0   : > { %v5205_v52 = vunpack.i.h.bf16 %v5203_v15  ;;  %v5204_v33 = vunpack.i.l.bf16 %v5203_v15 }
 0x6b3   : > { %v5208_v62 = vpop.permute.xlu0 %5207  ;;  %v5218_v3 = vpop.permute.xlu1 %5217 }
 0x6b4   : > { %v5210_v61 = vunpack.i.h.bf16 %v5208_v62  ;;  %v5209_v63 = vunpack.i.l.bf16 %v5208_v62  ;;  %v5220_v26 = vunpack.i.h.bf16 %v5218_v3  ;;  %v5219_v8 = vunpack.i.l.bf16 %v5218_v3 }
 0x6b6   : > { %v2865_v6 = vsel %vm355_vm5, %v7005_v41, %v5219_v8  ;;  %v2841_v35 = vsel %vm355_vm5, %v6979_v58, %v5220_v26 }
 0x6b7   : > { %v5213_v21 = vpop.permute.xlu0 %5212 }
 0x6b8   : > { %v5215_v22 = vunpack.i.h.bf16 %v5213_v21  ;;  %v5214_v16 = vunpack.i.l.bf16 %v5213_v21 }
 0x6ba   : > { %v2840_v27 = vsel %vm355_vm5, %v6946_v48, %v5215_v22  ;;  %v2864_v54 = vsel %vm355_vm5, %v7001_v23, %v5214_v16 }
 0x6bb   : > { %v2872_v60 = vsel %vm1274_vm14, %v2864_v54, %v5204_v33  ;;  %v2848_v31 = vsel %vm1274_vm14, %v2840_v27, %v5205_v52 }
 0x6bc   : > { %v2880_v1 = vsel %vm1283_vm15, %v2872_v60, %v5209_v63  ;;  %v2856_v40 = vsel %vm1283_vm15, %v2848_v31, %v5210_v61 }
 0x6bd   : > { %3011 = vmatprep.mubr.f32.mxu1 %v2880_v1 }
 0x6be   : > { %3012 = vmatmul.mubr.f32.vlgmr.msra.gmra.mrb[40].mxu1 %v2856_v40 }
 0x6cc   : > { %v5223_v7 = vpop.permute.xlu1 %5222 }
 0x6cd   : > { %v5228_v17 = vpop.permute.xlu0 %5227  ;;  %v5225_v55 = vunpack.i.h.bf16 %v5223_v7  ;;  %v5224_v57 = vunpack.i.l.bf16 %v5223_v7 }
 0x6ce   : > { %v5230_v9 = vunpack.i.h.bf16 %v5228_v17  ;;  %v5229_v48 = vunpack.i.l.bf16 %v5228_v17 }
 0x6d0   : > { %v2873_v56 = vsel %vm1274_vm14, %v2865_v6, %v5229_v48  ;;  %v2849_v14 = vsel %vm1274_vm14, %v2841_v35, %v5230_v9 }
 0x6d1   : > { %v5238_v44 = vpop.permute.xlu1 %5237  ;;  %v5233_v13 = vpop.permute.xlu0 %5232 }
 0x6d2   : > { %v5240_v23 = vunpack.i.h.bf16 %v5238_v44  ;;  %v5239_v11 = vunpack.i.l.bf16 %v5238_v44  ;;  %v5235_v25 = vunpack.i.h.bf16 %v5233_v13  ;;  %v5234_v36 = vunpack.i.l.bf16 %v5233_v13 }
 0x6d4   : > { %v2881_v34 = vsel %vm1283_vm15, %v2873_v56, %v5239_v11  ;;  %v2857_v19 = vsel %vm1283_vm15, %v2849_v14, %v5240_v23 }
 0x6d5   : > { %v5248_v5 = vpop.permute.xlu1 %5247  ;;  %3016 = vmatprep.mubr.f32.mxu1 %v2881_v34  ;;  %v5243_v2 = vpop.permute.xlu0 %5242 }
 0x6d6   : > { %v5245_v10 = vunpack.i.h.bf16 %v5243_v2  ;;  %v5244_v46 = vunpack.i.l.bf16 %v5243_v2  ;;  %3017 = vmatmul.mubr.f32.gmra.mrb[42].mxu1 %v2857_v19  ;;  %v5250_v50 = vunpack.i.h.bf16 %v5248_v5  ;;  %v5249_v4 = vunpack.i.l.bf16 %v5248_v5 }
 0x6d8   : > { %v2866_v41 = vsel %vm355_vm5, %v7047_v30, %v5244_v46  ;;  %v2842_v58 = vsel %vm355_vm5, %v6976_v43, %v5245_v10  ;;  %v2867_v22 = vsel %vm355_vm5, %v7051_v28, %v5249_v4  ;;  %v2843_v16 = vsel %vm355_vm5, %v7031_v24, %v5250_v50 }
 0x6d9   : > { %v5253_v49 = vpop.permute.xlu1 %5252  ;;  %v5258_v59 = vpop.permute.xlu0 %5257  ;;  %v2874_v39 = vsel %vm1274_vm14, %v2866_v41, %v5224_v57  ;;  %v2850_v12 = vsel %vm1274_vm14, %v2842_v58, %v5225_v55 }
 0x6da   : > { %v5260_v47 = vunpack.i.h.bf16 %v5258_v59  ;;  %v5259_v20 = vunpack.i.l.bf16 %v5258_v59  ;;  %v2882_v29 = vsel %vm1283_vm15, %v2874_v39, %v5234_v36  ;;  %v2858_v62 = vsel %vm1283_vm15, %v2850_v12, %v5235_v25 }
 0x6db   : > { %3021 = vmatprep.mubr.f32.mxu1 %v2882_v29  ;;  %v5255_v1 = vunpack.i.h.bf16 %v5253_v49  ;;  %v5254_v40 = vunpack.i.l.bf16 %v5253_v49 }
 0x6dc   : > { %3022 = vmatmul.mubr.f32.gmra.mrb[44].mxu1 %v2858_v62  ;;  %v2875_v52 = vsel %vm1274_vm14, %v2867_v22, %v5259_v20  ;;  %v2851_v33 = vsel %vm1274_vm14, %v2843_v16, %v5260_v47 }
 0x6dd   : > { %v5268_v30 = vpop.permute.xlu1 %5267  ;;  %v5263_v43 = vpop.permute.xlu0 %5262 }
 0x6de   : > { %v5270_v15 = vunpack.i.h.bf16 %v5268_v30  ;;  %v5269_v21 = vunpack.i.l.bf16 %v5268_v30  ;;  %v5265_v28 = vunpack.i.h.bf16 %v5263_v43  ;;  %v5264_v3 = vunpack.i.l.bf16 %v5263_v43 }
 0x6e0   : > { %v2883_v61 = vsel %vm1283_vm15, %v2875_v52, %v5269_v21  ;;  %v2859_v63 = vsel %vm1283_vm15, %v2851_v33, %v5270_v15 }
 0x6e1   : > { %v5278_v27 = vpop.permute.xlu1 %5277  ;;  %3026 = vmatprep.mubr.f32.mxu1 %v2883_v61  ;;  %v5273_v54 = vpop.permute.xlu0 %5272 }
 0x6e2   : > { %v5275_v60 = vunpack.i.h.bf16 %v5273_v54  ;;  %v5274_v31 = vunpack.i.l.bf16 %v5273_v54  ;;  %3027 = vmatmul.mubr.f32.gmra.mrb[46].mxu1 %v2859_v63  ;;  %v5280_v17 = vunpack.i.h.bf16 %v5278_v27  ;;  %v5279_v26 = vunpack.i.l.bf16 %v5278_v27 }
 0x6e4   : > { %v2868_v24 = vsel %vm355_vm5, %v7086_v42, %v5274_v31  ;;  %v2844_v7 = vsel %vm355_vm5, %v7027_v51, %v5275_v60  ;;  %v2869_v51 = vsel %vm355_vm5, %v7090_v53, %v5279_v26  ;;  %v2845_v56 = vsel %vm355_vm5, %v7072_v18, %v5280_v17 }
 0x6e5   : > { %v5283_v8 = vpop.permute.xlu1 %5282  ;;  %v5288_v9 = vpop.permute.xlu0 %5287  ;;  %v2876_v48 = vsel %vm1274_vm14, %v2868_v24, %v5254_v40  ;;  %v2852_v44 = vsel %vm1274_vm14, %v2844_v7, %v5255_v1  ;;  %v7282_v1 = vld [vmem:[%s7776_s6] ss:$0 sm:$0xff] }
 0x6e6   : > { %v5290_v13 = vunpack.i.h.bf16 %v5288_v9  ;;  %v5289_v23 = vunpack.i.l.bf16 %v5288_v9  ;;  %v2884_v11 = vsel %vm1283_vm15, %v2876_v48, %v5264_v3  ;;  %v2860_v6 = vsel %vm1283_vm15, %v2852_v44, %v5265_v28 }
 0x6e7   : > { %3031 = vmatprep.mubr.f32.mxu1 %v2884_v11  ;;  %v5285_v41 = vunpack.i.h.bf16 %v5283_v8  ;;  %v5284_v18 = vunpack.i.l.bf16 %v5283_v8 }
 0x6e8   : > { %3032 = vmatmul.mubr.f32.gmra.mrb[48].mxu1 %v2860_v6  ;;  %v2877_v2 = vsel %vm1274_vm14, %v2869_v51, %v5289_v23  ;;  %v2853_v10 = vsel %vm1274_vm14, %v2845_v56, %v5290_v13 }
 0x6e9   : > { %v5293_v42 = vpop.permute.xlu1 %5292  ;;  %v5298_v35 = vpop.permute.xlu0 %5297 }
 0x6ea   : > { %v5295_v14 = vunpack.i.h.bf16 %v5293_v42  ;;  %v5294_v34 = vunpack.i.l.bf16 %v5293_v42  ;;  %v5300_v19 = vunpack.i.h.bf16 %v5298_v35  ;;  %v5299_v5 = vunpack.i.l.bf16 %v5298_v35 }
 0x6ec   : > { %v2885_v46 = vsel %vm1283_vm15, %v2877_v2, %v5294_v34  ;;  %v2861_v55 = vsel %vm1283_vm15, %v2853_v10, %v5295_v14  ;;  %v2870_v57 = vsel %vm355_vm5, %v7112_v32, %v5299_v5  ;;  %v2846_v53 = vsel %vm355_vm5, %v7067_v45, %v5300_v19  ;;  %v3317_v34 = vld [vmem:[#allocation4 + $0x140] sm:$0xff]  ;;  %v3318_v2 = vld [vmem:[#allocation4 + $0x148] sm:$0x3] }
 0x6ed   : > { %v5308_v58 = vpop.permute.xlu1 %5307  ;;  %3036 = vmatprep.mubr.f32.mxu1 %v2885_v46  ;;  %v5303_v25 = vpop.permute.xlu0 %5302  ;;  %v2878_v12 = vsel %vm1274_vm14, %v2870_v57, %v5284_v18  ;;  %v2854_v50 = vsel %vm1274_vm14, %v2846_v53, %v5285_v41  ;;  %v3588_v18 = vrot.slane %v3318_v2, 2 }
 0x6ee   : > { %v5305_v36 = vunpack.i.h.bf16 %v5303_v25  ;;  %v5304_v49 = vunpack.i.l.bf16 %v5303_v25  ;;  %3037 = vmatmul.mubr.f32.gmra.mrb[50].mxu1 %v2861_v55  ;;  %v5310_v59 = vunpack.i.h.bf16 %v5308_v58  ;;  %v5309_v39 = vunpack.i.l.bf16 %v5308_v58 }
 0x6ef   : > { %v3587_v55 = vrot.slane %v3317_v34, 2 }
 0x6f0   : > { %v2886_v4 = vsel %vm1283_vm15, %v2878_v12, %v5304_v49  ;;  %v2862_v32 = vsel %vm1283_vm15, %v2854_v50, %v5305_v36  ;;  %v2871_v43 = vsel %vm355_vm5, %v7121_v38, %v5309_v39  ;;  %v2847_v15 = vsel %vm355_vm5, %v7099_v37, %v5310_v59 }
 0x6f1   : > { %v5318_v47 = vpop.permute.xlu1 %5317  ;;  %v5313_v45 = vpop.permute.xlu0 %5312  ;;  %3041 = vmatprep.mubr.f32.mxu1 %v2886_v4  ;;  %v3589_v39 = vsel %vm537_vm2, %v3587_v55, %v3588_v18 }
 0x6f2   : > { %v5315_v20 = vunpack.i.h.bf16 %v5313_v45  ;;  %v5314_v29 = vunpack.i.l.bf16 %v5313_v45  ;;  %3042 = vmatmul.mubr.f32.gmra.mrb[52].mxu1 %v2862_v32  ;;  %v5320_v62 = vunpack.i.h.bf16 %v5318_v47  ;;  %v5319_v30 = vunpack.i.l.bf16 %v5318_v47 }
 0x6f4   : > { %v2879_v21 = vsel %vm1274_vm14, %v2871_v43, %v5314_v29  ;;  %v2855_v22 = vsel %vm1274_vm14, %v2847_v15, %v5315_v20 }
 0x6f5   : > { %v2887_v16 = vsel %vm1283_vm15, %v2879_v21, %v5319_v30  ;;  %v2863_v52 = vsel %vm1283_vm15, %v2855_v22, %v5320_v62 }
 0x6f6   : > { %3046 = vmatprep.mubr.f32.mxu1 %v2887_v16 }
 0x6f7   : > { %3047 = vmatmul.mubr.f32.gmra.mrb[54].mxu1 %v2863_v52 }
 0x72f   : > { %v4761_v37 = vpop.f32.mrb[32].mxu0 }
 0x730   : > { %v3118_v38 = vpop.f32.mrb[33].mxu0 }
 0x73b   : > { %v4764_v33 = vpop.f32.mrb[34].mxu0 }
 0x73c   : > { %v3128_v61 = vpop.f32.mrb[35].mxu0 }
 0x744   : > { %v7271_v63 = vpop.f32.mrb[36].mxu0 }
 0x745   : > { %v7273_v27 = vpop.f32.mrb[37].mxu0 }
 0x748   : > { %v7275_v54 = vpop.f32.mrb[38].mxu0 }
 0x749   : > { %v7277_v60 = vpop.f32.mrb[39].mxu0 }
 0x791   : > { %v4565_v31 = vpop.f32.mrb[40].mxu1 }
 0x792   : > { %v4566_v40 = vpop.f32.mrb[41].mxu1 }
 0x793   : > { %v4567_v0 = vadd.f32 %v4566_v40, %v4565_v31 }
 0x795   : > { %v3014_v28 = vadd.f32 %v4567_v0, %v7282_v1 }
 0x797   : > { %v3119_v3 = vadd.f32 %v3118_v38, %v3014_v28  ;;  %v3335_v28 = vld [vmem:[#allocation4 + $0x1e0] sm:$0xff] }
 0x799   : > { %v3157_v24 = vmax.f32 %v3119_v3, 0.0  ;;  %v3336_v3 = vld [vmem:[#allocation4 + $0x1e8] sm:$0x3] }
 0x79b   : > { %3166 = vst.msk [vmem:[#allocation4 + $0x11] sm:$0xff] %vm377_vm4, %v3157_v24  ;;  %3182 = vrot.lane.b32.xlu0 %v3157_v24, %s5622_s28  ;;  %3248 = vrot.lane.b32.xlu1 %v3157_v24, %s5623_s29 }
 0x79f   : > { %3215 = vrot.lane.b32.xlu0 %v3157_v24, %s5621_s27  ;;  %v4054_v24 = vld [vmem:[%s7777_s7] sm:$0xff] }
 0x7a2   : > { %v3281_v7 = vld [vmem:[#allocation4 + $0x10] sm:$0xff]  ;;  %v3282_v17 = vld [vmem:[#allocation4 + $0x18] sm:$0x3] }
 0x7a3   : > { %v3369_v26 = vrot.slane %v3281_v7, 1  ;;  %v3370_v8 = vrot.slane %v3282_v17, 1  ;;  %v3441_v53 = vrot.slane %v3281_v7, 2  ;;  %v3442_v41 = vrot.slane %v3282_v17, 2  ;;  %v4055_v7 = vld [vmem:[%s7777_s7 + $0x8] sm:$0xff] }
 0x7a4   : > { %v4909_v17 = vpack.c.bf16 %v4055_v7, %v4054_v24  ;;  %v4082_v24 = vld [vmem:[%s7777_s7 + $0xe0] sm:$0xff]  ;;  %v4083_v7 = vld [vmem:[%s7777_s7 + $0xe8] sm:$0xff] }
 0x7a5   : > { %v7290_v9 = vsel %vm512_vm3, %v3369_v26, %v3370_v8  ;;  %v3443_v59 = vsel %vm537_vm2, %v3441_v53, %v3442_v41  ;;  %v4072_v8 = vld [vmem:[%s7777_s7 + $0x90] sm:$0xff] }
 0x7a6   : > { %v5321_v4 = vpack.i.bf16 %v3443_v59, %v3589_v39 }
 0x7a9   : > { %v4568_v48 = vpop.f32.mrb[42].mxu1 }
 0x7aa   : > { %v4569_v44 = vpop.f32.mrb[43].mxu1 }
 0x7ab   : > { %v4570_v13 = vadd.f32 %v4569_v44, %v4568_v48  ;;  %v4073_v48 = vld [vmem:[%s7777_s7 + $0x98] sm:$0xff]  ;;  %v3584_v44 = vrot.slane %v3335_v28, 1 }
 0x7ad   : > { %v3019_v23 = vadd.f32 %v4570_v13, %v7282_v1  ;;  %v3585_v13 = vrot.slane %v3336_v3, 1 }
 0x7af   : > { %v3124_v11 = vadd.f32 %v4761_v37, %v3019_v23  ;;  %v4571_v6 = vpop.f32.mrb[44].mxu1  ;;  %v4911_v23 = vpack.c.bf16 %v4073_v48, %v4072_v8  ;;  %v3586_v55 = vsel %vm512_vm3, %v3584_v44, %v3585_v13  ;;  %v4067_v8 = vld [vmem:[%s7777_s7 + $0x68] sm:$0xff] }
 0x7b0   : > { %v4572_v35 = vpop.f32.mrb[45].mxu1 }
 0x7b1   : > { %v3158_v42 = vmax.f32 %v3124_v11, 0.0  ;;  %v4573_v51 = vadd.f32 %v4572_v35, %v4571_v6  ;;  %v4056_v6 = vld [vmem:[%s7777_s7 + $0x10] sm:$0xff] }
 0x7b3   : > { %3167 = vst.msk [vmem:[#allocation4 + $0x21] sm:$0xff] %vm377_vm4, %v3158_v42  ;;  %3250 = vrot.lane.b32.xlu0 %v3158_v42, %s5623_s29  ;;  %3184 = vrot.lane.b32.xlu1 %v3158_v42, %s5622_s28  ;;  %v3024_v56 = vadd.f32 %v4573_v51, %v7282_v1 }
 0x7b5   : > { %v4574_v14 = vpop.f32.mrb[46].mxu1  ;;  %v3129_v19 = vadd.f32 %v3128_v61, %v3024_v56  ;;  %v4074_v56 = vld [vmem:[%s7777_s7 + $0xa0] sm:$0xff] }
 0x7b6   : > { %v4575_v5 = vpop.f32.mrb[47].mxu1 }
 0x7b7   : > { %v4576_v10 = vadd.f32 %v4575_v5, %v4574_v14  ;;  %3217 = vrot.lane.b32.xlu1 %v3158_v42, %s5621_s27  ;;  %v3159_v46 = vmax.f32 %v3129_v19, 0.0  ;;  %v4057_v42 = vld [vmem:[%s7777_s7 + $0x18] sm:$0xff]  ;;  %v4075_v14 = vld [vmem:[%s7777_s7 + $0xa8] sm:$0xff] }
 0x7b8   : > { %v4913_v51 = vpack.c.bf16 %v4057_v42, %v4056_v6  ;;  %v4915_v5 = vpack.c.bf16 %v4075_v14, %v4074_v56  ;;  %v4084_v42 = vld [vmem:[%s7777_s7 + $0xf0] sm:$0xff]  ;;  %v4069_v14 = vld [vmem:[%s7777_s7 + $0x78] sm:$0xff] }
 0x7b9   : > { %v3029_v57 = vadd.f32 %v4576_v10, %v7282_v1  ;;  %3168 = vst.msk [vmem:[#allocation4 + $0x31] sm:$0xff] %vm377_vm4, %v3159_v46  ;;  %3186 = vrot.lane.b32.xlu0 %v3159_v46, %s5622_s28 }
 0x7ba   : > { %v3283_v11 = vld [vmem:[#allocation4 + $0x20] sm:$0xff]  ;;  %v3284_v35 = vld [vmem:[#allocation4 + $0x28] sm:$0x3] }
 0x7bb   : > { %v3134_v58 = vadd.f32 %v4764_v33, %v3029_v57  ;;  %3252 = vrot.lane.b32.xlu1 %v3159_v46, %s5623_s29  ;;  %v4577_v25 = vpop.f32.mrb[48].mxu1  ;;  %v4058_v57 = vld [vmem:[%s7777_s7 + $0x20] sm:$0xff]  ;;  %v3372_v53 = vrot.slane %v3283_v11, 1  ;;  %v3373_v41 = vrot.slane %v3284_v35, 1  ;;  %v3444_v18 = vrot.slane %v3283_v11, 2 }
 0x7bc   : > { %v4578_v49 = vpop.f32.mrb[49].mxu1  ;;  %v3445_v59 = vrot.slane %v3284_v35, 2  ;;  %v4085_v35 = vld [vmem:[%s7777_s7 + $0xf8] sm:$0xff] }
 0x7bd   : > { %v3160_v36 = vmax.f32 %v3134_v58, 0.0  ;;  %v4579_v12 = vadd.f32 %v4578_v49, %v4577_v25  ;;  %3219 = vrot.lane.b32.xlu0 %v3159_v46, %s5621_s27  ;;  %v4059_v58 = vld [vmem:[%s7777_s7 + $0x28] sm:$0xff]  ;;  %v4076_v25 = vld [vmem:[%s7777_s7 + $0xb0] sm:$0xff]  ;;  %v4935_v56 = vpack.c.bf16 %v4085_v35, %v4084_v42 }
 0x7be   : > { %v4917_v39 = vpack.c.bf16 %v4059_v58, %v4058_v57 }
 0x7bf   : > { %3169 = vst.msk [vmem:[#allocation4 + $0x41] sm:$0xff] %vm377_vm4, %v3160_v36  ;;  %3188 = vrot.lane.b32.xlu1 %v3160_v36, %s5622_s28  ;;  %v3034_v50 = vadd.f32 %v4579_v12, %v7282_v1 }
 0x7c1   : > { %v4580_v32 = vpop.f32.mrb[50].mxu1  ;;  %v3139_v47 = vadd.f32 %v7273_v27, %v3034_v50  ;;  %5322 = vrot.lane.b32.xlu0 %v5321_v4, %s5624_s12  ;;  %v4060_v50 = vld [vmem:[%s7777_s7 + $0x30] sm:$0xff]  ;;  %v4061_v4 = vld [vmem:[%s7777_s7 + $0x38] sm:$0xff] }
 0x7c2   : > { %v4581_v45 = vpop.f32.mrb[51].mxu1 }
 0x7c3   : > { %v4582_v20 = vadd.f32 %v4581_v45, %v4580_v32  ;;  %3221 = vrot.lane.b32.xlu1 %v3160_v36, %s5621_s27  ;;  %v3161_v29 = vmax.f32 %v3139_v47, 0.0  ;;  %v4078_v32 = vld [vmem:[%s7777_s7 + $0xc0] sm:$0xff] }
 0x7c5   : > { %v3039_v62 = vadd.f32 %v4582_v20, %v7282_v1  ;;  %v4583_v30 = vpop.f32.mrb[52].mxu1  ;;  %3170 = vst.msk [vmem:[#allocation4 + $0x51] sm:$0xff] %vm377_vm4, %v3161_v29  ;;  %3254 = vrot.lane.b32.xlu0 %v3160_v36, %s5623_s29  ;;  %v4077_v36 = vld [vmem:[%s7777_s7 + $0xb8] sm:$0xff] }
 0x7c6   : > { %v4584_v43 = vpop.f32.mrb[53].mxu1  ;;  %v4919_v12 = vpack.c.bf16 %v4077_v36, %v4076_v25 }
 0x7c7   : > { %v3144_v15 = vadd.f32 %v7271_v63, %v3039_v62  ;;  %3256 = vrot.lane.b32.xlu1 %v3161_v29, %s5623_s29  ;;  %v4585_v21 = vadd.f32 %v4584_v43, %v4583_v30  ;;  %v4079_v62 = vld [vmem:[%s7777_s7 + $0xc8] sm:$0xff] }
 0x7c9   : > { %v3162_v22 = vmax.f32 %v3144_v15, 0.0  ;;  %v3044_v16 = vadd.f32 %v4585_v21, %v7282_v1  ;;  %3190 = vrot.lane.b32.xlu0 %v3161_v29, %s5622_s28 }
 0x7ca   : > { %v4586_v52 = vpop.f32.mrb[54].mxu1 }
 0x7cb   : > { %3171 = vst.msk [vmem:[#allocation4 + $0x61] sm:$0xff] %vm377_vm4, %v3162_v22  ;;  %v3149_v37 = vadd.f32 %v7277_v60, %v3044_v16  ;;  %3192 = vrot.lane.b32.xlu1 %v3162_v22, %s5622_s28  ;;  %v4587_v38 = vpop.f32.mrb[55].mxu1  ;;  %v4071_v60 = vld [vmem:[%s7777_s7 + $0x88] sm:$0xff]  ;;  %v4062_v16 = vld [vmem:[%s7777_s7 + $0x40] sm:$0xff] }
 0x7cc   : > { %v4588_v33 = vadd.f32 %v4587_v38, %v4586_v52  ;;  %v4063_v52 = vld [vmem:[%s7777_s7 + $0x48] sm:$0xff]  ;;  %v3446_v38 = vsel %vm537_vm2, %v3444_v18, %v3445_v59 }
 0x7cd   : > { %v3163_v61 = vmax.f32 %v3149_v37, 0.0  ;;  %3223 = vrot.lane.b32.xlu0 %v3161_v29, %s5621_s27  ;;  %v4921_v29 = vpack.c.bf16 %v4061_v4, %v4060_v50 }
 0x7ce   : > { %v3049_v63 = vadd.f32 %v4588_v33, %v7282_v1 }
 0x7cf   : > { %3172 = vst.msk [vmem:[#allocation4 + $0x71] sm:$0xff] %vm377_vm4, %v3163_v61  ;;  %3225 = vrot.lane.b32.xlu1 %v3162_v22, %s5621_s27 }
 0x7d0   : > { %v3154_v27 = vadd.f32 %v7275_v54, %v3049_v63  ;;  %v4070_v54 = vld [vmem:[%s7777_s7 + $0x80] sm:$0xff]  ;;  %v4080_v63 = vld [vmem:[%s7777_s7 + $0xd0] sm:$0xff] }
 0x7d1   : > { %3258 = vrot.lane.b32.xlu0 %v3162_v22, %s5623_s29  ;;  %v4907_v0 = vpack.c.bf16 %v4071_v60, %v4070_v54  ;;  %v7396_v22 = vsel %vm512_vm3, %v3372_v53, %v3373_v41  ;;  %v4925_v60 = vpack.c.bf16 %v4063_v52, %v4062_v16 }
 0x7d2   : > { %v3164_v31 = vmax.f32 %v3154_v27, 0.0  ;;  %v4081_v27 = vld [vmem:[%s7777_s7 + $0xd8] sm:$0xff] }
 0x7d3   : > { %3260 = vrot.lane.b32.xlu1 %v3163_v61, %s5623_s29  ;;  %4908 = vmatprep.subr.bf16.mxu0 %v4907_v0  ;;  %v4065_v0 = vld [vmem:[%s7777_s7 + $0x58] sm:$0xff] }
 0x7d4   : > { %3173 = vst.msk [vmem:[#allocation4 + $0x81] sm:$0xff] %vm377_vm4, %v3164_v31  ;;  %4910 = vmatpush3.bf16.msra.mxu0 %v4909_v17  ;;  %v4066_v17 = vld [vmem:[%s7777_s7 + $0x60] sm:$0xff] }
 0x7d5   : > { %3194 = vrot.lane.b32.xlu0 %v3163_v61, %s5622_s28  ;;  %4912 = vmatprep.subr.bf16.mxu0 %v4911_v23  ;;  %v4933_v13 = vpack.c.bf16 %v4067_v8, %v4066_v17 }
 0x7d7   : > { %3196 = vrot.lane.b32.xlu1 %v3164_v31, %s5622_s28 }
 0x7d8   : > { %4914 = vmatpush3.bf16.msra.mxu0 %v4913_v51  ;;  %v4068_v51 = vld [vmem:[%s7777_s7 + $0x70] sm:$0xff] }
 0x7d9   : > { %3227 = vrot.lane.b32.xlu0 %v3163_v61, %s5621_s27  ;;  %4916 = vmatprep.subr.bf16.mxu0 %v4915_v5  ;;  %v4923_v61 = vpack.c.bf16 %v4079_v62, %v4078_v32 }
 0x7db   : > { %3262 = vrot.lane.b32.xlu1 %v3164_v31, %s5623_s29 }
 0x7dc   : > { %4918 = vmatpush3.bf16.msra.mxu0 %v4917_v39 }
 0x7dd   : > { %3229 = vrot.lane.b32.xlu0 %v3164_v31, %s5621_s27  ;;  %4920 = vmatprep.subr.bf16.mxu0 %v4919_v12 }
 0x7e0   : > { %4922 = vmatpush3.bf16.msra.mxu0 %v4921_v29 }
 0x7e1   : > { %4924 = vmatprep.subr.bf16.mxu0 %v4923_v61 }
 0x7e4   : > { %4926 = vmatpush3.bf16.msra.mxu0 %v4925_v60 }
 0x80d   : > { %v3183_v1 = vpop.permute.xlu0 %3182  ;;  %v3249_v40 = vpop.permute.xlu1 %3248 }
 0x80e   : > { %3207 = vst.msk [vmem:[#allocation4 + $0xb1] sm:$0xff] %vm377_vm4, %v3183_v1  ;;  %3273 = vst.msk [vmem:[#allocation4 + $0x1f1] sm:$0xff] %vm377_vm4, %v3249_v40  ;;  %v4927_v1 = vpack.c.bf16 %v4081_v27, %v4080_v63  ;;  %v4064_v40 = vld [vmem:[%s7777_s7 + $0x50] sm:$0xff] }
 0x80f   : > { %v4929_v3 = vpack.c.bf16 %v4065_v0, %v4064_v40 }
 0x810   : > { %4928 = vmatprep.subr.bf16.mxu0 %v4927_v1 }
 0x811   : > { %v3216_v26 = vpop.permute.xlu0 %3215  ;;  %4930 = vmatpush3.bf16.msra.mxu0 %v4929_v3 }
 0x812   : > { %3240 = vst.msk [vmem:[#allocation4 + $0x151] sm:$0xff] %vm377_vm4, %v3216_v26  ;;  %v4931_v26 = vpack.c.bf16 %v4083_v7, %v4082_v24 }
 0x814   : > { %4932 = vmatprep.subr.bf16.mxu0 %v4931_v26 }
 0x815   : > { %v3299_v34 = vld [vmem:[#allocation4 + $0xb0] sm:$0xff]  ;;  %v3300_v19 = vld [vmem:[#allocation4 + $0xb8] sm:$0x3]  ;;  %4934 = vmatpush3.bf16.msra.mxu0 %v4933_v13  ;;  %v3288_v13 = vld [vmem:[#allocation4 + $0x48] sm:$0x3] }
 0x816   : > { %v5326_v2 = vpack.i.bf16 %v3299_v34, %v3335_v28  ;;  %v3417_v10 = vrot.slane %v3299_v34, 1  ;;  %v3418_v46 = vrot.slane %v3300_v19, 1  ;;  %v3337_v11 = vld [vmem:[#allocation4 + $0x1f0] sm:$0xff]  ;;  %v3338_v6 = vld [vmem:[#allocation4 + $0x1f8] sm:$0x3]  ;;  %4936 = vmatprep.subr.bf16.mxu0 %v4935_v56 }
 0x817   : > { %v3521_v19 = vrot.slane %v3337_v11, 1  ;;  %v3522_v5 = vrot.slane %v3338_v6, 1 }
 0x818   : > { %5327 = vrot.lane.b32.xlu1 %v5326_v2, %s5619_s14  ;;  %v3419_v49 = vsel %vm512_vm3, %v3417_v10, %v3418_v46  ;;  %v3285_v2 = vld [vmem:[#allocation4 + $0x30] sm:$0xff]  ;;  %v3286_v10 = vld [vmem:[#allocation4 + $0x38] sm:$0x3]  ;;  %v4937_v46 = vpack.c.bf16 %v4069_v14, %v4068_v51  ;;  %v3379_v14 = vrot.slane %v3288_v13, 1 }
 0x819   : > { %v5331_v47 = vpack.i.bf16 %v3419_v49, %v3586_v55  ;;  %v3319_v45 = vld [vmem:[#allocation4 + $0x150] sm:$0xff]  ;;  %v3320_v20 = vld [vmem:[#allocation4 + $0x158] sm:$0x3]  ;;  %v3447_v36 = vrot.slane %v3285_v2, 2  ;;  %v3448_v49 = vrot.slane %v3286_v10, 2  ;;  %v3523_v12 = vsel %vm512_vm3, %v3521_v19, %v3522_v5 }
 0x81a   : > { %v3481_v30 = vrot.slane %v3319_v45, 1  ;;  %v3482_v43 = vrot.slane %v3320_v20, 1  ;;  %v3545_v15 = vrot.slane %v3319_v45, 2  ;;  %v3546_v21 = vrot.slane %v3320_v20, 2  ;;  %4938 = vmatpush3.bf16.msra.mxu0 %v4937_v46 }
 0x81b   : > { %5332 = vrot.lane.b32.xlu0 %v5331_v47, %s5615_s18  ;;  %v3375_v50 = vrot.slane %v3285_v2, 1  ;;  %v3376_v4 = vrot.slane %v3286_v10, 1 }
 0x81c   : > { %v7405_v37 = vsel %vm512_vm3, %v3481_v30, %v3482_v43  ;;  %v3547_v33 = vsel %vm537_vm2, %v3545_v15, %v3546_v21  ;;  %v3449_v21 = vsel %vm537_vm2, %v3447_v36, %v3448_v49 }
 0x81d   : > { %v5336_v31 = vpack.i.bf16 %v7405_v37, %v7396_v22  ;;  %v5341_v54 = vpack.i.bf16 %v3446_v38, %v3547_v33  ;;  %v5346_v28 = vpack.i.bf16 %v3547_v33, %v3446_v38  ;;  %v7468_v38 = vsel %vm512_vm3, %v3375_v50, %v3376_v4 }
 0x81f   : > { %5337 = vrot.lane.b32.xlu1 %v5336_v31, %s5620_s26  ;;  %5342 = vrot.lane.b32.xlu0 %v5341_v54, %s5624_s12 }
 0x823   : > { %5347 = vrot.lane.b32.xlu1 %v5346_v28, %s5622_s28 }
 0x825   : > { %v3251_v48 = vpop.permute.xlu0 %3250  ;;  %v3185_v44 = vpop.permute.xlu1 %3184 }
 0x826   : > { %3274 = vst.msk [vmem:[#allocation4 + $0x201] sm:$0xff] %vm377_vm4, %v3251_v48  ;;  %3208 = vst.msk [vmem:[#allocation4 + $0xc1] sm:$0xff] %vm377_vm4, %v3185_v44  ;;  %v3287_v44 = vld [vmem:[#allocation4 + $0x40] sm:$0xff] }
 0x827   : > { %v3378_v56 = vrot.slane %v3287_v44, 1 }
 0x829   : > { %v3218_v23 = vpop.permute.xlu1 %3217 }
 0x82a   : > { %3241 = vst.msk [vmem:[#allocation4 + $0x161] sm:$0xff] %vm377_vm4, %v3218_v23 }
 0x82b   : > { %v3187_v34 = vpop.permute.xlu0 %3186 }
 0x82c   : > { %3209 = vst.msk [vmem:[#allocation4 + $0xd1] sm:$0xff] %vm377_vm4, %v3187_v34 }
 0x82d   : > { %v3253_v55 = vpop.permute.xlu1 %3252  ;;  %v3301_v57 = vld [vmem:[#allocation4 + $0xc0] sm:$0xff]  ;;  %v3302_v53 = vld [vmem:[#allocation4 + $0xc8] sm:$0x3] }
 0x82e   : > { %3275 = vst.msk [vmem:[#allocation4 + $0x211] sm:$0xff] %vm377_vm4, %v3253_v55  ;;  %v5356_v41 = vpack.i.bf16 %v3337_v11, %v3301_v57  ;;  %v3420_v18 = vrot.slane %v3301_v57, 1  ;;  %v5351_v58 = vpack.i.bf16 %v3301_v57, %v3337_v11  ;;  %v3421_v25 = vrot.slane %v3302_v53, 1  ;;  %v3339_v60 = vld [vmem:[#allocation4 + $0x200] sm:$0xff]  ;;  %v3340_v1 = vld [vmem:[#allocation4 + $0x208] sm:$0x3] }
 0x82f   : > { %v3220_v59 = vpop.permute.xlu0 %3219  ;;  %v3524_v17 = vrot.slane %v3339_v60, 1  ;;  %v3525_v26 = vrot.slane %v3340_v1, 1  ;;  %v7493_v57 = vsel %vm512_vm3, %v3378_v56, %v3379_v14  ;;  %v3450_v53 = vrot.slane %v3287_v44, 2 }
 0x830   : > { %5357 = vrot.lane.b32.xlu1 %v5356_v41, %s5621_s27  ;;  %5352 = vrot.lane.b32.xlu0 %v5351_v58, %s5619_s14  ;;  %v3422_v39 = vsel %vm512_vm3, %v3420_v18, %v3421_v25  ;;  %3242 = vst.msk [vmem:[#allocation4 + $0x171] sm:$0xff] %vm377_vm4, %v3220_v59  ;;  %v3451_v41 = vrot.slane %v3288_v13, 2 }
 0x831   : > { %v3189_v32 = vpop.permute.xlu1 %3188  ;;  %v5366_v47 = vpack.i.bf16 %v3523_v12, %v3422_v39  ;;  %v5361_v45 = vpack.i.bf16 %v3422_v39, %v3523_v12  ;;  %v3321_v20 = vld [vmem:[#allocation4 + $0x160] sm:$0xff]  ;;  %v3322_v29 = vld [vmem:[#allocation4 + $0x168] sm:$0x3]  ;;  %v3526_v51 = vsel %vm512_vm3, %v3524_v17, %v3525_v26 }
 0x832   : > { %3210 = vst.msk [vmem:[#allocation4 + $0xe1] sm:$0xff] %vm377_vm4, %v3189_v32  ;;  %v3548_v62 = vrot.slane %v3321_v20, 2  ;;  %v3549_v30 = vrot.slane %v3322_v29, 2  ;;  %v3484_v43 = vrot.slane %v3321_v20, 1  ;;  %v3485_v15 = vrot.slane %v3322_v29, 1 }
 0x833   : > { %v7462_v16 = vpop.permute.xlu0 %5322  ;;  %v3303_v61 = vld [vmem:[#allocation4 + $0xd0] sm:$0xff]  ;;  %v3304_v63 = vld [vmem:[#allocation4 + $0xd8] sm:$0x3]  ;;  %v3452_v12 = vsel %vm537_vm2, %v3450_v53, %v3451_v41 }
 0x834   : > { %5367 = vrot.lane.b32.xlu1 %v5366_v47, %s5623_s29  ;;  %5362 = vrot.lane.b32.xlu0 %v5361_v45, %s5615_s18  ;;  %v3550_v52 = vsel %vm537_vm2, %v3548_v62, %v3549_v30  ;;  %v7471_v33 = vsel %vm512_vm3, %v3484_v43, %v3485_v15  ;;  %v3423_v40 = vrot.slane %v3303_v61, 1  ;;  %v3424_v0 = vrot.slane %v3304_v63, 1 }
 0x835   : > { %v3222_v27 = vpop.permute.xlu1 %3221  ;;  %v5376_v31 = vpack.i.bf16 %v3449_v21, %v3550_v52  ;;  %v5371_v54 = vpack.i.bf16 %v7471_v33, %v7468_v38  ;;  %v5386_v8 = vpack.i.bf16 %v3303_v61, %v3339_v60  ;;  %v5381_v48 = vpack.i.bf16 %v3550_v52, %v3449_v21  ;;  %v3341_v32 = vld [vmem:[#allocation4 + $0x210] sm:$0xff]  ;;  %v3342_v45 = vld [vmem:[#allocation4 + $0x218] sm:$0x3] }
 0x836   : > { %3243 = vst.msk [vmem:[#allocation4 + $0x181] sm:$0xff] %vm377_vm4, %v3222_v27  ;;  %v3425_v23 = vsel %vm512_vm3, %v3423_v40, %v3424_v0  ;;  %v5391_v19 = vpack.i.bf16 %v3339_v60, %v3303_v61  ;;  %v3527_v15 = vrot.slane %v3341_v32, 1  ;;  %v3528_v21 = vrot.slane %v3342_v45, 1  ;;  %v3289_v52 = vld [vmem:[#allocation4 + $0x50] sm:$0xff] }
 0x837   : > { %v3255_v28 = vpop.permute.xlu0 %3254  ;;  %v3323_v3 = vld [vmem:[#allocation4 + $0x170] sm:$0xff]  ;;  %v3324_v24 = vld [vmem:[#allocation4 + $0x178] sm:$0x3]  ;;  %v5396_v34 = vpack.i.bf16 %v3425_v23, %v3526_v51  ;;  %v5401_v58 = vpack.i.bf16 %v3526_v51, %v3425_v23  ;;  %v3381_v17 = vrot.slane %v3289_v52, 1 }
 0x838   : > { %5377 = vrot.lane.b32.xlu1 %v5376_v31, %s5624_s12  ;;  %5372 = vrot.lane.b32.xlu0 %v5371_v54, %s5620_s26  ;;  %3276 = vst.msk [vmem:[#allocation4 + $0x221] sm:$0xff] %vm377_vm4, %v3255_v28  ;;  %v3487_v11 = vrot.slane %v3323_v3, 1  ;;  %v3488_v6 = vrot.slane %v3324_v24, 1  ;;  %v3551_v2 = vrot.slane %v3323_v3, 2  ;;  %v3552_v10 = vrot.slane %v3324_v24, 2 }
 0x839   : > { %v3257_v7 = vpop.permute.xlu1 %3256  ;;  %v3305_v36 = vld [vmem:[#allocation4 + $0xe0] sm:$0xff]  ;;  %v3306_v49 = vld [vmem:[#allocation4 + $0xe8] sm:$0x3]  ;;  %v3290_v31 = vld [vmem:[#allocation4 + $0x58] sm:$0x3]  ;;  %v3453_v28 = vrot.slane %v3289_v52, 2  ;;  %v3529_v24 = vsel %vm512_vm3, %v3527_v15, %v3528_v21 }
 0x83a   : > { %3277 = vst.msk [vmem:[#allocation4 + $0x231] sm:$0xff] %vm377_vm4, %v3257_v7  ;;  %v7487_v5 = vsel %vm512_vm3, %v3487_v11, %v3488_v6  ;;  %v3553_v25 = vsel %vm537_vm2, %v3551_v2, %v3552_v10  ;;  %v3426_v47 = vrot.slane %v3305_v36, 1  ;;  %v3427_v20 = vrot.slane %v3306_v49, 1 }
 0x83b   : > { %v3191_v42 = vpop.permute.xlu0 %3190  ;;  %v5406_v18 = vpack.i.bf16 %v7487_v5, %v7493_v57  ;;  %v5416_v50 = vpack.i.bf16 %v3553_v25, %v3452_v12  ;;  %v5411_v4 = vpack.i.bf16 %v3452_v12, %v3553_v25  ;;  %v5426_v61 = vpack.i.bf16 %v3341_v32, %v3305_v36  ;;  %v3292_v25 = vld [vmem:[#allocation4 + $0x68] sm:$0x3] }
 0x83c   : > { %5387 = vrot.lane.b32.xlu1 %v5386_v8, %s5619_s14  ;;  %5382 = vrot.lane.b32.xlu0 %v5381_v48, %s5622_s28  ;;  %3211 = vst.msk [vmem:[#allocation4 + $0xf1] sm:$0xff] %vm377_vm4, %v3191_v42  ;;  %v5421_v63 = vpack.i.bf16 %v3305_v36, %v3341_v32  ;;  %v3428_v27 = vsel %vm512_vm3, %v3426_v47, %v3427_v20  ;;  %v3454_v7 = vrot.slane %v3290_v31, 2  ;;  %v3382_v26 = vrot.slane %v3290_v31, 1 }
 0x83d   : > { %v3193_v35 = vpop.permute.xlu1 %3192  ;;  %v3325_v62 = vld [vmem:[#allocation4 + $0x180] sm:$0xff]  ;;  %v3326_v30 = vld [vmem:[#allocation4 + $0x188] sm:$0x3]  ;;  %v5436_v8 = vpack.i.bf16 %v3529_v24, %v3428_v27  ;;  %v5431_v48 = vpack.i.bf16 %v3428_v27, %v3529_v24 }
 0x83e   : > { %3212 = vst.msk [vmem:[#allocation4 + $0x101] sm:$0xff] %vm377_vm4, %v3193_v35  ;;  %v3554_v54 = vrot.slane %v3325_v62, 2  ;;  %v3555_v60 = vrot.slane %v3326_v30, 2  ;;  %v3490_v1 = vrot.slane %v3325_v62, 1  ;;  %v3491_v40 = vrot.slane %v3326_v30, 1 }
 0x83f   : > { %v3224_v46 = vpop.permute.xlu0 %3223  ;;  %v3455_v42 = vsel %vm537_vm2, %v3453_v28, %v3454_v7  ;;  %v7523_v35 = vsel %vm512_vm3, %v3381_v17, %v3382_v26  ;;  %v3343_v14 = vld [vmem:[#allocation4 + $0x220] sm:$0xff]  ;;  %v3457_v30 = vrot.slane %v3292_v25, 2  ;;  %v3293_v7 = vld [vmem:[#allocation4 + $0x70] sm:$0xff] }
 0x840   : > { %5397 = vrot.lane.b32.xlu1 %v5396_v34, %s5615_s18  ;;  %5392 = vrot.lane.b32.xlu0 %v5391_v19, %s5621_s27  ;;  %3244 = vst.msk [vmem:[#allocation4 + $0x191] sm:$0xff] %vm377_vm4, %v3224_v46  ;;  %v3556_v44 = vsel %vm537_vm2, %v3554_v54, %v3555_v60  ;;  %v7516_v13 = vsel %vm512_vm3, %v3490_v1, %v3491_v40  ;;  %v3344_v34 = vld [vmem:[#allocation4 + $0x228] sm:$0x3] }
 0x841   : > { %v3226_v55 = vpop.permute.xlu1 %3225  ;;  %v5446_v51 = vpack.i.bf16 %v3455_v42, %v3556_v44  ;;  %v5441_v56 = vpack.i.bf16 %v7516_v13, %v7523_v35  ;;  %v3531_v53 = vrot.slane %v3344_v34, 1  ;;  %v3345_v54 = vld [vmem:[#allocation4 + $0x230] sm:$0xff]  ;;  %v3346_v1 = vld [vmem:[#allocation4 + $0x238] sm:$0x3] }
 0x842   : > { %3245 = vst.msk [vmem:[#allocation4 + $0x1a1] sm:$0xff] %vm377_vm4, %v3226_v55  ;;  %v3530_v55 = vrot.slane %v3343_v14, 1  ;;  %v3534_v24 = vrot.slane %v3346_v1, 1 }
 0x843   : > { %v3259_v59 = vpop.permute.xlu0 %3258  ;;  %v3307_v11 = vld [vmem:[#allocation4 + $0xf0] sm:$0xff]  ;;  %v3308_v6 = vld [vmem:[#allocation4 + $0xf8] sm:$0x3] }
 0x844   : > { %5407 = vrot.lane.b32.xlu1 %v5406_v18, %s5620_s26  ;;  %5402 = vrot.lane.b32.xlu0 %v5401_v58, %s5623_s29  ;;  %3278 = vst.msk [vmem:[#allocation4 + $0x241] sm:$0xff] %vm377_vm4, %v3259_v59  ;;  %v3429_v19 = vrot.slane %v3307_v11, 1  ;;  %v3430_v2 = vrot.slane %v3308_v6, 1  ;;  %v5456_v41 = vpack.i.bf16 %v3307_v11, %v3343_v14  ;;  %v5451_v18 = vpack.i.bf16 %v3556_v44, %v3455_v42  ;;  %v3291_v58 = vld [vmem:[#allocation4 + $0x60] sm:$0xff] }
 0x845   : > { %v3261_v39 = vpop.permute.xlu1 %3260  ;;  %v3384_v12 = vrot.slane %v3291_v58, 1  ;;  %v5461_v32 = vpack.i.bf16 %v3343_v14, %v3307_v11  ;;  %v3456_v62 = vrot.slane %v3291_v58, 2  ;;  %v3309_v52 = vld [vmem:[#allocation4 + $0x100] sm:$0xff]  ;;  %v3459_v42 = vrot.slane %v3293_v7, 2 }
 0x846   : > { %3279 = vst.msk [vmem:[#allocation4 + $0x251] sm:$0xff] %vm377_vm4, %v3261_v39  ;;  %v3431_v36 = vsel %vm512_vm3, %v3429_v19, %v3430_v2  ;;  %v3532_v39 = vsel %vm512_vm3, %v3530_v55, %v3531_v53  ;;  %v3432_v60 = vrot.slane %v3309_v52, 1  ;;  %v5496_v17 = vpack.i.bf16 %v3345_v54, %v3309_v52 }
 0x847   : > { %v3195_v29 = vpop.permute.xlu0 %3194  ;;  %v3327_v10 = vld [vmem:[#allocation4 + $0x190] sm:$0xff]  ;;  %v3328_v46 = vld [vmem:[#allocation4 + $0x198] sm:$0x3]  ;;  %v5471_v15 = vpack.i.bf16 %v3532_v39, %v3431_v36  ;;  %v5491_v26 = vpack.i.bf16 %v3309_v52, %v3345_v54  ;;  %v3387_v14 = vrot.slane %v3293_v7, 1 }
 0x848   : > { %5417 = vrot.lane.b32.xlu1 %v5416_v50, %s5622_s28  ;;  %5412 = vrot.lane.b32.xlu0 %v5411_v4, %s5624_s12  ;;  %3213 = vst.msk [vmem:[#allocation4 + $0x111] sm:$0xff] %vm377_vm4, %v3195_v29  ;;  %v3493_v49 = vrot.slane %v3327_v10, 1  ;;  %v3494_v59 = vrot.slane %v3328_v46, 1  ;;  %v3385_v50 = vrot.slane %v3292_v25, 1  ;;  %v5466_v4 = vpack.i.bf16 %v3431_v36, %v3532_v39 }
 0x849   : > { %v3197_v43 = vpop.permute.xlu1 %3196  ;;  %v3557_v45 = vrot.slane %v3327_v10, 2  ;;  %v3558_v20 = vrot.slane %v3328_v46, 2  ;;  %v3330_v28 = vld [vmem:[#allocation4 + $0x1a8] sm:$0x3] }
 0x84a   : > { %3214 = vst.msk [vmem:[#allocation4 + $0x121] sm:$0xff] %vm377_vm4, %v3197_v43  ;;  %v7534_v47 = vsel %vm512_vm3, %v3493_v49, %v3494_v59  ;;  %v7539_v29 = vsel %vm512_vm3, %v3384_v12, %v3385_v50  ;;  %v3497_v6 = vrot.slane %v3330_v28, 1 }
 0x84b   : > { %v3228_v0 = vpop.permute.xlu0 %3227  ;;  %v5476_v43 = vpack.i.bf16 %v7534_v47, %v7539_v29  ;;  %v3559_v21 = vsel %vm537_vm2, %v3557_v45, %v3558_v20  ;;  %v3347_v36 = vld [vmem:[#allocation4 + $0x240] sm:$0xff]  ;;  %v3348_v49 = vld [vmem:[#allocation4 + $0x248] sm:$0x3] }
 0x84c   : > { %5427 = vrot.lane.b32.xlu1 %v5426_v61, %s5621_s27  ;;  %5422 = vrot.lane.b32.xlu0 %v5421_v63, %s5619_s14  ;;  %3246 = vst.msk [vmem:[#allocation4 + $0x1b1] sm:$0xff] %vm377_vm4, %v3228_v0  ;;  %v3310_v61 = vld [vmem:[#allocation4 + $0x108] sm:$0x3]  ;;  %v3458_v63 = vsel %vm537_vm2, %v3456_v62, %v3457_v30  ;;  %v3329_v0 = vld [vmem:[#allocation4 + $0x1a0] sm:$0xff] }
 0x84d   : > { %v3263_v3 = vpop.permute.xlu1 %3262  ;;  %v5486_v27 = vpack.i.bf16 %v3559_v21, %v3458_v63  ;;  %v5481_v31 = vpack.i.bf16 %v3458_v63, %v3559_v21  ;;  %v3433_v40 = vrot.slane %v3310_v61, 1  ;;  %v3560_v44 = vrot.slane %v3329_v0, 2  ;;  %v3295_v62 = vld [vmem:[#allocation4 + $0x80] sm:$0xff]  ;;  %v3296_v30 = vld [vmem:[#allocation4 + $0x88] sm:$0x3] }
 0x84e   : > { %3280 = vst.msk [vmem:[#allocation4 + $0x261] sm:$0xff] %vm377_vm4, %v3263_v3  ;;  %v3533_v3 = vrot.slane %v3345_v54, 1  ;;  %v3496_v11 = vrot.slane %v3329_v0, 1  ;;  %v3390_v61 = vrot.slane %v3295_v62, 1  ;;  %v3391_v63 = vrot.slane %v3296_v30, 1 }
 0x84f   : > { %v3230_v23 = vpop.permute.xlu0 %3229  ;;  %v3311_v55 = vld [vmem:[#allocation4 + $0x110] sm:$0xff]  ;;  %v3312_v53 = vld [vmem:[#allocation4 + $0x118] sm:$0x3]  ;;  %v3462_v0 = vrot.slane %v3295_v62, 2 }
 0x850   : > { %5437 = vrot.lane.b32.xlu1 %v5436_v8, %s5623_s29  ;;  %5432 = vrot.lane.b32.xlu0 %v5431_v48, %s5615_s18  ;;  %3247 = vst.msk [vmem:[#allocation4 + $0x1c1] sm:$0xff] %vm377_vm4, %v3230_v23  ;;  %v3434_v8 = vsel %vm512_vm3, %v3432_v60, %v3433_v40  ;;  %v3294_v48 = vld [vmem:[#allocation4 + $0x78] sm:$0x3]  ;;  %v3561_v23 = vrot.slane %v3330_v28, 2  ;;  %v7555_v46 = vsel %vm512_vm3, %v3496_v11, %v3497_v6  ;;  %v3435_v59 = vrot.slane %v3311_v55, 1  ;;  %v3349_v6 = vld [vmem:[#allocation4 + $0x250] sm:$0xff] }
 0x851   : > { %v3388_v34 = vrot.slane %v3294_v48, 1  ;;  %v3436_v39 = vrot.slane %v3312_v53, 1  ;;  %v5526_v45 = vpack.i.bf16 %v3311_v55, %v3347_v36  ;;  %v7577_v40 = vsel %vm512_vm3, %v3390_v61, %v3391_v63 }
 0x852   : > { %v3562_v10 = vsel %vm537_vm2, %v3560_v44, %v3561_v23  ;;  %v3463_v28 = vrot.slane %v3296_v30, 2  ;;  %v3316_v44 = vld [vmem:[#allocation4 + $0x138] sm:$0x3] }
 0x853   : > { %v3331_v12 = vld [vmem:[#allocation4 + $0x1b0] sm:$0xff]  ;;  %v3332_v50 = vld [vmem:[#allocation4 + $0x1b8] sm:$0x3] }
 0x854   : > { %5447 = vrot.lane.b32.xlu1 %v5446_v51, %s5624_s12  ;;  %5442 = vrot.lane.b32.xlu0 %v5441_v56, %s5620_s26  ;;  %v3535_v51 = vsel %vm512_vm3, %v3533_v3, %v3534_v24  ;;  %v3460_v56 = vrot.slane %v3294_v48, 2  ;;  %v3500_v21 = vrot.slane %v3332_v50, 1  ;;  %v3563_v60 = vrot.slane %v3331_v12, 2  ;;  %v3315_v48 = vld [vmem:[#allocation4 + $0x130] sm:$0xff] }
 0x855   : > { %v5506_v19 = vpack.i.bf16 %v3535_v51, %v3434_v8  ;;  %v5501_v2 = vpack.i.bf16 %v3434_v8, %v3535_v51  ;;  %v3564_v1 = vrot.slane %v3332_v50, 2  ;;  %v3464_v8 = vsel %vm537_vm2, %v3462_v0, %v3463_v28  ;;  %v3350_v51 = vld [vmem:[#allocation4 + $0x258] sm:$0x3] }
 0x857   : > { %v3565_v7 = vsel %vm537_vm2, %v3563_v60, %v3564_v1  ;;  %v3334_v53 = vld [vmem:[#allocation4 + $0x1c8] sm:$0x3] }
 0x858   : > { %5457 = vrot.lane.b32.xlu1 %v5456_v41, %s5619_s14  ;;  %5452 = vrot.lane.b32.xlu0 %v5451_v18, %s5622_s28  ;;  %v3461_v41 = vsel %vm537_vm2, %v3459_v42, %v3460_v56  ;;  %v7561_v18 = vsel %vm512_vm3, %v3387_v14, %v3388_v34  ;;  %v5556_v23 = vpack.i.bf16 %v3565_v7, %v3464_v8  ;;  %v3297_v14 = vld [vmem:[#allocation4 + $0x90] sm:$0xff]  ;;  %v3351_v34 = vld [vmem:[#allocation4 + $0x260] sm:$0xff] }
 0x859   : > { %v5516_v58 = vpack.i.bf16 %v3461_v41, %v3562_v10  ;;  %v5511_v25 = vpack.i.bf16 %v7555_v46, %v7561_v18  ;;  %v5521_v20 = vpack.i.bf16 %v3562_v10, %v3461_v41  ;;  %v5551_v11 = vpack.i.bf16 %v3464_v8, %v3565_v7 }
 0x85a   : > { %v3597_v10 = vrot.slane %v3315_v48, 1  ;;  %v3539_v41 = vrot.slane %v3349_v6, 1  ;;  %v3542_v50 = vrot.slane %v3351_v34, 1  ;;  %v3600_v30 = vrot.slane %v3297_v14, 2 }
 0x85c   : > { %5467 = vrot.lane.b32.xlu1 %v5466_v4, %s5615_s18  ;;  %5462 = vrot.lane.b32.xlu0 %v5461_v32, %s5621_s27  ;;  %v3536_v4 = vrot.slane %v3347_v36, 1  ;;  %v3537_v32 = vrot.slane %v3348_v49, 1 }
 0x85e   : > { %v3538_v52 = vsel %vm512_vm3, %v3536_v4, %v3537_v32 }
 0x860   : > { %5477 = vrot.lane.b32.xlu1 %v5476_v43, %s5620_s26  ;;  %5472 = vrot.lane.b32.xlu0 %v5471_v15, %s5623_s29  ;;  %v3437_v43 = vsel %vm512_vm3, %v3435_v59, %v3436_v39  ;;  %v3499_v15 = vrot.slane %v3331_v12, 1 }
 0x861   : > { %v5541_v24 = vpack.i.bf16 %v3538_v52, %v3437_v43 }
 0x862   : > { %v7572_v54 = vsel %vm512_vm3, %v3499_v15, %v3500_v21 }
 0x863   : > { %v5546_v3 = vpack.i.bf16 %v7572_v54, %v7577_v40 }
 0x864   : > { %5487 = vrot.lane.b32.xlu1 %v5486_v27, %s5622_s28  ;;  %5482 = vrot.lane.b32.xlu0 %v5481_v31, %s5624_s12  ;;  %v5536_v27 = vpack.i.bf16 %v3437_v43, %v3538_v52  ;;  %v5531_v31 = vpack.i.bf16 %v3347_v36, %v3311_v55  ;;  %v3333_v55 = vld [vmem:[#allocation4 + $0x1c0] sm:$0xff]  ;;  %v3592_v36 = vrot.slane %v3297_v14, 1 }
 0x865   : > { %v3502_v32 = vrot.slane %v3333_v55, 1 }
 0x868   : > { %5497 = vrot.lane.b32.xlu1 %v5496_v17, %s5621_s27  ;;  %5492 = vrot.lane.b32.xlu0 %v5491_v26, %s5619_s14  ;;  %v3313_v17 = vld [vmem:[#allocation4 + $0x120] sm:$0xff]  ;;  %v3314_v26 = vld [vmem:[#allocation4 + $0x128] sm:$0x3] }
 0x869   : > { %v3438_v42 = vrot.slane %v3313_v17, 1  ;;  %v3439_v56 = vrot.slane %v3314_v26, 1  ;;  %v5566_v49 = vpack.i.bf16 %v3349_v6, %v3313_v17  ;;  %v5561_v59 = vpack.i.bf16 %v3313_v17, %v3349_v6 }
 0x86a   : > { %v5591_v26 = vpack.i.bf16 %v3351_v34, %v3315_v48 }
 0x86b   : > { %v3440_v39 = vsel %vm512_vm3, %v3438_v42, %v3439_v56  ;;  %v5601_v42 = vld [vmem:[#allocation4 + $0x140] sm:$0xff]  ;;  %v5602_v56 = vld [vmem:[#allocation4 + $0x148] sm:$0x3] }
 0x86c   : > { %5507 = vrot.lane.b32.xlu1 %v5506_v19, %s5623_s29  ;;  %5502 = vrot.lane.b32.xlu0 %v5501_v2, %s5615_s18  ;;  %v3298_v19 = vld [vmem:[#allocation4 + $0x98] sm:$0x3]  ;;  %v3352_v2 = vld [vmem:[#allocation4 + $0x268] sm:$0x3]  ;;  %v3572_v14 = vrot.slane %v5602_v56, 1 }
 0x86d   : > { %v3593_v12 = vrot.slane %v3298_v19, 1  ;;  %v3543_v4 = vrot.slane %v3352_v2, 1  ;;  %v3601_v52 = vrot.slane %v3298_v19, 2 }
 0x86f   : > { %v3594_v21 = vsel %vm512_vm3, %v3592_v36, %v3593_v12  ;;  %v3544_v61 = vsel %vm512_vm3, %v3542_v50, %v3543_v4  ;;  %v3602_v28 = vsel %vm537_vm2, %v3600_v30, %v3601_v52 }
 0x870   : > { %5517 = vrot.lane.b32.xlu1 %v5516_v58, %s5624_s12  ;;  %5512 = vrot.lane.b32.xlu0 %v5511_v25, %s5620_s26  ;;  %v3540_v58 = vrot.slane %v3350_v51, 1  ;;  %v3598_v25 = vrot.slane %v3316_v44, 1  ;;  %v5325_v44 = vunpack.i.h.bf16 %v7462_v16  ;;  %v3571_v51 = vrot.slane %v5601_v42, 1 }
 0x872   : > { %v3599_v62 = vsel %vm512_vm3, %v3597_v10, %v3598_v25  ;;  %v3573_v19 = vsel %vm512_vm3, %v3571_v51, %v3572_v14  ;;  %v5324_v25 = vunpack.i.l.bf16 %v7462_v16 }
 0x873   : > { %v5586_v60 = vpack.i.bf16 %v3544_v61, %v3599_v62 }
 0x874   : > { %5527 = vrot.lane.b32.xlu1 %v5526_v45, %s5619_s14  ;;  %5522 = vrot.lane.b32.xlu0 %v5521_v20, %s5622_s28  ;;  %v3503_v45 = vrot.slane %v3334_v53, 1  ;;  %v3541_v20 = vsel %vm512_vm3, %v3539_v41, %v3540_v58 }
 0x875   : > { %v5576_v43 = vpack.i.bf16 %v3541_v20, %v3440_v39  ;;  %v5571_v15 = vpack.i.bf16 %v3440_v39, %v3541_v20 }
 0x876   : > { %v3504_v63 = vsel %vm512_vm3, %v3502_v32, %v3503_v45  ;;  %vm3989_vm3 = vcmask 916480  }
 0x877   : > { %v5581_v1 = vpack.i.bf16 %v3504_v63, %v3594_v21 }
 0x878   : > { %5537 = vrot.lane.b32.xlu1 %v5536_v27, %s5615_s18  ;;  %5532 = vrot.lane.b32.xlu0 %v5531_v31, %s5621_s27  ;;  %v3566_v27 = vrot.slane %v3333_v55, 2  ;;  %v3567_v31 = vrot.slane %v3334_v53, 2 }
 0x87a   : > { %v3568_v0 = vsel %vm537_vm2, %v3566_v27, %v3567_v31  ;;  %vm3972_vm2 = vcmask 654336  }
 0x87b   : > { %v5596_v17 = vpack.i.bf16 %v3568_v0, %v3602_v28 }
 0x87c   : > { %5547 = vrot.lane.b32.xlu1 %v5546_v3, %s5620_s26  ;;  %5542 = vrot.lane.b32.xlu0 %v5541_v24, %s5623_s29 }
 0x880   : > { %5557 = vrot.lane.b32.xlu1 %v5556_v23, %s5622_s28  ;;  %5552 = vrot.lane.b32.xlu0 %v5551_v11, %s5624_s12 }
 0x884   : > { %5567 = vrot.lane.b32.xlu1 %v5566_v49, %s5621_s27  ;;  %5562 = vrot.lane.b32.xlu0 %v5561_v59, %s5619_s14 }
 0x888   : > { %5577 = vrot.lane.b32.xlu1 %v5576_v43, %s5623_s29  ;;  %5572 = vrot.lane.b32.xlu0 %v5571_v15, %s5615_s18 }
 0x88a   : > { %v5328_v3 = vpop.permute.xlu1 %5327 }
 0x88b   : > { %v5330_v8 = vunpack.i.h.bf16 %v5328_v3  ;;  %v5329_v55 = vunpack.i.l.bf16 %v5328_v3 }
 0x88c   : > { %5587 = vrot.lane.b32.xlu1 %v5586_v60, %s5623_s29  ;;  %5582 = vrot.lane.b32.xlu0 %v5581_v1, %s5620_s26 }
 0x88d   : > { %v5333_v24 = vpop.permute.xlu0 %5332 }
 0x88e   : > { %v5335_v7 = vunpack.i.h.bf16 %v5333_v24  ;;  %v5334_v34 = vunpack.i.l.bf16 %v5333_v24 }
 0x890   : > { %v3939_v23 = vsel %vm377_vm4, %v7290_v9, %v5335_v7  ;;  %5597 = vrot.lane.b32.xlu1 %v5596_v17, %s5622_s28  ;;  %5592 = vrot.lane.b32.xlu0 %v5591_v26, %s5621_s27  ;;  %v3998_v9 = vsel %vm377_vm4, %v3573_v19, %v5334_v34  ;;  %s7757_s28 = scalar_lea.vmem %s7779_s9, %s4362_s11 }
 0x891   : > { %v3947_v11 = vsel %vm355_vm5, %v3939_v23, %v5330_v8  ;;  %v5338_v48 = vpop.permute.xlu1 %5337  ;;  %v5343_v2 = vpop.permute.xlu0 %5342  ;;  %v4006_v53 = vsel %vm355_vm5, %v3998_v9, %v5329_v55 }
 0x892   : > { %v3956_v6 = vsel %vm3955_vm1, %v3947_v11, %v5325_v44  ;;  %v5340_v36 = vunpack.i.h.bf16 %v5338_v48  ;;  %v5339_v49 = vunpack.i.l.bf16 %v5338_v48  ;;  %v4014_v59 = vsel %vm3955_vm1, %v4006_v53, %v5324_v25 }
 0x893   : > { %v5345_v11 = vunpack.i.h.bf16 %v5343_v2 }
 0x894   : > { %v3964_v32 = vsel %vm1274_vm14, %v3956_v6, %v5340_v36  ;;  %v4022_v45 = vsel %vm1274_vm14, %v4014_v59, %v5339_v49  ;;  %v5344_v6 = vunpack.i.l.bf16 %v5343_v2 }
 0x895   : > { %v5348_v10 = vpop.permute.xlu1 %5347 }
 0x896   : > { %v5350_v43 = vunpack.i.h.bf16 %v5348_v10  ;;  %v5349_v15 = vunpack.i.l.bf16 %v5348_v10 }
 0x8a2   : > { %v5358_v41 = vpop.permute.xlu1 %5357  ;;  %v5353_v58 = vpop.permute.xlu0 %5352 }
 0x8a3   : > { %v5360_v20 = vunpack.i.h.bf16 %v5358_v41  ;;  %v5359_v62 = vunpack.i.l.bf16 %v5358_v41  ;;  %v5355_v7 = vunpack.i.h.bf16 %v5353_v58  ;;  %v5354_v17 = vunpack.i.l.bf16 %v5353_v58 }
 0x8a6   : > { %v5368_v39 = vpop.permute.xlu1 %5367  ;;  %v5363_v12 = vpop.permute.xlu0 %5362 }
 0x8a7   : > { %v5370_v50 = vunpack.i.h.bf16 %v5368_v39  ;;  %v5369_v4 = vunpack.i.l.bf16 %v5368_v39  ;;  %v5365_v27 = vunpack.i.h.bf16 %v5363_v12  ;;  %v5364_v31 = vunpack.i.l.bf16 %v5363_v12 }
 0x8a9   : > { %v3973_v30 = vsel %vm3972_vm2, %v3964_v32, %v5370_v50  ;;  %v4030_v16 = vsel %vm3972_vm2, %v4022_v45, %v5369_v4  ;;  %v3940_v3 = vsel %vm377_vm4, %v7396_v22, %v5365_v27  ;;  %v3999_v24 = vsel %vm377_vm4, %v7405_v37, %v5364_v31 }
 0x8aa   : > { %v7617_v21 = vpop.permute.xlu1 %5377  ;;  %v5373_v52 = vpop.permute.xlu0 %5372  ;;  %v4038_v61 = vsel %vm1283_vm15, %v4030_v16, %v5359_v62  ;;  %v3981_v63 = vsel %vm1283_vm15, %v3973_v30, %v5360_v20  ;;  %v3948_v44 = vsel %vm355_vm5, %v3940_v3, %v5355_v7  ;;  %v4007_v23 = vsel %vm355_vm5, %v3999_v24, %v5354_v17 }
 0x8ab   : > { %v4046_v60 = vsel %vm3989_vm3, %v4038_v61, %v5349_v15  ;;  %v3990_v1 = vsel %vm3989_vm3, %v3981_v63, %v5350_v43  ;;  %v5375_v42 = vunpack.i.h.bf16 %v5373_v52  ;;  %v5374_v51 = vunpack.i.l.bf16 %v5373_v52 }
 0x8ac   : > { %4157 = vmatprep.mubr.f32.mxu0 %v4046_v60  ;;  %v3957_v56 = vsel %vm3955_vm1, %v3948_v44, %v5345_v11  ;;  %v4015_v14 = vsel %vm3955_vm1, %v4007_v23, %v5344_v6  ;;  %v5380_v15 = vunpack.i.h.bf16 %v7617_v21 }
 0x8ad   : > { %4158 = vmatmul.mubr.f32.vlgmr.msra.gmra.mrb[40].mxu0 %v3990_v1  ;;  %v3965_v9 = vsel %vm1274_vm14, %v3957_v56, %v5375_v42  ;;  %v4023_v55 = vsel %vm1274_vm14, %v4015_v14, %v5374_v51 }
 0x8ae   : > { %v5388_v0 = vpop.permute.xlu1 %5387  ;;  %v5383_v28 = vpop.permute.xlu0 %5382 }
 0x8af   : > { %v5385_v49 = vunpack.i.h.bf16 %v5383_v28  ;;  %v5384_v59 = vunpack.i.l.bf16 %v5383_v28  ;;  %v5390_v50 = vunpack.i.h.bf16 %v5388_v0  ;;  %v5389_v4 = vunpack.i.l.bf16 %v5388_v0 }
 0x8b2   : > { %v5398_v26 = vpop.permute.xlu1 %5397  ;;  %v5393_v8 = vpop.permute.xlu0 %5392 }
 0x8b3   : > { %v5400_v34 = vunpack.i.h.bf16 %v5398_v26  ;;  %v5399_v37 = vunpack.i.l.bf16 %v5398_v26  ;;  %v5395_v53 = vunpack.i.h.bf16 %v5393_v8  ;;  %v5394_v41 = vunpack.i.l.bf16 %v5393_v8 }
 0x8b5   : > { %v3941_v39 = vsel %vm377_vm4, %v7468_v38, %v5400_v34  ;;  %v4000_v12 = vsel %vm377_vm4, %v7471_v33, %v5399_v37  ;;  %v5379_v33 = vunpack.i.l.bf16 %v7617_v21 }
 0x8b6   : > { %v5408_v22 = vpop.permute.xlu1 %5407  ;;  %v5403_v48 = vpop.permute.xlu0 %5402  ;;  %v3949_v30 = vsel %vm355_vm5, %v3941_v39, %v5390_v50  ;;  %v4008_v16 = vsel %vm355_vm5, %v4000_v12, %v5389_v4 }
 0x8b7   : > { %v5405_v19 = vunpack.i.h.bf16 %v5403_v48  ;;  %v5404_v10 = vunpack.i.l.bf16 %v5403_v48  ;;  %v5410_v52 = vunpack.i.h.bf16 %v5408_v22  ;;  %v5409_v61 = vunpack.i.l.bf16 %v5408_v22 }
 0x8b8   : > { %v3958_v63 = vsel %vm3955_vm1, %v3949_v30, %v5380_v15  ;;  %v4016_v27 = vsel %vm3955_vm1, %v4008_v16, %v5379_v33 }
 0x8b9   : > { %v4031_v25 = vsel %vm3972_vm2, %v4023_v55, %v5404_v10  ;;  %v3974_v36 = vsel %vm3972_vm2, %v3965_v9, %v5405_v19  ;;  %v3966_v28 = vsel %vm1274_vm14, %v3958_v63, %v5410_v52  ;;  %v4024_v3 = vsel %vm1274_vm14, %v4016_v27, %v5409_v61 }
 0x8ba   : > { %v5418_v58 = vpop.permute.xlu1 %5417  ;;  %v7633_v2 = vpop.permute.xlu0 %5412  ;;  %v4039_v32 = vsel %vm1283_vm15, %v4031_v25, %v5394_v41  ;;  %v3982_v45 = vsel %vm1283_vm15, %v3974_v36, %v5395_v53 }
 0x8bb   : > { %v4047_v20 = vsel %vm3989_vm3, %v4039_v32, %v5384_v59  ;;  %v3991_v62 = vsel %vm3989_vm3, %v3982_v45, %v5385_v49  ;;  %v5420_v26 = vunpack.i.h.bf16 %v5418_v58  ;;  %v5419_v8 = vunpack.i.l.bf16 %v5418_v58 }
 0x8bc   : > { %4162 = vmatprep.mubr.f32.mxu0 %v4047_v20  ;;  %v5415_v58 = vunpack.i.h.bf16 %v7633_v2  ;;  %v5414_v25 = vunpack.i.l.bf16 %v7633_v2 }
 0x8bd   : > { %4163 = vmatmul.mubr.f32.gmra.mrb[42].mxu0 %v3991_v62 }
 0x8be   : > { %v5428_v43 = vpop.permute.xlu1 %5427  ;;  %v5423_v38 = vpop.permute.xlu0 %5422 }
 0x8bf   : > { %v5430_v24 = vunpack.i.h.bf16 %v5428_v43  ;;  %v5429_v7 = vunpack.i.l.bf16 %v5428_v43  ;;  %v5425_v19 = vunpack.i.h.bf16 %v5423_v38  ;;  %v5424_v10 = vunpack.i.l.bf16 %v5423_v38 }
 0x8c2   : > { %v5438_v31 = vpop.permute.xlu1 %5437  ;;  %v5433_v60 = vpop.permute.xlu0 %5432 }
 0x8c3   : > { %v5440_v1 = vunpack.i.h.bf16 %v5438_v31  ;;  %v5439_v0 = vunpack.i.l.bf16 %v5438_v31  ;;  %v5435_v42 = vunpack.i.h.bf16 %v5433_v60  ;;  %v5434_v51 = vunpack.i.l.bf16 %v5433_v60 }
 0x8c5   : > { %v4032_v17 = vsel %vm3972_vm2, %v4024_v3, %v5439_v0  ;;  %v3975_v21 = vsel %vm3972_vm2, %v3966_v28, %v5440_v1  ;;  %v3942_v34 = vsel %vm377_vm4, %v7493_v57, %v5435_v42  ;;  %v4001_v37 = vsel %vm377_vm4, %v7487_v5, %v5434_v51 }
 0x8c6   : > { %v7655_v44 = vpop.permute.xlu1 %5447  ;;  %v5443_v23 = vpop.permute.xlu0 %5442  ;;  %v4040_v11 = vsel %vm1283_vm15, %v4032_v17, %v5429_v7  ;;  %v3983_v6 = vsel %vm1283_vm15, %v3975_v21, %v5430_v24  ;;  %v3950_v53 = vsel %vm355_vm5, %v3942_v34, %v5425_v19  ;;  %v4009_v41 = vsel %vm355_vm5, %v4001_v37, %v5424_v10 }
 0x8c7   : > { %v4048_v56 = vsel %vm3989_vm3, %v4040_v11, %v5419_v8  ;;  %v3992_v14 = vsel %vm3989_vm3, %v3983_v6, %v5420_v26  ;;  %v5445_v36 = vunpack.i.h.bf16 %v5443_v23  ;;  %v5444_v49 = vunpack.i.l.bf16 %v5443_v23 }
 0x8c8   : > { %4167 = vmatprep.mubr.f32.mxu0 %v4048_v56  ;;  %v3959_v59 = vsel %vm3955_vm1, %v3950_v53, %v5415_v58  ;;  %v4017_v57 = vsel %vm3955_vm1, %v4009_v41, %v5414_v25  ;;  %v5450_v7 = vunpack.i.h.bf16 %v7655_v44 }
 0x8c9   : > { %4168 = vmatmul.mubr.f32.gmra.mrb[44].mxu0 %v3992_v14  ;;  %v3967_v45 = vsel %vm1274_vm14, %v3959_v59, %v5445_v36  ;;  %v4025_v20 = vsel %vm1274_vm14, %v4017_v57, %v5444_v49 }
 0x8ca   : > { %v5458_v22 = vpop.permute.xlu1 %5457  ;;  %v5453_v48 = vpop.permute.xlu0 %5452 }
 0x8cb   : > { %v5455_v15 = vunpack.i.h.bf16 %v5453_v48  ;;  %v5454_v33 = vunpack.i.l.bf16 %v5453_v48  ;;  %v5460_v63 = vunpack.i.h.bf16 %v5458_v22  ;;  %v5459_v27 = vunpack.i.l.bf16 %v5458_v22 }
 0x8ce   : > { %v5468_v9 = vpop.permute.xlu1 %5467  ;;  %v5463_v55 = vpop.permute.xlu0 %5462 }
 0x8cf   : > { %v5470_v12 = vunpack.i.h.bf16 %v5468_v9  ;;  %v5469_v50 = vunpack.i.l.bf16 %v5468_v9  ;;  %v5465_v62 = vunpack.i.h.bf16 %v5463_v55  ;;  %v5464_v30 = vunpack.i.l.bf16 %v5463_v55 }
 0x8d1   : > { %v3943_v52 = vsel %vm377_vm4, %v7523_v35, %v5470_v12  ;;  %v4002_v61 = vsel %vm377_vm4, %v7516_v13, %v5469_v50  ;;  %v5449_v13 = vunpack.i.l.bf16 %v7655_v44 }
 0x8d2   : > { %v5478_v39 = vpop.permute.xlu1 %5477  ;;  %v5473_v5 = vpop.permute.xlu0 %5472  ;;  %v3951_v28 = vsel %vm355_vm5, %v3943_v52, %v5460_v63  ;;  %v4010_v3 = vsel %vm355_vm5, %v4002_v61, %v5459_v27 }
 0x8d3   : > { %v5475_v4 = vunpack.i.h.bf16 %v5473_v5  ;;  %v5474_v32 = vunpack.i.l.bf16 %v5473_v5  ;;  %v5480_v17 = vunpack.i.h.bf16 %v5478_v39  ;;  %v5479_v21 = vunpack.i.l.bf16 %v5478_v39 }
 0x8d4   : > { %v3960_v26 = vsel %vm3955_vm1, %v3951_v28, %v5450_v7  ;;  %v4018_v8 = vsel %vm3955_vm1, %v4010_v3, %v5449_v13 }
 0x8d5   : > { %v4033_v43 = vsel %vm3972_vm2, %v4025_v20, %v5474_v32  ;;  %v3976_v38 = vsel %vm3972_vm2, %v3967_v45, %v5475_v4  ;;  %v3968_v51 = vsel %vm1274_vm14, %v3960_v26, %v5480_v17  ;;  %v4026_v56 = vsel %vm1274_vm14, %v4018_v8, %v5479_v21 }
 0x8d6   : > { %v5488_v16 = vpop.permute.xlu1 %5487  ;;  %v7673_v2 = vpop.permute.xlu0 %5482  ;;  %v4041_v31 = vsel %vm1283_vm15, %v4033_v43, %v5464_v30  ;;  %v3984_v60 = vsel %vm1283_vm15, %v3976_v38, %v5465_v62 }
 0x8d7   : > { %v4049_v1 = vsel %vm3989_vm3, %v4041_v31, %v5454_v33  ;;  %v3993_v0 = vsel %vm3989_vm3, %v3984_v60, %v5455_v15  ;;  %v5490_v34 = vunpack.i.h.bf16 %v5488_v16  ;;  %v5489_v37 = vunpack.i.l.bf16 %v5488_v16 }
 0x8d8   : > { %4172 = vmatprep.mubr.f32.mxu0 %v4049_v1  ;;  %v5485_v45 = vunpack.i.h.bf16 %v7673_v2  ;;  %v5484_v20 = vunpack.i.l.bf16 %v7673_v2 }
 0x8d9   : > { %4173 = vmatmul.mubr.f32.gmra.mrb[46].mxu0 %v3993_v0 }
 0x8da   : > { %v5498_v24 = vpop.permute.xlu1 %5497  ;;  %v5493_v35 = vpop.permute.xlu0 %5492 }
 0x8db   : > { %v5500_v14 = vunpack.i.h.bf16 %v5498_v24  ;;  %v5499_v22 = vunpack.i.l.bf16 %v5498_v24  ;;  %v5495_v39 = vunpack.i.h.bf16 %v5493_v35  ;;  %v5494_v5 = vunpack.i.l.bf16 %v5493_v35 }
 0x8de   : > { %v5508_v23 = vpop.permute.xlu1 %5507  ;;  %v5503_v11 = vpop.permute.xlu0 %5502 }
 0x8df   : > { %v5510_v6 = vunpack.i.h.bf16 %v5508_v23  ;;  %v5509_v42 = vunpack.i.l.bf16 %v5508_v23  ;;  %v5505_v53 = vunpack.i.h.bf16 %v5503_v11  ;;  %v5504_v41 = vunpack.i.l.bf16 %v5503_v11 }
 0x8e1   : > { %v4034_v48 = vsel %vm3972_vm2, %v4026_v56, %v5509_v42  ;;  %v3977_v44 = vsel %vm3972_vm2, %v3968_v51, %v5510_v6  ;;  %v3944_v59 = vsel %vm377_vm4, %v7539_v29, %v5505_v53  ;;  %v4003_v57 = vsel %vm377_vm4, %v7534_v47, %v5504_v41 }
 0x8e2   : > { %v5518_v19 = vpop.permute.xlu1 %5517  ;;  %v5513_v10 = vpop.permute.xlu0 %5512  ;;  %v4042_v9 = vsel %vm1283_vm15, %v4034_v48, %v5499_v22  ;;  %v3985_v55 = vsel %vm1283_vm15, %v3977_v44, %v5500_v14  ;;  %v3952_v4 = vsel %vm355_vm5, %v3944_v59, %v5495_v39  ;;  %v4011_v32 = vsel %vm355_vm5, %v4003_v57, %v5494_v5 }
 0x8e3   : > { %v4050_v58 = vsel %vm3989_vm3, %v4042_v9, %v5489_v37  ;;  %v3994_v25 = vsel %vm3989_vm3, %v3985_v55, %v5490_v34  ;;  %v5515_v16 = vunpack.i.h.bf16 %v5513_v10  ;;  %v5514_v43 = vunpack.i.l.bf16 %v5513_v10 }
 0x8e4   : > { %4177 = vmatprep.mubr.f32.mxu0 %v4050_v58  ;;  %v3961_v29 = vsel %vm3955_vm1, %v3952_v4, %v5485_v45  ;;  %v4019_v47 = vsel %vm3955_vm1, %v4011_v32, %v5484_v20  ;;  %v5520_v17 = vunpack.i.h.bf16 %v5518_v19  ;;  %v5519_v21 = vunpack.i.l.bf16 %v5518_v19 }
 0x8e5   : > { %4178 = vmatmul.mubr.f32.gmra.mrb[48].mxu0 %v3994_v25  ;;  %v3969_v2 = vsel %vm1274_vm14, %v3961_v29, %v5515_v16  ;;  %v4027_v27 = vsel %vm1274_vm14, %v4019_v47, %v5514_v43 }
 0x8e6   : > { %v5528_v36 = vpop.permute.xlu1 %5527  ;;  %v5523_v49 = vpop.permute.xlu0 %5522 }
 0x8e7   : > { %v5530_v31 = vunpack.i.h.bf16 %v5528_v36  ;;  %v5529_v60 = vunpack.i.l.bf16 %v5528_v36  ;;  %v5524_v7 = vunpack.i.l.bf16 %v5523_v49 }
 0x8ea   : > { %v5538_v12 = vpop.permute.xlu1 %5537  ;;  %v5533_v50 = vpop.permute.xlu0 %5532 }
 0x8eb   : > { %v5540_v62 = vunpack.i.h.bf16 %v5538_v12  ;;  %v5539_v30 = vunpack.i.l.bf16 %v5538_v12  ;;  %v5535_v1 = vunpack.i.h.bf16 %v5533_v50  ;;  %v5534_v0 = vunpack.i.l.bf16 %v5533_v50 }
 0x8ed   : > { %v3945_v33 = vsel %vm377_vm4, %v7561_v18, %v5540_v62  ;;  %v4004_v52 = vsel %vm377_vm4, %v7555_v46, %v5539_v30  ;;  %v5525_v18 = vunpack.i.h.bf16 %v5523_v49 }
 0x8ee   : > { %v5548_v38 = vpop.permute.xlu1 %5547  ;;  %v5543_v15 = vpop.permute.xlu0 %5542  ;;  %v3953_v46 = vsel %vm355_vm5, %v3945_v33, %v5530_v31  ;;  %v4012_v13 = vsel %vm355_vm5, %v4004_v52, %v5529_v60 }
 0x8ef   : > { %v5545_v61 = vunpack.i.h.bf16 %v5543_v15  ;;  %v5544_v63 = vunpack.i.l.bf16 %v5543_v15  ;;  %v5550_v23 = vunpack.i.h.bf16 %v5548_v38  ;;  %v5549_v11 = vunpack.i.l.bf16 %v5548_v38 }
 0x8f0   : > { %v3962_v51 = vsel %vm3955_vm1, %v3953_v46, %v5520_v17  ;;  %v4020_v56 = vsel %vm3955_vm1, %v4012_v13, %v5519_v21 }
 0x8f1   : > { %v4035_v24 = vsel %vm3972_vm2, %v4027_v27, %v5544_v63  ;;  %v3978_v35 = vsel %vm3972_vm2, %v3969_v2, %v5545_v61  ;;  %v3970_v48 = vsel %vm1274_vm14, %v3962_v51, %v5550_v23  ;;  %v4028_v44 = vsel %vm1274_vm14, %v4020_v56, %v5549_v11 }
 0x8f2   : > { %v5558_v28 = vpop.permute.xlu1 %5557  ;;  %v5553_v3 = vpop.permute.xlu0 %5552  ;;  %v4043_v26 = vsel %vm1283_vm15, %v4035_v24, %v5534_v0  ;;  %v3986_v8 = vsel %vm1283_vm15, %v3978_v35, %v5535_v1 }
 0x8f3   : > { %v4051_v6 = vsel %vm3989_vm3, %v4043_v26, %v5524_v7  ;;  %v3995_v42 = vsel %vm3989_vm3, %v3986_v8, %v5525_v18  ;;  %v5560_v34 = vunpack.i.h.bf16 %v5558_v28  ;;  %v5559_v37 = vunpack.i.l.bf16 %v5558_v28  ;;  %v4359_v7 = vld [vmem:[%s7778_s8] ss:$0 sm:$0xff] }
 0x8f4   : > { %4182 = vmatprep.mubr.f32.mxu0 %v4051_v6  ;;  %v5555_v19 = vunpack.i.h.bf16 %v5553_v3  ;;  %v5554_v10 = vunpack.i.l.bf16 %v5553_v3 }
 0x8f5   : > { %4183 = vmatmul.mubr.f32.gmra.mrb[50].mxu0 %v3995_v42 }
 0x8f6   : > { %v5568_v14 = vpop.permute.xlu1 %5567  ;;  %v5563_v22 = vpop.permute.xlu0 %5562 }
 0x8f7   : > { %v5570_v36 = vunpack.i.h.bf16 %v5568_v14  ;;  %v5569_v49 = vunpack.i.l.bf16 %v5568_v14  ;;  %v5565_v59 = vunpack.i.h.bf16 %v5563_v22  ;;  %v5564_v57 = vunpack.i.l.bf16 %v5563_v22 }
 0x8fa   : > { %v5578_v9 = vpop.permute.xlu1 %5577  ;;  %v5573_v55 = vpop.permute.xlu0 %5572 }
 0x8fb   : > { %v5580_v53 = vunpack.i.h.bf16 %v5578_v9  ;;  %v5579_v41 = vunpack.i.l.bf16 %v5578_v9  ;;  %v5575_v58 = vunpack.i.h.bf16 %v5573_v55  ;;  %v5574_v25 = vunpack.i.l.bf16 %v5573_v55 }
 0x8fd   : > { %v3946_v39 = vsel %vm377_vm4, %v7577_v40, %v5575_v58  ;;  %v4005_v5 = vsel %vm377_vm4, %v7572_v54, %v5574_v25  ;;  %v4036_v12 = vsel %vm3972_vm2, %v4028_v44, %v5579_v41  ;;  %v3979_v50 = vsel %vm3972_vm2, %v3970_v48, %v5580_v53 }
 0x8fe   : > { %v3954_v4 = vsel %vm355_vm5, %v3946_v39, %v5565_v59  ;;  %v4013_v32 = vsel %vm355_vm5, %v4005_v5, %v5564_v57  ;;  %v5588_v45 = vpop.permute.xlu1 %5587  ;;  %v5583_v20 = vpop.permute.xlu0 %5582  ;;  %v4044_v62 = vsel %vm1283_vm15, %v4036_v12, %v5569_v49  ;;  %v3987_v30 = vsel %vm1283_vm15, %v3979_v50, %v5570_v36 }
 0x8ff   : > { %v5590_v16 = vunpack.i.h.bf16 %v5588_v45  ;;  %v5589_v43 = vunpack.i.l.bf16 %v5588_v45  ;;  %v5585_v40 = vunpack.i.h.bf16 %v5583_v20  ;;  %v5584_v29 = vunpack.i.l.bf16 %v5583_v20 }
 0x900   : > { %v3963_v54 = vsel %vm3955_vm1, %v3954_v4, %v5555_v19  ;;  %v4021_v47 = vsel %vm3955_vm1, %v4013_v32, %v5554_v10  ;;  %v4052_v38 = vsel %vm3989_vm3, %v4044_v62, %v5559_v37  ;;  %v3996_v15 = vsel %vm3989_vm3, %v3987_v30, %v5560_v34 }
 0x901   : > { %v3971_v33 = vsel %vm1274_vm14, %v3963_v54, %v5585_v40  ;;  %v4029_v52 = vsel %vm1274_vm14, %v4021_v47, %v5584_v29  ;;  %4187 = vmatprep.mubr.f32.mxu0 %v4052_v38 }
 0x902   : > { %4188 = vmatmul.mubr.f32.gmra.mrb[52].mxu0 %v3996_v15  ;;  %v5598_v61 = vpop.permute.xlu1 %5597  ;;  %v5593_v63 = vpop.permute.xlu0 %5592  ;;  %v4037_v1 = vsel %vm3972_vm2, %v4029_v52, %v5589_v43  ;;  %v3980_v0 = vsel %vm3972_vm2, %v3971_v33, %v5590_v16 }
 0x903   : > { %v5600_v2 = vunpack.i.h.bf16 %v5598_v61  ;;  %v5599_v27 = vunpack.i.l.bf16 %v5598_v61  ;;  %v5595_v31 = vunpack.i.h.bf16 %v5593_v63  ;;  %v5594_v60 = vunpack.i.l.bf16 %v5593_v63 }
 0x905   : > { %v4045_v28 = vsel %vm1283_vm15, %v4037_v1, %v5594_v60  ;;  %v3988_v3 = vsel %vm1283_vm15, %v3980_v0, %v5595_v31 }
 0x906   : > { %v4053_v24 = vsel %vm3989_vm3, %v4045_v28, %v5599_v27  ;;  %v3997_v35 = vsel %vm3989_vm3, %v3988_v3, %v5600_v2 }
 0x907   : > { %4192 = vmatprep.mubr.f32.mxu0 %v4053_v24 }
 0x908   : > { %4193 = vmatmul.mubr.f32.gmra.mrb[54].mxu0 %v3997_v35 }
 0x980   : > { %v4633_v18 = vpop.f32.mrb[40].mxu0 }
 0x981   : > { %v4634_v46 = vpop.f32.mrb[41].mxu0 }
 0x982   : > { %v4635_v13 = vadd.f32 %v4634_v46, %v4633_v18 }
 0x984   : > { %v4160_v17 = vadd.f32 %v4635_v13, %v4359_v7 }
 0x986   : > { %4198 = vst [vmem:[%s7757_s28] sm:$0xff] %v4160_v17 }
 0x990   : > { %v4636_v21 = vpop.f32.mrb[42].mxu0 }
 0x991   : > { %v4637_v26 = vpop.f32.mrb[43].mxu0 }
 0x992   : > { %v4638_v8 = vadd.f32 %v4637_v26, %v4636_v21 }
 0x994   : > { %v4165_v23 = vadd.f32 %v4638_v8, %v4359_v7 }
 0x996   : > { %4199 = vst [vmem:[%s7757_s28 + $0x8] sm:$0xff] %v4165_v23 }
 0x99c   : > { %v4639_v11 = vpop.f32.mrb[44].mxu0 }
 0x99d   : > { %v4640_v6 = vpop.f32.mrb[45].mxu0 }
 0x99e   : > { %v4641_v42 = vadd.f32 %v4640_v6, %v4639_v11 }
 0x9a0   : > { %v4170_v51 = vadd.f32 %v4641_v42, %v4359_v7 }
 0x9a2   : > { %4200 = vst [vmem:[%s7757_s28 + $0x10] sm:$0xff] %v4170_v51 }
 0x9ac   : > { %v4642_v56 = vpop.f32.mrb[46].mxu0 }
 0x9ad   : > { %v4643_v14 = vpop.f32.mrb[47].mxu0 }
 0x9ae   : > { %v4644_v22 = vadd.f32 %v4643_v14, %v4642_v56 }
 0x9b0   : > { %v4175_v48 = vadd.f32 %v4644_v22, %v4359_v7 }
 0x9b2   : > { %4201 = vst [vmem:[%s7757_s28 + $0x18] sm:$0xff] %v4175_v48 }
 0x9b8   : > { %v4645_v44 = vpop.f32.mrb[48].mxu0 }
 0x9b9   : > { %v4646_v34 = vpop.f32.mrb[49].mxu0 }
 0x9ba   : > { %v4647_v37 = vadd.f32 %v4646_v34, %v4645_v44 }
 0x9bc   : > { %v4180_v19 = vadd.f32 %v4647_v37, %v4359_v7 }
 0x9be   : > { %4202 = vst [vmem:[%s7757_s28 + $0x20] sm:$0xff] %v4180_v19 }
 0x9c8   : > { %v4648_v10 = vpop.f32.mrb[50].mxu0 }
 0x9c9   : > { %v4649_v9 = vpop.f32.mrb[51].mxu0 }
 0x9ca   : > { %v4650_v55 = vadd.f32 %v4649_v9, %v4648_v10 }
 0x9cc   : > { %v4185_v53 = vadd.f32 %v4650_v55, %v4359_v7 }
 0x9ce   : > { %4203 = vst [vmem:[%s7757_s28 + $0x28] sm:$0xff] %v4185_v53 }
 0x9d5   : > { %v4651_v41 = vpop.f32.mrb[52].mxu0 }
 0x9d6   : > { %v4652_v58 = vpop.f32.mrb[53].mxu0 }
 0x9d7   : > { %v4653_v25 = vadd.f32 %v4652_v58, %v4651_v41 }
 0x9d9   : > { %v4190_v36 = vadd.f32 %v4653_v25, %v4359_v7 }
 0x9db   : > { %4204 = vst [vmem:[%s7757_s28 + $0x30] sm:$0xff] %v4190_v36  ;;  %v4654_v49 = vpop.f32.mrb[54].mxu0 }
 0x9dc   : > { %v4655_v59 = vpop.f32.mrb[55].mxu0 }
 0x9dd   : > { %v4656_v57 = vadd.f32 %v4655_v59, %v4654_v49 }
 0x9df   : > { %v4195_v39 = vadd.f32 %v4656_v57, %v4359_v7 }
 0x9e1   : > { %4205 = vst [vmem:[%s7757_s28 + $0x38] sm:$0xff] %v4195_v39 }
 0x9e2 PF: > { %s19_s30 = sadd.s32 1, %s5609_s30  }
 0x9e3   : > { %p16_p4 = scmp.ge.s32.totalorder %s19_s30, 4  }
 0x9e5   :  { %18 = sbr.rel (!%p16_p4) target bundleno = 1 (0x1), region = 94 }

</bundles_post_ra>
